<compile_context>
chip_gen: v7x
topology: tpu7x:2x2x1
jax: 0.10.0
libtpu: 0.0.40
codegen_flags: <defaults>
</compile_context>

<pallas_src>
from functools import partial

import jax
import jax.numpy as jnp
from jax import lax
from jax.experimental import pallas as pl
from jax.experimental.pallas import tpu as pltpu

IMG_SHAPE = (1, 28, 28)
OUT_FEATURES = 28 * 28        # 784
OUT_PADDED = 7 * 128          # 896 -> lane-dense output stores
LATENT = 100
LATENT_PADDED = 128           # aligned K for the first matmul
EPS = 1e-5
SLOPE = 0.2
TB_DEFAULT = 256              # batch-tile rows (fills MXU M dim, fits v7x VMEM)


def _leaky_relu(v):
    return jnp.where(v >= 0, v, SLOPE * v)


def _round_up(n, m):
    return ((n + m - 1) // m) * m


# --------------------------------------------------------------------------- #
# Kernel
# --------------------------------------------------------------------------- #
def generator_kernel(x_ref,
                     w1_ref, b1_ref,
                     w2_ref, g2_ref, be2_ref,
                     w3_ref, g3_ref, be3_ref,
                     w4_ref, b4_ref,
                     o_ref,
                     s2_ref, ss2_ref, s3_ref, ss3_ref,
                     *, batch_size, padded_batch, tile_rows):
    """3-phase schedule over (phase, batch_tile):
         phase 0: accumulate fc2-output sum/sumsq   (BN2 stats)
         phase 1: apply BN2, accumulate fc3 stats   (BN3 stats)
         phase 2: apply BN3, fc4 + tanh, store tile
       Weights are VMEM-resident; the cheap front is recomputed per phase so no
       (B, 512)/(B, 1024) activations ever round-trip through HBM."""
    phase = pl.program_id(0)
    tile = pl.program_id(1)
    inv_b = 1.0 / batch_size            # GLOBAL batch size (trace-time const)

    def bf16_dot(a, w_ref):
        # bf16 MXU operands, f32 accumulation.
        return jnp.dot(a.astype(jnp.bfloat16), w_ref[...],
                       preferred_element_type=jnp.float32)

    def masked_for_stats(z):
        # Zero out padded tail rows so they don't pollute BN statistics.
        if padded_batch == batch_size:
            return z
        row = tile * tile_rows + lax.broadcasted_iota(
            jnp.int32, (tile_rows, 1), 0)
        return jnp.where(row < batch_size, z, 0.0)

    def bn_scale_shift(s_ref, ss_ref, g_ref, be_ref):
        # Training-mode BatchNorm (biased variance) as a fused scale/shift.
        mu = s_ref[...] * inv_b
        var = ss_ref[...] * inv_b - mu * mu
        scale = g_ref[...] * lax.rsqrt(var + EPS)      # rsqrt -> EUP slot
        shift = be_ref[...] - mu * scale
        return scale, shift

    # Cheap front of the network, recomputed every phase (weights resident).
    x = x_ref[...]                                               # (TB, 128)
    h1 = _leaky_relu(bf16_dot(x, w1_ref) + b1_ref[...])          # (TB, 128)
    z2 = bf16_dot(h1, w2_ref)      # fc2 bias cancelled by BN mean subtraction

    @pl.when(phase == 0)
    def _():
        @pl.when(tile == 0)
        def _():
            s2_ref[...] = jnp.zeros_like(s2_ref)
            ss2_ref[...] = jnp.zeros_like(ss2_ref)
            s3_ref[...] = jnp.zeros_like(s3_ref)
            ss3_ref[...] = jnp.zeros_like(ss3_ref)
        zm = masked_for_stats(z2)
        s2_ref[...] += jnp.sum(zm, axis=0, keepdims=True)
        ss2_ref[...] += jnp.sum(zm * zm, axis=0, keepdims=True)

    @pl.when(phase >= 1)
    def _():
        sc2, sh2 = bn_scale_shift(s2_ref, ss2_ref, g2_ref, be2_ref)
        h2 = _leaky_relu(z2 * sc2 + sh2)                         # (TB, 512)
        z3 = bf16_dot(h2, w3_ref)  # fc3 bias cancelled by BN mean subtraction

        @pl.when(phase == 1)
        def _():
            zm = masked_for_stats(z3)
            s3_ref[...] += jnp.sum(zm, axis=0, keepdims=True)
            ss3_ref[...] += jnp.sum(zm * zm, axis=0, keepdims=True)

        @pl.when(phase == 2)
        def _():
            sc3, sh3 = bn_scale_shift(s3_ref, ss3_ref, g3_ref, be3_ref)
            h3 = _leaky_relu(z3 * sc3 + sh3)                     # (TB, 1024)
            # Padded output columns are zeros -> tanh(0)=0; sliced in wrapper.
            y = jnp.tanh(bf16_dot(h3, w4_ref) + b4_ref[...])     # (TB, 896)
            o_ref[...] = y.astype(o_ref.dtype)


# --------------------------------------------------------------------------- #
# Wrapper
# --------------------------------------------------------------------------- #
def prepare_params(params):
    """One-time pad/cast of f32 (in_features, out_features) params for the kernel."""
    w1 = jnp.pad(params["w1"], ((0, LATENT_PADDED - LATENT), (0, 0))).astype(jnp.bfloat16)
    w2 = params["w2"].astype(jnp.bfloat16)
    w3 = params["w3"].astype(jnp.bfloat16)
    w4 = jnp.pad(params["w4"], ((0, 0), (0, OUT_PADDED - OUT_FEATURES))).astype(jnp.bfloat16)
    b4 = jnp.pad(params["b4"], ((0, 0), (0, OUT_PADDED - OUT_FEATURES)))
    return (w1, params["b1"],
            w2, params["g2"], params["be2"],
            w3, params["g3"], params["be3"],
            w4, b4)


@partial(jax.jit, static_argnames=("tile_rows",))
def generator_forward(x, prepared, tile_rows=None):
    """x: (B, 100) f32 latent. prepared: output of prepare_params. -> (B, 1, 28, 28) f32."""
    B = x.shape[0]
    tb = tile_rows if tile_rows is not None else min(TB_DEFAULT, _round_up(B, 8))
    num_tiles = -(-B // tb)
    B_pad = num_tiles * tb

    x_p = jnp.pad(x, ((0, B_pad - B), (0, LATENT_PADDED - LATENT)))
    args = (x_p,) + tuple(prepared)

    kernel = partial(generator_kernel,
                     batch_size=B, padded_batch=B_pad, tile_rows=tb)

    resident = lambda p, i: (0, 0)      # weights/params: DMA once, stay in VMEM
    grid_spec = pltpu.PrefetchScalarGridSpec(
        num_scalar_prefetch=0,
        grid=(3, num_tiles),            # (phase, batch tile); tile axis fastest
        in_specs=[
            pl.BlockSpec((tb, LATENT_PADDED), lambda p, i: (i, 0)),   # x
            pl.BlockSpec((LATENT_PADDED, 128), resident),             # w1
            pl.BlockSpec((1, 128), resident),                         # b1
            pl.BlockSpec((128, 512), resident),                       # w2
            pl.BlockSpec((1, 512), resident),                         # g2
            pl.BlockSpec((1, 512), resident),                         # be2
            pl.BlockSpec((512, 1024), resident),                      # w3
            pl.BlockSpec((1, 1024), resident),                        # g3
            pl.BlockSpec((1, 1024), resident),                        # be3
            pl.BlockSpec((1024, OUT_PADDED), resident),               # w4
            pl.BlockSpec((1, OUT_PADDED), resident),                  # b4
        ],
        out_specs=pl.BlockSpec((tb, OUT_PADDED), lambda p, i: (i, 0)),
        scratch_shapes=[pltpu.VMEM((1, 512), jnp.float32),    # sum(z2)
                        pltpu.VMEM((1, 512), jnp.float32),    # sum(z2^2)
                        pltpu.VMEM((1, 1024), jnp.float32),   # sum(z3)
                        pltpu.VMEM((1, 1024), jnp.float32)],  # sum(z3^2)
    )

    macs_per_row = (3 * (LATENT_PADDED * 128 + 128 * 512)
                    + 2 * (512 * 1024)
                    + 1024 * OUT_PADDED)
    flops = int(2 * B_pad * macs_per_row)
    bytes_accessed = int(sum(a.size * a.dtype.itemsize for a in prepared)
                         + 3 * x_p.size * 4 + B_pad * OUT_PADDED * 2)
    transcendentals = int(B_pad * OUT_PADDED + num_tiles * (2 * 512 + 1024))

    out = pl.pallas_call(
        kernel,
        out_shape=jax.ShapeDtypeStruct((B_pad, OUT_PADDED), jnp.bfloat16),
        grid_spec=grid_spec,
        compiler_params=pltpu.CompilerParams(
            dimension_semantics=("arbitrary", "arbitrary"),
            vmem_limit_bytes=48 * 1024 * 1024),
        cost_estimate=pl.CostEstimate(flops=flops,
                                      transcendentals=transcendentals,
                                      bytes_accessed=bytes_accessed),
    )(*args)

    # bf16 kernel output; slice + reshape + f32 convert fuse into one XLA copy
    # that only *reads* bf16 (half the traffic of the old f32 path).
    return out[:B, :OUT_FEATURES].astype(jnp.float32).reshape(B, *IMG_SHAPE)


# --------------------------------------------------------------------------- #
# Params + references
# --------------------------------------------------------------------------- #
def init_params(key):
    """Deterministic synthetic weights, PyTorch-Linear-style uniform(+-1/sqrt(fan_in))."""
    dims = [(100, 128), (128, 512), (512, 1024), (1024, OUT_FEATURES)]
    keys = jax.random.split(key, 2 * len(dims))
    params = {}
    for i, (fin, fout) in enumerate(dims):
        bound = 1.0 / (fin ** 0.5)
        params[f"w{i+1}"] = jax.random.uniform(keys[2 * i], (fin, fout), jnp.float32, -bound, bound)
        params[f"b{i+1}"] = jax.random.uniform(keys[2 * i + 1], (1, fout), jnp.float32, -bound, bound)
    params["g2"] = jnp.ones((1, 512), jnp.float32)
    params["be2"] = jnp.zeros((1, 512), jnp.float32)
    params["g3"] = jnp.ones((1, 1024), jnp.float32)
    params["be3"] = jnp.zeros((1, 1024), jnp.float32)
    return params


def _reference_same_precision(x, prepared):
    """Pure-JAX reference with the exact kernel math (bf16 dot operands, fused BN,
    bf16 output quantization)."""
    (w1, b1, w2, g2, be2, w3, g3, be3, w4, b4) = prepared
    B = x.shape[0]
    inv_b = 1.0 / B
    x_p = jnp.pad(x, ((0, 0), (0, LATENT_PADDED - LATENT)))

    def dot(a, w):
        return jnp.dot(a.astype(jnp.bfloat16), w, preferred_element_type=jnp.float32)

    def bn_lrelu(z, gamma, beta):
        mu = jnp.sum(z, axis=0, keepdims=True) * inv_b
        var = jnp.sum(z * z, axis=0, keepdims=True) * inv_b - mu * mu
        scale = gamma * lax.rsqrt(var + EPS)
        return _leaky_relu(z * scale + (beta - mu * scale))

    h1 = _leaky_relu(dot(x_p, w1) + b1)
    h2 = bn_lrelu(dot(h1, w2), g2, be2)
    h3 = bn_lrelu(dot(h2, w3), g3, be3)
    y = jnp.tanh(dot(h3, w4) + b4).astype(jnp.bfloat16).astype(jnp.float32)
    return y[:, :OUT_FEATURES].reshape(B, *IMG_SHAPE)


def _reference_f32_faithful(x, p):
    """Full-precision faithful reference (PyTorch semantics, incl. fc2/fc3 biases)."""
    def bn(z, gamma, beta):
        mu = jnp.mean(z, axis=0, keepdims=True)
        var = jnp.mean((z - mu) * (z - mu), axis=0, keepdims=True)
        return gamma * (z - mu) * lax.rsqrt(var + EPS) + beta

    h1 = _leaky_relu(x @ p["w1"] + p["b1"])
    h2 = _leaky_relu(bn(h1 @ p["w2"] + p["b2"], p["g2"], p["be2"]))
    h3 = _leaky_relu(bn(h2 @ p["w3"] + p["b3"], p["g3"], p["be3"]))
    y = jnp.tanh(h3 @ p["w4"] + p["b4"])
    return y.reshape(x.shape[0], *IMG_SHAPE)


if __name__ == "__main__":
    key = jax.random.PRNGKey(0)
    k_x, k_p = jax.random.split(key)

    params = init_params(k_p)
    prepared = prepare_params(params)

    # Case 1: small batch, single batch tile.
    B1 = 8
    x1 = jax.random.normal(k_x, (B1, LATENT), jnp.float32)
    out1 = jax.block_until_ready(generator_forward(x1, prepared))
    assert out1.shape == (B1, *IMG_SHAPE), out1.shape
    ref1b = _reference_same_precision(x1, prepared)
    assert jnp.allclose(out1, ref1b, atol=1e-2), float(jnp.max(jnp.abs(out1 - ref1b)))
    ref1f = _reference_f32_faithful(x1, params)
    assert jnp.allclose(out1, ref1f, atol=7e-2), float(jnp.max(jnp.abs(out1 - ref1f)))

    # Case 2: forces multiple batch tiles (tile_rows=8 -> 3 tiles) plus a padded
    # tail (B=20 -> B_pad=24) to exercise cross-tile BatchNorm accumulation and
    # the tail-row masking.
    B2 = 20
    x2 = jax.random.normal(jax.random.PRNGKey(1), (B2, LATENT), jnp.float32)
    out2 = jax.block_until_ready(generator_forward(x2, prepared, tile_rows=8))
    assert out2.shape == (B2, *IMG_SHAPE), out2.shape
    ref2b = _reference_same_precision(x2, prepared)
    assert jnp.allclose(out2, ref2b, atol=1e-2), float(jnp.max(jnp.abs(out2 - ref2b)))
    ref2f = _reference_f32_faithful(x2, params)
    assert jnp.allclose(out2, ref2f, atol=7e-2), float(jnp.max(jnp.abs(out2 - ref2f)))

    print("KERNEL_OK")
</pallas_src>

<mosaic_0001>
module attributes {stable_mosaic.version = 11 : i64} {
  func.func @generator_kernel(%arg0: i32, %arg1: i32, %arg2: memref<8x128xf32, #tpu.memory_space<vmem>>, %arg3: memref<128x128xbf16, #tpu.memory_space<vmem>>, %arg4: memref<1x128xf32, #tpu.memory_space<vmem>>, %arg5: memref<128x512xbf16, #tpu.memory_space<vmem>>, %arg6: memref<1x512xf32, #tpu.memory_space<vmem>>, %arg7: memref<1x512xf32, #tpu.memory_space<vmem>>, %arg8: memref<512x1024xbf16, #tpu.memory_space<vmem>>, %arg9: memref<1x1024xf32, #tpu.memory_space<vmem>>, %arg10: memref<1x1024xf32, #tpu.memory_space<vmem>>, %arg11: memref<1024x896xbf16, #tpu.memory_space<vmem>>, %arg12: memref<1x896xf32, #tpu.memory_space<vmem>>, %arg13: memref<8x896xbf16, #tpu.memory_space<vmem>>, %arg14: memref<1x512xf32, #tpu.memory_space<vmem>>, %arg15: memref<1x512xf32, #tpu.memory_space<vmem>>, %arg16: memref<1x1024xf32, #tpu.memory_space<vmem>>, %arg17: memref<1x1024xf32, #tpu.memory_space<vmem>>) attributes {dimension_semantics = [#tpu.dimension_semantics<arbitrary>, #tpu.dimension_semantics<arbitrary>], iteration_bounds = array<i64: 3, 1>, scalar_prefetch = 0 : i64, scratch_operands = 4 : i64, tpu.core_type = #tpu.core_type<tc>, window_params = [{transform_indices = @transform_0, window_bounds = array<i64: 8, 128>}, {pipeline_mode = #tpu.pipeline_mode<synchronous>, transform_indices = @transform_1, window_bounds = array<i64: 128, 128>}, {pipeline_mode = #tpu.pipeline_mode<synchronous>, transform_indices = @transform_2, window_bounds = array<i64: 1, 128>}, {pipeline_mode = #tpu.pipeline_mode<synchronous>, transform_indices = @transform_3, window_bounds = array<i64: 128, 512>}, {pipeline_mode = #tpu.pipeline_mode<synchronous>, transform_indices = @transform_4, window_bounds = array<i64: 1, 512>}, {pipeline_mode = #tpu.pipeline_mode<synchronous>, transform_indices = @transform_5, window_bounds = array<i64: 1, 512>}, {pipeline_mode = #tpu.pipeline_mode<synchronous>, transform_indices = @transform_6, window_bounds = array<i64: 512, 1024>}, {pipeline_mode = #tpu.pipeline_mode<synchronous>, transform_indices = @transform_7, window_bounds = array<i64: 1, 1024>}, {pipeline_mode = #tpu.pipeline_mode<synchronous>, transform_indices = @transform_8, window_bounds = array<i64: 1, 1024>}, {pipeline_mode = #tpu.pipeline_mode<synchronous>, transform_indices = @transform_9, window_bounds = array<i64: 1024, 896>}, {pipeline_mode = #tpu.pipeline_mode<synchronous>, transform_indices = @transform_10, window_bounds = array<i64: 1, 896>}, {transform_indices = @transform_11, window_bounds = array<i64: 8, 896>}]} {
    %c0 = arith.constant 0 : index
    %c0_0 = arith.constant 0 : index
    %0 = vector.load %arg2[%c0, %c0_0] : memref<8x128xf32, #tpu.memory_space<vmem>>, vector<8x128xf32>
    %1 = arith.truncf %0 : vector<8x128xf32> to vector<8x128xbf16>
    %c0_1 = arith.constant 0 : index
    %c0_2 = arith.constant 0 : index
    %2 = vector.load %arg3[%c0_1, %c0_2] : memref<128x128xbf16, #tpu.memory_space<vmem>>, vector<128x128xbf16>
    %cst = arith.constant dense<0.000000e+00> : vector<8x128xf32>
    %3 = tpu.matmul %1, %2, %cst {dimension_numbers = #tpu.dot_dimension_numbers<[1], [0], [0], [1], [0, 0, 1, 1], [], []>} : vector<8x128xbf16>, vector<128x128xbf16>, vector<8x128xf32> -> vector<8x128xf32>
    %c0_3 = arith.constant 0 : index
    %c0_4 = arith.constant 0 : index
    %4 = vector.load %arg4[%c0_3, %c0_4] : memref<1x128xf32, #tpu.memory_space<vmem>>, vector<1x128xf32>
    %5 = vector.broadcast %4 : vector<1x128xf32> to vector<8x128xf32>
    %6 = arith.addf %3, %5 : vector<8x128xf32>
    %cst_5 = arith.constant 0.000000e+00 : f32
    %7 = vector.broadcast %cst_5 : f32 to vector<8x128xf32>
    %8 = arith.cmpf oge, %6, %7 : vector<8x128xf32>
    %cst_6 = arith.constant 2.000000e-01 : f32
    %9 = vector.broadcast %cst_6 : f32 to vector<8x128xf32>
    %10 = arith.mulf %9, %6 : vector<8x128xf32>
    %11 = arith.select %8, %6, %10 : vector<8x128xi1>, vector<8x128xf32>
    %12 = arith.truncf %11 : vector<8x128xf32> to vector<8x128xbf16>
    %c0_7 = arith.constant 0 : index
    %c0_8 = arith.constant 0 : index
    %13 = vector.load %arg5[%c0_7, %c0_8] : memref<128x512xbf16, #tpu.memory_space<vmem>>, vector<128x512xbf16>
    %cst_9 = arith.constant dense<0.000000e+00> : vector<8x512xf32>
    %14 = tpu.matmul %12, %13, %cst_9 {dimension_numbers = #tpu.dot_dimension_numbers<[1], [0], [0], [1], [0, 0, 1, 1], [], []>} : vector<8x128xbf16>, vector<128x512xbf16>, vector<8x512xf32> -> vector<8x512xf32>
    %c0_i32 = arith.constant 0 : i32
    %15 = arith.cmpi eq, %arg0, %c0_i32 : i32
    %16 = arith.extui %15 : i1 to i32
    %c0_i32_10 = arith.constant 0 : i32
    %17 = arith.cmpi ne, %16, %c0_i32_10 : i32
    scf.if %17 {
      %c0_i32_12 = arith.constant 0 : i32
      %21 = arith.cmpi eq, %arg1, %c0_i32_12 : i32
      %22 = arith.extui %21 : i1 to i32
      %c0_i32_13 = arith.constant 0 : i32
      %23 = arith.cmpi ne, %22, %c0_i32_13 : i32
      scf.if %23 {
        %cst_24 = arith.constant 0.000000e+00 : f32
        %35 = vector.broadcast %cst_24 : f32 to vector<1x512xf32>
        %c0_25 = arith.constant 0 : index
        %c0_26 = arith.constant 0 : index
        %36 = vector.load %arg14[%c0_25, %c0_26] : memref<1x512xf32, #tpu.memory_space<vmem>>, vector<1x512xf32>
        tpu.vector_store %arg14[%c0_25, %c0_26], %35 {strides = array<i32>} : memref<1x512xf32, #tpu.memory_space<vmem>>, vector<1x512xf32>,
        %cst_27 = arith.constant 0.000000e+00 : f32
        %37 = vector.broadcast %cst_27 : f32 to vector<1x512xf32>
        %c0_28 = arith.constant 0 : index
        %c0_29 = arith.constant 0 : index
        %38 = vector.load %arg15[%c0_28, %c0_29] : memref<1x512xf32, #tpu.memory_space<vmem>>, vector<1x512xf32>
        tpu.vector_store %arg15[%c0_28, %c0_29], %37 {strides = array<i32>} : memref<1x512xf32, #tpu.memory_space<vmem>>, vector<1x512xf32>,
        %cst_30 = arith.constant 0.000000e+00 : f32
        %39 = vector.broadcast %cst_30 : f32 to vector<1x1024xf32>
        %c0_31 = arith.constant 0 : index
        %c0_32 = arith.constant 0 : index
        %40 = vector.load %arg16[%c0_31, %c0_32] : memref<1x1024xf32, #tpu.memory_space<vmem>>, vector<1x1024xf32>
        tpu.vector_store %arg16[%c0_31, %c0_32], %39 {strides = array<i32>} : memref<1x1024xf32, #tpu.memory_space<vmem>>, vector<1x1024xf32>,
        %cst_33 = arith.constant 0.000000e+00 : f32
        %41 = vector.broadcast %cst_33 : f32 to vector<1x1024xf32>
        %c0_34 = arith.constant 0 : index
        %c0_35 = arith.constant 0 : index
        %42 = vector.load %arg17[%c0_34, %c0_35] : memref<1x1024xf32, #tpu.memory_space<vmem>>, vector<1x1024xf32>
        tpu.vector_store %arg17[%c0_34, %c0_35], %41 {strides = array<i32>} : memref<1x1024xf32, #tpu.memory_space<vmem>>, vector<1x1024xf32>,
      } else {
      }
      %c0_14 = arith.constant 0 : index
      %c0_15 = arith.constant 0 : index
      %24 = vector.load %arg14[%c0_14, %c0_15] : memref<1x512xf32, #tpu.memory_space<vmem>>, vector<1x512xf32>
      %cst_16 = arith.constant dense<0.000000e+00> : vector<512xf32>
      %25 = vector.multi_reduction <add>, %14, %cst_16 [0] : vector<8x512xf32> to vector<512xf32>
      %26 = vector.shape_cast %25 : vector<512xf32> to vector<1x512xf32>
      %27 = arith.addf %24, %26 : vector<1x512xf32>
      %c0_17 = arith.constant 0 : index
      %c0_18 = arith.constant 0 : index
      %28 = vector.load %arg14[%c0_17, %c0_18] : memref<1x512xf32, #tpu.memory_space<vmem>>, vector<1x512xf32>
      tpu.vector_store %arg14[%c0_17, %c0_18], %27 {strides = array<i32>} : memref<1x512xf32, #tpu.memory_space<vmem>>, vector<1x512xf32>,
      %c0_19 = arith.constant 0 : index
      %c0_20 = arith.constant 0 : index
      %29 = vector.load %arg15[%c0_19, %c0_20] : memref<1x512xf32, #tpu.memory_space<vmem>>, vector<1x512xf32>
      %30 = arith.mulf %14, %14 : vector<8x512xf32>
      %cst_21 = arith.constant dense<0.000000e+00> : vector<512xf32>
      %31 = vector.multi_reduction <add>, %30, %cst_21 [0] : vector<8x512xf32> to vector<512xf32>
      %32 = vector.shape_cast %31 : vector<512xf32> to vector<1x512xf32>
      %33 = arith.addf %29, %32 : vector<1x512xf32>
      %c0_22 = arith.constant 0 : index
      %c0_23 = arith.constant 0 : index
      %34 = vector.load %arg15[%c0_22, %c0_23] : memref<1x512xf32, #tpu.memory_space<vmem>>, vector<1x512xf32>
      tpu.vector_store %arg15[%c0_22, %c0_23], %33 {strides = array<i32>} : memref<1x512xf32, #tpu.memory_space<vmem>>, vector<1x512xf32>,
    } else {
    }
    %c1_i32 = arith.constant 1 : i32
    %18 = arith.cmpi sge, %arg0, %c1_i32 : i32
    %19 = arith.extui %18 : i1 to i32
    %c0_i32_11 = arith.constant 0 : i32
    %20 = arith.cmpi ne, %19, %c0_i32_11 : i32
    scf.if %20 {
      %c0_12 = arith.constant 0 : index
      %c0_13 = arith.constant 0 : index
      %21 = vector.load %arg14[%c0_12, %c0_13] : memref<1x512xf32, #tpu.memory_space<vmem>>, vector<1x512xf32>
      %cst_14 = arith.constant 1.250000e-01 : f32
      %22 = vector.broadcast %cst_14 : f32 to vector<1x512xf32>
      %23 = arith.mulf %21, %22 : vector<1x512xf32>
      %c0_15 = arith.constant 0 : index
      %c0_16 = arith.constant 0 : index
      %24 = vector.load %arg15[%c0_15, %c0_16] : memref<1x512xf32, #tpu.memory_space<vmem>>, vector<1x512xf32>
      %cst_17 = arith.constant 1.250000e-01 : f32
      %25 = vector.broadcast %cst_17 : f32 to vector<1x512xf32>
      %26 = arith.mulf %24, %25 : vector<1x512xf32>
      %27 = arith.mulf %23, %23 : vector<1x512xf32>
      %28 = arith.subf %26, %27 : vector<1x512xf32>
      %c0_18 = arith.constant 0 : index
      %c0_19 = arith.constant 0 : index
      %29 = vector.load %arg6[%c0_18, %c0_19] : memref<1x512xf32, #tpu.memory_space<vmem>>, vector<1x512xf32>
      %cst_20 = arith.constant 9.99999974E-6 : f32
      %30 = vector.broadcast %cst_20 : f32 to vector<1x512xf32>
      %31 = arith.addf %28, %30 : vector<1x512xf32>
      %32 = math.rsqrt %31 : vector<1x512xf32>
      %33 = arith.mulf %29, %32 : vector<1x512xf32>
      %c0_21 = arith.constant 0 : index
      %c0_22 = arith.constant 0 : index
      %34 = vector.load %arg7[%c0_21, %c0_22] : memref<1x512xf32, #tpu.memory_space<vmem>>, vector<1x512xf32>
      %35 = arith.mulf %23, %33 : vector<1x512xf32>
      %36 = arith.subf %34, %35 : vector<1x512xf32>
      %37 = vector.broadcast %33 : vector<1x512xf32> to vector<8x512xf32>
      %38 = arith.mulf %14, %37 : vector<8x512xf32>
      %39 = vector.broadcast %36 : vector<1x512xf32> to vector<8x512xf32>
      %40 = arith.addf %38, %39 : vector<8x512xf32>
      %cst_23 = arith.constant 0.000000e+00 : f32
      %41 = vector.broadcast %cst_23 : f32 to vector<8x512xf32>
      %42 = arith.cmpf oge, %40, %41 : vector<8x512xf32>
      %cst_24 = arith.constant 2.000000e-01 : f32
      %43 = vector.broadcast %cst_24 : f32 to vector<8x512xf32>
      %44 = arith.mulf %43, %40 : vector<8x512xf32>
      %45 = arith.select %42, %40, %44 : vector<8x512xi1>, vector<8x512xf32>
      %46 = arith.truncf %45 : vector<8x512xf32> to vector<8x512xbf16>
      %c0_25 = arith.constant 0 : index
      %c0_26 = arith.constant 0 : index
      %47 = vector.load %arg8[%c0_25, %c0_26] : memref<512x1024xbf16, #tpu.memory_space<vmem>>, vector<512x1024xbf16>
      %cst_27 = arith.constant dense<0.000000e+00> : vector<8x1024xf32>
      %48 = tpu.matmul %46, %47, %cst_27 {dimension_numbers = #tpu.dot_dimension_numbers<[1], [0], [0], [1], [0, 0, 1, 1], [], []>} : vector<8x512xbf16>, vector<512x1024xbf16>, vector<8x1024xf32> -> vector<8x1024xf32>
      %c1_i32_28 = arith.constant 1 : i32
      %49 = arith.cmpi eq, %arg0, %c1_i32_28 : i32
      %50 = arith.extui %49 : i1 to i32
      %c0_i32_29 = arith.constant 0 : i32
      %51 = arith.cmpi ne, %50, %c0_i32_29 : i32
      scf.if %51 {
        %c0_31 = arith.constant 0 : index
        %c0_32 = arith.constant 0 : index
        %55 = vector.load %arg16[%c0_31, %c0_32] : memref<1x1024xf32, #tpu.memory_space<vmem>>, vector<1x1024xf32>
        %cst_33 = arith.constant dense<0.000000e+00> : vector<1024xf32>
        %56 = vector.multi_reduction <add>, %48, %cst_33 [0] : vector<8x1024xf32> to vector<1024xf32>
        %57 = vector.shape_cast %56 : vector<1024xf32> to vector<1x1024xf32>
        %58 = arith.addf %55, %57 : vector<1x1024xf32>
        %c0_34 = arith.constant 0 : index
        %c0_35 = arith.constant 0 : index
        %59 = vector.load %arg16[%c0_34, %c0_35] : memref<1x1024xf32, #tpu.memory_space<vmem>>, vector<1x1024xf32>
        tpu.vector_store %arg16[%c0_34, %c0_35], %58 {strides = array<i32>} : memref<1x1024xf32, #tpu.memory_space<vmem>>, vector<1x1024xf32>,
        %c0_36 = arith.constant 0 : index
        %c0_37 = arith.constant 0 : index
        %60 = vector.load %arg17[%c0_36, %c0_37] : memref<1x1024xf32, #tpu.memory_space<vmem>>, vector<1x1024xf32>
        %61 = arith.mulf %48, %48 : vector<8x1024xf32>
        %cst_38 = arith.constant dense<0.000000e+00> : vector<1024xf32>
        %62 = vector.multi_reduction <add>, %61, %cst_38 [0] : vector<8x1024xf32> to vector<1024xf32>
        %63 = vector.shape_cast %62 : vector<1024xf32> to vector<1x1024xf32>
        %64 = arith.addf %60, %63 : vector<1x1024xf32>
        %c0_39 = arith.constant 0 : index
        %c0_40 = arith.constant 0 : index
        %65 = vector.load %arg17[%c0_39, %c0_40] : memref<1x1024xf32, #tpu.memory_space<vmem>>, vector<1x1024xf32>
        tpu.vector_store %arg17[%c0_39, %c0_40], %64 {strides = array<i32>} : memref<1x1024xf32, #tpu.memory_space<vmem>>, vector<1x1024xf32>,
      } else {
      }
      %c2_i32 = arith.constant 2 : i32
      %52 = arith.cmpi eq, %arg0, %c2_i32 : i32
      %53 = arith.extui %52 : i1 to i32
      %c0_i32_30 = arith.constant 0 : i32
      %54 = arith.cmpi ne, %53, %c0_i32_30 : i32
      scf.if %54 {
        %c0_31 = arith.constant 0 : index
        %c0_32 = arith.constant 0 : index
        %55 = vector.load %arg16[%c0_31, %c0_32] : memref<1x1024xf32, #tpu.memory_space<vmem>>, vector<1x1024xf32>
        %cst_33 = arith.constant 1.250000e-01 : f32
        %56 = vector.broadcast %cst_33 : f32 to vector<1x1024xf32>
        %57 = arith.mulf %55, %56 : vector<1x1024xf32>
        %c0_34 = arith.constant 0 : index
        %c0_35 = arith.constant 0 : index
        %58 = vector.load %arg17[%c0_34, %c0_35] : memref<1x1024xf32, #tpu.memory_space<vmem>>, vector<1x1024xf32>
        %cst_36 = arith.constant 1.250000e-01 : f32
        %59 = vector.broadcast %cst_36 : f32 to vector<1x1024xf32>
        %60 = arith.mulf %58, %59 : vector<1x1024xf32>
        %61 = arith.mulf %57, %57 : vector<1x1024xf32>
        %62 = arith.subf %60, %61 : vector<1x1024xf32>
        %c0_37 = arith.constant 0 : index
        %c0_38 = arith.constant 0 : index
        %63 = vector.load %arg9[%c0_37, %c0_38] : memref<1x1024xf32, #tpu.memory_space<vmem>>, vector<1x1024xf32>
        %cst_39 = arith.constant 9.99999974E-6 : f32
        %64 = vector.broadcast %cst_39 : f32 to vector<1x1024xf32>
        %65 = arith.addf %62, %64 : vector<1x1024xf32>
        %66 = math.rsqrt %65 : vector<1x1024xf32>
        %67 = arith.mulf %63, %66 : vector<1x1024xf32>
        %c0_40 = arith.constant 0 : index
        %c0_41 = arith.constant 0 : index
        %68 = vector.load %arg10[%c0_40, %c0_41] : memref<1x1024xf32, #tpu.memory_space<vmem>>, vector<1x1024xf32>
        %69 = arith.mulf %57, %67 : vector<1x1024xf32>
        %70 = arith.subf %68, %69 : vector<1x1024xf32>
        %71 = vector.broadcast %67 : vector<1x1024xf32> to vector<8x1024xf32>
        %72 = arith.mulf %48, %71 : vector<8x1024xf32>
        %73 = vector.broadcast %70 : vector<1x1024xf32> to vector<8x1024xf32>
        %74 = arith.addf %72, %73 : vector<8x1024xf32>
        %cst_42 = arith.constant 0.000000e+00 : f32
        %75 = vector.broadcast %cst_42 : f32 to vector<8x1024xf32>
        %76 = arith.cmpf oge, %74, %75 : vector<8x1024xf32>
        %cst_43 = arith.constant 2.000000e-01 : f32
        %77 = vector.broadcast %cst_43 : f32 to vector<8x1024xf32>
        %78 = arith.mulf %77, %74 : vector<8x1024xf32>
        %79 = arith.select %76, %74, %78 : vector<8x1024xi1>, vector<8x1024xf32>
        %80 = arith.truncf %79 : vector<8x1024xf32> to vector<8x1024xbf16>
        %c0_44 = arith.constant 0 : index
        %c0_45 = arith.constant 0 : index
        %81 = vector.load %arg11[%c0_44, %c0_45] : memref<1024x896xbf16, #tpu.memory_space<vmem>>, vector<1024x896xbf16>
        %cst_46 = arith.constant dense<0.000000e+00> : vector<8x896xf32>
        %82 = tpu.matmul %80, %81, %cst_46 {dimension_numbers = #tpu.dot_dimension_numbers<[1], [0], [0], [1], [0, 0, 1, 1], [], []>} : vector<8x1024xbf16>, vector<1024x896xbf16>, vector<8x896xf32> -> vector<8x896xf32>
        %c0_47 = arith.constant 0 : index
        %c0_48 = arith.constant 0 : index
        %83 = vector.load %arg12[%c0_47, %c0_48] : memref<1x896xf32, #tpu.memory_space<vmem>>, vector<1x896xf32>
        %84 = vector.broadcast %83 : vector<1x896xf32> to vector<8x896xf32>
        %85 = arith.addf %82, %84 : vector<8x896xf32>
        %86 = math.tanh %85 : vector<8x896xf32>
        %87 = arith.truncf %86 : vector<8x896xf32> to vector<8x896xbf16>
        %c0_49 = arith.constant 0 : index
        %c0_50 = arith.constant 0 : index
        %88 = vector.load %arg13[%c0_49, %c0_50] : memref<8x896xbf16, #tpu.memory_space<vmem>>, vector<8x896xbf16>
        tpu.vector_store %arg13[%c0_49, %c0_50], %87 {strides = array<i32>} : memref<8x896xbf16, #tpu.memory_space<vmem>>, vector<8x896xbf16>,
      } else {
      }
    } else {
    }
    return
  }
  func.func @transform_0(%arg0: i32, %arg1: i32) -> (i32, i32) {
    %c0_i32 = arith.constant 0 : i32
    %c0_i32_0 = arith.constant 0 : i32
    return %arg1, %c0_i32 : i32, i32
  }
  func.func @transform_1(%arg0: i32, %arg1: i32) -> (i32, i32) {
    %c0_i32 = arith.constant 0 : i32
    %c0_i32_0 = arith.constant 0 : i32
    %c0_i32_1 = arith.constant 0 : i32
    return %c0_i32, %c0_i32_0 : i32, i32
  }
  func.func @transform_2(%arg0: i32, %arg1: i32) -> (i32, i32) {
    %c0_i32 = arith.constant 0 : i32
    %c0_i32_0 = arith.constant 0 : i32
    %c0_i32_1 = arith.constant 0 : i32
    return %c0_i32, %c0_i32_0 : i32, i32
  }
  func.func @transform_3(%arg0: i32, %arg1: i32) -> (i32, i32) {
    %c0_i32 = arith.constant 0 : i32
    %c0_i32_0 = arith.constant 0 : i32
    %c0_i32_1 = arith.constant 0 : i32
    return %c0_i32, %c0_i32_0 : i32, i32
  }
  func.func @transform_4(%arg0: i32, %arg1: i32) -> (i32, i32) {
    %c0_i32 = arith.constant 0 : i32
    %c0_i32_0 = arith.constant 0 : i32
    %c0_i32_1 = arith.constant 0 : i32
    return %c0_i32, %c0_i32_0 : i32, i32
  }
  func.func @transform_5(%arg0: i32, %arg1: i32) -> (i32, i32) {
    %c0_i32 = arith.constant 0 : i32
    %c0_i32_0 = arith.constant 0 : i32
    %c0_i32_1 = arith.constant 0 : i32
    return %c0_i32, %c0_i32_0 : i32, i32
  }
  func.func @transform_6(%arg0: i32, %arg1: i32) -> (i32, i32) {
    %c0_i32 = arith.constant 0 : i32
    %c0_i32_0 = arith.constant 0 : i32
    %c0_i32_1 = arith.constant 0 : i32
    return %c0_i32, %c0_i32_0 : i32, i32
  }
  func.func @transform_7(%arg0: i32, %arg1: i32) -> (i32, i32) {
    %c0_i32 = arith.constant 0 : i32
    %c0_i32_0 = arith.constant 0 : i32
    %c0_i32_1 = arith.constant 0 : i32
    return %c0_i32, %c0_i32_0 : i32, i32
  }
  func.func @transform_8(%arg0: i32, %arg1: i32) -> (i32, i32) {
    %c0_i32 = arith.constant 0 : i32
    %c0_i32_0 = arith.constant 0 : i32
    %c0_i32_1 = arith.constant 0 : i32
    return %c0_i32, %c0_i32_0 : i32, i32
  }
  func.func @transform_9(%arg0: i32, %arg1: i32) -> (i32, i32) {
    %c0_i32 = arith.constant 0 : i32
    %c0_i32_0 = arith.constant 0 : i32
    %c0_i32_1 = arith.constant 0 : i32
    return %c0_i32, %c0_i32_0 : i32, i32
  }
  func.func @transform_10(%arg0: i32, %arg1: i32) -> (i32, i32) {
    %c0_i32 = arith.constant 0 : i32
    %c0_i32_0 = arith.constant 0 : i32
    %c0_i32_1 = arith.constant 0 : i32
    return %c0_i32, %c0_i32_0 : i32, i32
  }
  func.func @transform_11(%arg0: i32, %arg1: i32) -> (i32, i32) {
    %c0_i32 = arith.constant 0 : i32
    %c0_i32_0 = arith.constant 0 : i32
    return %arg1, %c0_i32 : i32, i32
  }
}

</mosaic_0001>

<bundles_post_ra>
// kernel: generator_forward.1
= control target key start
LH: loop header
LB: loop body
LE: loop exit
PB: predicated region body
PF: predicated region fallthrough
CT: control target
= control target key end

     0   :  { %s9900_s0 = inlined_call_operand.vmem [shape: f32[8,128], index: 0, kind: input, shape index: {}]   ;;  %s9901_s1 = inlined_call_operand.hbm [shape: bf16[128,128], index: 1, kind: input, shape index: {}]   ;;  %s9902_s2 = inlined_call_operand.hbm [shape: f32[1,128], index: 2, kind: input, shape index: {}]   ;;  %s9903_s3 = inlined_call_operand.hbm [shape: bf16[128,512], index: 3, kind: input, shape index: {}]   ;;  %s9904_s4 = inlined_call_operand.hbm [shape: f32[1,512], index: 4, kind: input, shape index: {}]   ;;  %s9905_s5 = inlined_call_operand.hbm [shape: f32[1,512], index: 5, kind: input, shape index: {}]   ;;  %s9906_s6 = inlined_call_operand.hbm [shape: bf16[512,1024], index: 6, kind: input, shape index: {}]   ;;  %s9907_s7 = inlined_call_operand.hbm [shape: f32[1,1024], index: 7, kind: input, shape index: {}]   ;;  %s9908_s8 = inlined_call_operand.hbm [shape: f32[1,1024], index: 8, kind: input, shape index: {}]   ;;  %s9909_s9 = inlined_call_operand.hbm [shape: bf16[1024,896], index: 9, kind: input, shape index: {}]   ;;  %s9910_s10 = inlined_call_operand.hbm [shape: f32[1,896], index: 10, kind: input, shape index: {}]   ;;  %s9911_s11 = inlined_call_operand.vmem [shape: bf16[8,896], index: 11, kind: output, shape index: {}]  }
   0x1   :  { %9916 = sst [smem:[#allocation29_spill]] %s9901_s1 }
   0x2   :  { %9917 = sst [smem:[#allocation30_spill]] %s9902_s2 }
   0x3   :  { %9918 = sst [smem:[#allocation31_spill]] %s9904_s4 }
   0x4   :  { %9919 = sst [smem:[#allocation32_spill]] %s9906_s6 }
   0x5   :  { %16 = vsyncpa [#allocation7], 0 }
   0x6   :  { %17 = vsyncpa [#allocation9], 0 }
   0x7   :  { %18 = vsyncpa [#allocation12], 0 }
   0x8   :  { %19 = vsyncpa [#allocation15], 0 }
   0x9   :  { %20 = vsyncpa [#allocation18], 0 }
   0xa   :  { %21 = vsyncpa [#allocation21], 0  ;;  %s9311_s17 = smov 0   ;;  %s9313_s18 = smov 0  }
   0xb   :  { %s9315_s19 = smov 0  }
   0xc LB: > { %9920 = sst [smem:[#allocation28_spill]] %s9225_s19  ;;  %s9227_s20 = smov [#allocation8]   ;;  %s9225_s19 = sphi %s9315_s19, %s9936_s19   ;;  %s9221_s18 = sphi %s9313_s18, %s9935_s18   ;;  %s9217_s17 = sphi %s9311_s17, %s9934_s17  }
   0xd   : > { %s339_s21 = sshll.u32 %s9227_s20, 4  ;;  %s7089_s22 = sadd.s32 4294967295, %s9225_s19   ;;  %s9333_s21 = int_to_ptr.vmem [resolvable:$true] %s339_s21 }
   0xe   : > { %p7090_p0 = scmp.ge.s32.totalorder %s9225_s19, 1  ;;  %p306_p1 = scmp.lt.s32.totalorder %s9225_s19, 4 }
   0xf   : > { %p9329_p2 = scmp.eq.s32.totalorder %s7089_s22, 0  ;;  %s9228_s25 = smov [#allocation11]  }
  0x10   : > { %p9335_p3 = pnand %p7090_p0, %p306_p1  ;;  %s363_s26 = sshll.u32 %s9228_s25, 4  ;;  %s9341_s26 = int_to_ptr.vmem [resolvable:$true] %s363_s26 }
  0x11   : > { %s9921_s23 = scalar_select %p9329_p2, 1, 0 }
  0x12   : > { %s9922_s24 = scalar_select %p9335_p3, 1, 0 }
  0x13   : > { %p8086_p4 = pneg %p9335_p3  ;;  %s9229_s27 = smov [#allocation14]  }
  0x14   : > { %s384_s28 = sshll.u32 %s9229_s27, 4  ;;  %s9230_s30 = smov [#allocation17]   ;;  %s9349_s28 = int_to_ptr.vmem [resolvable:$true] %s384_s28 }
  0x15   : > { %p9345_p5 = pnand %p9329_p2, %p8086_p4  ;;  %s9351_s12 = sshll.u32 %s9230_s30, 4  ;;  %s410_s12 = int_to_ptr.vmem [resolvable:$true] %s9351_s12 }
  0x16   : > { %s9924_s2 = sld [smem:[#allocation30_spill]] }
  0x17   : > { %p9361_p7 = pneg %p9345_p5 }
  0x1c   : > { %s8899_s15 = scalar_lea.hbm %s9924_s2, 16 }
  0x1d   : > { %p8900_p6 = scmp.ne.s32.totalorder %s9924_s2, %s8899_s15  ;;  %p8906_p10 = scmp.lt.u32.totalorder %s8899_s15, %s9924_s2 }
  0x1f   : > { %p8902_p8 = pnand %p9361_p7, %p8900_p6 }
  0x21   : > { %p8903_p9 = pneg %p8902_p8 }
  0x23   : > { %p8908_p11 = pnand %p8906_p10, %p8903_p9 }
  0x25   : > { %8911 = shalt.err (!%p8908_p11)
}
  0x26   : > { %s8912_s30 = scalar_lea.vmem %s9333_s21, 16  ;;  %s8919_s13 = scalar_lea.vmem %s9333_s21, 32 }
  0x27   : > { %p8913_p12 = scmp.ne.s32.totalorder %s9333_s21, %s8912_s30  ;;  %p8920_p1 = scmp.lt.s32.totalorder %s9333_s21, %s9333_s21 }
  0x28   : > { %p8921_p4 = scmp.lt.s32.totalorder %s8919_s13, %s8912_s30 }
  0x29   : > { %p8915_p13 = pnand %p8913_p12, %p9361_p7 }
  0x2a   : > { %p8922_p6 = por %p8921_p4, %p8920_p1 }
  0x2b   : > { %p8916_p0 = pneg %p8915_p13 }
  0x2d   : > { %p8923_p8 = pnand %p8922_p6, %p8916_p0 }
  0x2f   : > { %8926 = shalt.err (!%p8923_p8)
}
  0x30   : > { %8092 = dma.hbm_to_vmem [thread:$0]  (!%p9345_p5), %s9924_s2, 16, %s9333_s21, [#allocation9]  }
  0x31   : > { %s9926_s4 = sld [smem:[#allocation31_spill]] }
  0x37   : > { %s8927_s25 = scalar_lea.hbm %s9926_s4, 64 }
  0x38   : > { %p8928_p9 = scmp.ne.s32.totalorder %s9926_s4, %s8927_s25  ;;  %p8934_p12 = scmp.lt.u32.totalorder %s8927_s25, %s9926_s4 }
  0x3a   : > { %p8930_p10 = pnand %p8928_p9, %p9361_p7 }
  0x3c   : > { %p8931_p11 = pneg %p8930_p10 }
  0x3e   : > { %p8936_p13 = pnand %p8934_p12, %p8931_p11 }
  0x40   : > { %8939 = shalt.err (!%p8936_p13)
}
  0x41   : > { %s8940_s21 = scalar_lea.vmem %s9341_s26, 64  ;;  %p8948_p6 = scmp.lt.s32.totalorder %s9341_s26, %s9341_s26 }
  0x42   : > { %p8941_p0 = scmp.ne.s32.totalorder %s9341_s26, %s8940_s21  ;;  %p8949_p8 = scmp.lt.s32.totalorder %s8940_s21, %s8940_s21 }
  0x44   : > { %p8943_p1 = pnand %p8941_p0, %p9361_p7  ;;  %p8950_p9 = por %p8949_p8, %p8948_p6 }
  0x46   : > { %p8944_p4 = pneg %p8943_p1 }
  0x48   : > { %p8951_p10 = pnand %p8950_p9, %p8944_p4 }
  0x4a   : > { %8954 = shalt.err (!%p8951_p10)
}
  0x4b   : > { %8098 = dma.hbm_to_vmem [thread:$0]  (!%p9345_p5), %s9926_s4, 64, %s9341_s26, [#allocation12]  }
  0x4c   : > { %s9927_s6 = sld [smem:[#allocation32_spill]] }
  0x52   : > { %s8955_s20 = scalar_lea.hbm %s9927_s6, 32768 }
  0x53   : > { %p8956_p11 = scmp.ne.s32.totalorder %s9927_s6, %s8955_s20  ;;  %p8962_p0 = scmp.lt.u32.totalorder %s8955_s20, %s9927_s6 }
  0x55   : > { %p8958_p12 = pnand %p8956_p11, %p9361_p7 }
  0x57   : > { %p8959_p13 = pneg %p8958_p12 }
  0x59   : > { %p8964_p1 = pnand %p8962_p0, %p8959_p13 }
  0x5b   : > { %8967 = shalt.err (!%p8964_p1)
}
  0x5c   : > { %s8968_s26 = scalar_lea.vmem %s9349_s28, 32768  ;;  %p8976_p9 = scmp.lt.s32.totalorder %s9349_s28, %s9349_s28 }
  0x5d   : > { %p8969_p4 = scmp.ne.s32.totalorder %s9349_s28, %s8968_s26  ;;  %p8977_p10 = scmp.lt.s32.totalorder %s8968_s26, %s8968_s26 }
  0x5f   : > { %p8971_p6 = pnand %p8969_p4, %p9361_p7  ;;  %p8978_p11 = por %p8977_p10, %p8976_p9 }
  0x61   : > { %p8972_p8 = pneg %p8971_p6 }
  0x63   : > { %p8979_p12 = pnand %p8978_p11, %p8972_p8 }
  0x65   : > { %8982 = shalt.err (!%p8979_p12)
}
  0x66   : > { %s9231_s21 = smov 512   ;;  %s9232_s19 = smov 32  }
  0x67   : > { %8104 = dma.hbm_to_vmem [thread:$0]  (!%p9345_p5), %s9927_s6, 32768, %s9349_s28, [#allocation15], %s9231_s21, %s9231_s21, %s9232_s19  }
  0x68   : > { %s8983_s25 = scalar_lea.hbm %s9908_s8, 128 }
  0x69   : > { %p8984_p13 = scmp.ne.s32.totalorder %s9908_s8, %s8983_s25  ;;  %p8990_p4 = scmp.lt.u32.totalorder %s8983_s25, %s9908_s8 }
  0x6b   : > { %p8986_p0 = pnand %p8984_p13, %p9361_p7 }
  0x6d   : > { %p8987_p1 = pneg %p8986_p0 }
  0x6f   : > { %p8992_p6 = pnand %p8990_p4, %p8987_p1 }
  0x71   : > { %8995 = shalt.err (!%p8992_p6)
}
  0x72   : > { %s8996_s14 = scalar_lea.vmem %s410_s12, 128  ;;  %p9004_p11 = scmp.lt.s32.totalorder %s410_s12, %s410_s12 }
  0x73   : > { %p8997_p8 = scmp.ne.s32.totalorder %s410_s12, %s8996_s14  ;;  %p9005_p12 = scmp.lt.s32.totalorder %s8996_s14, %s8996_s14 }
  0x75   : > { %p8999_p9 = pnand %p8997_p8, %p9361_p7  ;;  %p9006_p2 = por %p9005_p12, %p9004_p11 }
  0x77   : > { %p9000_p10 = pneg %p8999_p9 }
  0x79   : > { %p9007_p3 = pnand %p9006_p2, %p9000_p10 }
  0x7b   : > { %9010 = shalt.err (!%p9007_p3)
}
  0x7c   : > { %8110 = dma.hbm_to_vmem [thread:$0]  (!%p9345_p5), %s9908_s8, 128, %s410_s12, [#allocation18]  }
  0x7d   : > { %s39_s19 = sadd.s32 1, %s9221_s18  ;;  %s9233_s15 = smov [#allocation6]  }
  0x7e   : > { %s325_s16 = sshll.u32 %s9233_s15, 4  ;;  %p41_p13 = scmp.ge.s32.totalorder %s39_s19, 3  ;;  %s326_s16 = int_to_ptr.vmem [resolvable:$true] %s325_s16 }
  0x7f   : > { %s9928_s1 = sld [smem:[#allocation29_spill]] }
  0x80   : > { %s9938_s19 = smov (%p41_p13, %s39_s19), 0 }
  0x85   : > { %s9011_s27 = scalar_lea.hbm %s9928_s1, 1024 }
  0x86   : > { %p9012_p2 = scmp.ne.s32.totalorder %s9928_s1, %s9011_s27  ;;  %p9018_p1 = scmp.lt.u32.totalorder %s9011_s27, %s9928_s1 }
  0x88   : > { %p9014_p3 = pnand %p9012_p2, %p9361_p7 }
  0x8a   : > { %p9015_p0 = pneg %p9014_p3 }
  0x8c   : > { %p9020_p4 = pnand %p9018_p1, %p9015_p0 }
  0x8e   : > { %9023 = shalt.err (!%p9020_p4)
}
  0x8f   : > { %s9024_s14 = scalar_lea.vmem %s326_s16, 1024  ;;  %p9032_p10 = scmp.lt.s32.totalorder %s326_s16, %s326_s16 }
  0x90   : > { %p9025_p6 = scmp.ne.s32.totalorder %s326_s16, %s9024_s14  ;;  %p9033_p11 = scmp.lt.s32.totalorder %s9024_s14, %s9024_s14 }
  0x92   : > { %p9027_p8 = pnand %p9025_p6, %p9361_p7  ;;  %p9034_p12 = por %p9033_p11, %p9032_p10 }
  0x94   : > { %p9028_p9 = pneg %p9027_p8 }
  0x96   : > { %p9035_p13 = pnand %p9034_p12, %p9028_p9 }
  0x98   : > { %9038 = shalt.err (!%p9035_p13)
}
  0x99   : > { %s9234_s28 = smov 64   ;;  %s9235_s21 = smov 4  }
  0x9a   : > { %8089 = dma.hbm_to_vmem [thread:$0]  (!%p9345_p5), %s9928_s1, 1024, %s326_s16, [#allocation7], %s9234_s28, %s9234_s28, %s9235_s21  }
  0x9b   : > { %s9236_s25 = smov [#allocation10]   ;;  %s9039_s26 = scalar_lea.hbm %s9903_s3, 4096 }
  0x9c   : > { %s349_s27 = sshll.u32 %s9236_s25, 4  ;;  %p9040_p2 = scmp.ne.s32.totalorder %s9903_s3, %s9039_s26  ;;  %s350_s27 = int_to_ptr.vmem [resolvable:$true] %s349_s27 }
  0x9d   : > { %p9046_p1 = scmp.lt.u32.totalorder %s9039_s26, %s9903_s3 }
  0x9e   : > { %p9042_p3 = pnand %p9040_p2, %p9361_p7 }
  0xa0   : > { %p9043_p0 = pneg %p9042_p3 }
  0xa2   : > { %p9048_p4 = pnand %p9046_p1, %p9043_p0 }
  0xa4   : > { %9051 = shalt.err (!%p9048_p4)
}
  0xa5   : > { %s9052_s16 = scalar_lea.vmem %s350_s27, 4096  ;;  %p9060_p10 = scmp.lt.s32.totalorder %s350_s27, %s350_s27 }
  0xa6   : > { %p9053_p6 = scmp.ne.s32.totalorder %s350_s27, %s9052_s16  ;;  %p9061_p11 = scmp.lt.s32.totalorder %s9052_s16, %s9052_s16 }
  0xa8   : > { %p9055_p8 = pnand %p9053_p6, %p9361_p7  ;;  %p9062_p12 = por %p9061_p11, %p9060_p10 }
  0xaa   : > { %p9056_p9 = pneg %p9055_p8 }
  0xac   : > { %p9063_p13 = pnand %p9062_p12, %p9056_p9 }
  0xae   : > { %9066 = shalt.err (!%p9063_p13)
}
  0xaf   : > { %s9237_s28 = smov 256   ;;  %s9238_s21 = smov 16  }
  0xb0   : > { %8095 = dma.hbm_to_vmem [thread:$0]  (!%p9345_p5), %s9903_s3, 4096, %s350_s27, [#allocation9], %s9237_s28, %s9237_s28, %s9238_s21  }
  0xb1   : > { %s9239_s15 = smov [#allocation13]   ;;  %s9240_s25 = smov [#allocation16]  }
  0xb2   : > { %s374_s20 = sshll.u32 %s9239_s15, 4  ;;  %s398_s30 = sshll.u32 %s9240_s25, 4  ;;  %s375_s20 = int_to_ptr.vmem [resolvable:$true] %s374_s20  ;;  %s399_s30 = int_to_ptr.vmem [resolvable:$true] %s398_s30 }
  0xb3   : > { %s9067_s12 = scalar_lea.hbm %s9905_s5, 64 }
  0xb4   : > { %p9068_p2 = scmp.ne.s32.totalorder %s9905_s5, %s9067_s12  ;;  %p9074_p1 = scmp.lt.u32.totalorder %s9067_s12, %s9905_s5 }
  0xb6   : > { %p9070_p3 = pnand %p9068_p2, %p9361_p7 }
  0xb8   : > { %p9071_p0 = pneg %p9070_p3 }
  0xba   : > { %p9076_p4 = pnand %p9074_p1, %p9071_p0 }
  0xbc   : > { %9079 = shalt.err (!%p9076_p4)
}
  0xbd   : > { %s9080_s27 = scalar_lea.vmem %s375_s20, 64  ;;  %p9088_p10 = scmp.lt.s32.totalorder %s375_s20, %s375_s20 }
  0xbe   : > { %p9081_p6 = scmp.ne.s32.totalorder %s375_s20, %s9080_s27  ;;  %p9089_p11 = scmp.lt.s32.totalorder %s9080_s27, %s9080_s27 }
  0xc0   : > { %p9083_p8 = pnand %p9081_p6, %p9361_p7  ;;  %p9090_p12 = por %p9089_p11, %p9088_p10 }
  0xc2   : > { %p9084_p9 = pneg %p9083_p8 }
  0xc4   : > { %p9091_p13 = pnand %p9090_p12, %p9084_p9 }
  0xc6   : > { %9094 = shalt.err (!%p9091_p13)
}
  0xc7   : > { %8101 = dma.hbm_to_vmem [thread:$0]  (!%p9345_p5), %s9905_s5, 64, %s375_s20, [#allocation12]  }
  0xc8   : > { %s9095_s2 = scalar_lea.hbm %s9907_s7, 128 }
  0xc9   : > { %p9096_p2 = scmp.ne.s32.totalorder %s9907_s7, %s9095_s2  ;;  %p9102_p1 = scmp.lt.u32.totalorder %s9095_s2, %s9907_s7 }
  0xcb   : > { %p9098_p3 = pnand %p9096_p2, %p9361_p7 }
  0xcd   : > { %p9099_p0 = pneg %p9098_p3 }
  0xcf   : > { %p9104_p4 = pnand %p9102_p1, %p9099_p0 }
  0xd1   : > { %9107 = shalt.err (!%p9104_p4)
}
  0xd2   : > { %s9108_s26 = scalar_lea.vmem %s399_s30, 128  ;;  %p9116_p10 = scmp.lt.s32.totalorder %s399_s30, %s399_s30 }
  0xd3   : > { %p9109_p6 = scmp.ne.s32.totalorder %s399_s30, %s9108_s26  ;;  %p9117_p11 = scmp.lt.s32.totalorder %s9108_s26, %s9108_s26 }
  0xd5   : > { %p9111_p8 = pnand %p9109_p6, %p9361_p7  ;;  %p9118_p12 = por %p9117_p11, %p9116_p10 }
  0xd7   : > { %p9112_p9 = pneg %p9111_p8 }
  0xd9   : > { %p9119_p13 = pnand %p9118_p12, %p9112_p9 }
  0xdb   : > { %9122 = shalt.err (!%p9119_p13)
}
  0xdc   : > { %8107 = dma.hbm_to_vmem [thread:$0]  (!%p9345_p5), %s9907_s7, 128, %s399_s30, [#allocation15]  }
  0xdd   : > { %s9241_s14 = smov [#allocation19]   ;;  %s9123_s21 = scalar_lea.hbm %s9909_s9, 57344 }
  0xde   : > { %s419_s16 = sshll.u32 %s9241_s14, 4  ;;  %p9124_p2 = scmp.ne.s32.totalorder %s9909_s9, %s9123_s21  ;;  %s420_s16 = int_to_ptr.vmem [resolvable:$true] %s419_s16 }
  0xdf   : > { %p9130_p1 = scmp.lt.u32.totalorder %s9123_s21, %s9909_s9 }
  0xe0   : > { %p9126_p3 = pnand %p9124_p2, %p9361_p7 }
  0xe2   : > { %p9127_p0 = pneg %p9126_p3 }
  0xe4   : > { %p9132_p4 = pnand %p9130_p1, %p9127_p0 }
  0xe6   : > { %9135 = shalt.err (!%p9132_p4)
}
  0xe7   : > { %s9136_s30 = scalar_lea.vmem %s420_s16, 57344  ;;  %p9144_p10 = scmp.lt.s32.totalorder %s420_s16, %s420_s16 }
  0xe8   : > { %p9137_p6 = scmp.ne.s32.totalorder %s420_s16, %s9136_s30  ;;  %p9145_p11 = scmp.lt.s32.totalorder %s9136_s30, %s9136_s30 }
  0xea   : > { %p9139_p8 = pnand %p9137_p6, %p9361_p7  ;;  %p9146_p12 = por %p9145_p11, %p9144_p10 }
  0xec   : > { %p9140_p9 = pneg %p9139_p8 }
  0xee   : > { %p9147_p13 = pnand %p9146_p12, %p9140_p9 }
  0xf0   : > { %9150 = shalt.err (!%p9147_p13)
}
  0xf1   : > { %s9242_s15 = smov 448   ;;  %s9243_s25 = smov 28  }
  0xf2   : > { %8113 = dma.hbm_to_vmem [thread:$0]  (!%p9345_p5), %s9909_s9, 57344, %s420_s16, [#allocation18], %s9242_s15, %s9242_s15, %s9243_s25  }
  0xf3   : > { %s9244_s20 = smov [#allocation20]   ;;  %s9151_s28 = scalar_lea.hbm %s9910_s10, 112 }
  0xf4   : > { %s433_s12 = sshll.u32 %s9244_s20, 4  ;;  %p9152_p2 = scmp.ne.s32.totalorder %s9910_s10, %s9151_s28  ;;  %s434_s12 = int_to_ptr.vmem [resolvable:$true] %s433_s12 }
  0xf5   : > { %p9158_p1 = scmp.lt.u32.totalorder %s9151_s28, %s9910_s10 }
  0xf6   : > { %p9154_p3 = pnand %p9152_p2, %p9361_p7 }
  0xf8   : > { %p9155_p0 = pneg %p9154_p3 }
  0xfa   : > { %p9160_p4 = pnand %p9158_p1, %p9155_p0 }
  0xfc   : > { %9163 = shalt.err (!%p9160_p4)
}
  0xfd   : > { %s9164_s16 = scalar_lea.vmem %s434_s12, 112  ;;  %s9171_s4 = scalar_lea.vmem %s434_s12, 128 }
  0xfe   : > { %p9165_p6 = scmp.ne.s32.totalorder %s434_s12, %s9164_s16  ;;  %p9172_p10 = scmp.lt.s32.totalorder %s434_s12, %s434_s12 }
  0xff   : > { %p9173_p11 = scmp.lt.s32.totalorder %s9171_s4, %s9164_s16 }
 0x100   : > { %p9167_p8 = pnand %p9165_p6, %p9361_p7 }
 0x101   : > { %p9174_p12 = por %p9173_p11, %p9172_p10 }
 0x102   : > { %p9168_p9 = pneg %p9167_p8 }
 0x104   : > { %p9175_p13 = pnand %p9174_p12, %p9168_p9 }
 0x106   : > { %9178 = shalt.err (!%p9175_p13)
}
 0x107   : > { %8116 = dma.hbm_to_vmem [thread:$0]  (!%p9345_p5), %s9910_s10, 112, %s434_s12, [#allocation21]  }
 0x108   : > { %p9929_p2 = scmp.ne.s32.totalorder %s9922_s24, 0 }
 0x109   : > { %p9930_p3 = scmp.ne.s32.totalorder (!%p9929_p2), %s9921_s23, 0 }
 0x10a   : > { %446 = sbr.rel (%p9929_p2) target bundleno = 1974 (0x7b6), region = 64 }
 0x111   : > { %9192 = dma.done.wait (%p9930_p3), [#allocation7], 1024  }
 0x112   : > { %9194 = vsyncadd (%p9930_p3), [#allocation7], 4294966272 }
 0x113   : > { %9196 = dma.done.wait (%p9930_p3), [#allocation9], 4112  }
 0x114   : > { %9198 = vsyncadd (%p9930_p3), [#allocation9], 4294963184 }
 0x115   : > { %9200 = dma.done.wait (%p9930_p3), [#allocation12], 128  }
 0x116   : > { %9202 = vsyncadd (%p9930_p3), [#allocation12], 4294967168 }
 0x117   : > { %9204 = dma.done.wait (%p9930_p3), [#allocation15], 32896  }
 0x118   : > { %9206 = vsyncadd (%p9930_p3), [#allocation15], 4294934400 }
 0x119   : > { %9208 = dma.done.wait (%p9930_p3), [#allocation18], 57472  }
 0x11a   : > { %9210 = vsyncadd (%p9930_p3), [#allocation18], 4294909824 }
 0x11b   : > { %9212 = dma.done.wait (%p9930_p3), [#allocation21], 112  }
 0x11c   : > { %9214 = vsyncadd (%p9930_p3), [#allocation21], 4294967184  ;;  %v9245_v0 = vmov 0.0   ;;  %vm9246_vm0 = vmmov 0   ;;  %v8185_v1 = vld [vmem:[#allocation6] sm:$0xff]   ;;  %v8186_v2 = vld [vmem:[#allocation6 + $0x8] sm:$0xff]  }
 0x11d   : > { %7970 = vmatprep.subr.bf16.mxu0 %v9245_v0  ;;  %7986 = vmatprep.mubr.msk.bf16.mxu0 %vm9246_vm0, %v9245_v0  ;;  %v8187_v3 = vld [vmem:[#allocation6 + $0x10] sm:$0xff]   ;;  %v8188_v5 = vld [vmem:[#allocation6 + $0x18] sm:$0xff]   ;;  %v8189_v8 = vld [vmem:[#allocation6 + $0x20] sm:$0xff]   ;;  %v9247_v43 = vmov 0   ;;  %p7154_p5 = scmp.ne.s32.totalorder %s9217_s17, 0 }
 0x11e   : > { %7971 = vmatpush3.bf16.msra.mxu0 %v8185_v1  ;;  %v8193_v4 = vld [vmem:[#allocation10 + $0x4] ss:$16 sps:$4 sm:$0xff]   ;;  %v8198_v6 = vld [vmem:[#allocation10] ss:$16 sps:$4 sm:$0xff]   ;;  %v8197_v21 = vld [vmem:[#allocation10 + $0xc] ss:$16 sps:$4 sm:$0xff]   ;;  %872 = vmatprep.mubr.bf16.mxu1 %v9247_v43  ;;  %v930_v61 = vlaneseq (!%p7154_p5) }
 0x11f   : > { %7972 = vmatprep.subr.bf16.mxu0 %v9245_v0  ;;  %840 = vmatprep.subr.bf16.mxu1 %v8193_v4  ;;  %v8199_v7 = vld [vmem:[#allocation10 + $0x24] ss:$16 sps:$4 sm:$0xff]   ;;  %v8204_v9 = vld [vmem:[#allocation10 + $0x20] ss:$16 sps:$4 sm:$0xff]   ;;  %v8195_v24 = vld [vmem:[#allocation10 + $0x8] ss:$16 sps:$4 sm:$0xff]  }
 0x120   : > { %841 = vmatpush1.bf16.msra.mxu1 %v8198_v6  ;;  %v8205_v10 = vld [vmem:[#allocation10 + $0x44] ss:$16 sps:$4 sm:$0xff]   ;;  %v8210_v11 = vld [vmem:[#allocation10 + $0x40] ss:$16 sps:$4 sm:$0xff]   ;;  %v8203_v25 = vld [vmem:[#allocation10 + $0x2c] ss:$16 sps:$4 sm:$0xff]  }
 0x121   : > { %842 = vmatprep.subr.bf16.mxu1 %v8199_v7  ;;  %v8211_v12 = vld [vmem:[#allocation10 + $0x64] ss:$16 sps:$4 sm:$0xff]   ;;  %v8216_v14 = vld [vmem:[#allocation10 + $0x60] ss:$16 sps:$4 sm:$0xff]   ;;  %v8201_v26 = vld [vmem:[#allocation10 + $0x28] ss:$16 sps:$4 sm:$0xff]  }
 0x122   : > { %7973 = vmatpush3.bf16.msra.mxu0 %v8186_v2  ;;  %v8190_v13 = vld [vmem:[#allocation6 + $0x28] sm:$0xff]   ;;  %v8191_v16 = vld [vmem:[#allocation6 + $0x30] sm:$0xff]   ;;  %v8192_v17 = vld [vmem:[#allocation6 + $0x38] sm:$0xff]   ;;  %v9248_v63 = vmov (!%p7154_p5), 1966171168   ;;  %v9249_v1 = vmov (!%p7154_p5), 0.0  }
 0x123   : > { %7974 = vmatprep.subr.bf16.mxu0 %v9245_v0  ;;  %v8217_v15 = vld [vmem:[#allocation10 + $0x84] ss:$16 sps:$4 sm:$0xff]   ;;  %v8222_v19 = vld [vmem:[#allocation10 + $0x80] ss:$16 sps:$4 sm:$0xff]   ;;  %v8209_v27 = vld [vmem:[#allocation10 + $0x4c] ss:$16 sps:$4 sm:$0xff]  }
 0x124   : > { %843 = vmatpush1.bf16.msra.mxu1 %v8204_v9  ;;  %v531_v18 = vld [vmem:[%s9900_s0] sm:$0xff]  ;;  %v8228_v22 = vld [vmem:[#allocation10 + $0xa0] ss:$16 sps:$4 sm:$0xff]   ;;  %v7113_v44 = vld [vmem:[#allocation8] ss:$0 sm:$0xff]  ;;  %936 = vst [vmem:[#allocation4] sm:$0xff] (!%p7154_p5), %v9249_v1 }
 0x125   : > { %844 = vmatprep.subr.bf16.mxu1 %v8205_v10  ;;  %v8223_v20 = vld [vmem:[#allocation10 + $0xa4] ss:$16 sps:$4 sm:$0xff]   ;;  %v532_v23 = vpack.c.bf16 %v531_v18, %v531_v18  ;;  %v8207_v28 = vld [vmem:[#allocation10 + $0x48] ss:$16 sps:$4 sm:$0xff]   ;;  %v8215_v29 = vld [vmem:[#allocation10 + $0x6c] ss:$16 sps:$4 sm:$0xff]  }
 0x126   : > { %7975 = vmatpush3.bf16.msra.mxu0 %v8187_v3  ;;  %v8213_v30 = vld [vmem:[#allocation10 + $0x68] ss:$16 sps:$4 sm:$0xff]   ;;  %v8221_v31 = vld [vmem:[#allocation10 + $0x8c] ss:$16 sps:$4 sm:$0xff]   ;;  %v8229_v35 = vld [vmem:[#allocation10 + $0xc4] ss:$16 sps:$4 sm:$0xff]  }
 0x127   : > { %7976 = vmatprep.subr.bf16.mxu0 %v9245_v0  ;;  %v8219_v32 = vld [vmem:[#allocation10 + $0x88] ss:$16 sps:$4 sm:$0xff]   ;;  %v8227_v33 = vld [vmem:[#allocation10 + $0xac] ss:$16 sps:$4 sm:$0xff]   ;;  %v8234_v38 = vld [vmem:[#allocation10 + $0xc0] ss:$16 sps:$4 sm:$0xff]  }
 0x128   : > { %845 = vmatpush1.bf16.msra.mxu1 %v8210_v11  ;;  %v8225_v34 = vld [vmem:[#allocation10 + $0xa8] ss:$16 sps:$4 sm:$0xff]   ;;  %v8233_v36 = vld [vmem:[#allocation10 + $0xcc] ss:$16 sps:$4 sm:$0xff]   ;;  %v8235_v39 = vld [vmem:[#allocation10 + $0xe4] ss:$16 sps:$4 sm:$0xff]  }
 0x129   : > { %846 = vmatprep.subr.bf16.mxu1 %v8211_v12  ;;  %v8231_v37 = vld [vmem:[#allocation10 + $0xc8] ss:$16 sps:$4 sm:$0xff]   ;;  %v8239_v40 = vld [vmem:[#allocation10 + $0xec] ss:$16 sps:$4 sm:$0xff]   ;;  %v8240_v42 = vld [vmem:[#allocation10 + $0xe0] ss:$16 sps:$4 sm:$0xff]  }
 0x12a   : > { %7977 = vmatpush3.bf16.msra.mxu0 %v8188_v5  ;;  %v8237_v41 = vld [vmem:[#allocation10 + $0xe8] ss:$16 sps:$4 sm:$0xff]   ;;  %937 = vst [vmem:[#allocation5] sm:$0xff] (!%p7154_p5), %v9249_v1  ;;  %vm9601_vm2 = vcmp.lt.s32.totalorder (!%p7154_p5), %v930_v61, 512 }
 0x12b   : > { %7978 = vmatprep.subr.bf16.mxu0 %v9245_v0  ;;  %934 = vst.msk [vmem:[#allocation2] sm:$0xf] (!%p7154_p5), %vm9601_vm2, %v9249_v1  ;;  %935 = vst.msk [vmem:[#allocation3] sm:$0xf] (!%p7154_p5), %vm9601_vm2, %v9249_v1 }
 0x12c   : > { %847 = vmatpush1.bf16.msra.mxu1 %v8216_v14 }
 0x12d   : > { %848 = vmatprep.subr.bf16.mxu1 %v8217_v15 }
 0x12e   : > { %7979 = vmatpush3.bf16.msra.mxu0 %v8189_v8  ;;  %v973_v8 = vshrl.u32 (!%p7154_p5), %v930_v61, 7 }
 0x12f   : > { %7980 = vmatprep.subr.bf16.mxu0 %v9245_v0 }
 0x130   : > { %849 = vmatpush1.bf16.msra.mxu1 %v8222_v19 }
 0x131   : > { %850 = vmatprep.subr.bf16.mxu1 %v8223_v20 }
 0x132   : > { %7981 = vmatpush3.bf16.msra.mxu0 %v8190_v13  ;;  %v938_v1 = vld [vmem:[#allocation2] sm:$0xf] (!%p7154_p5) }
 0x133   : > { %7982 = vmatprep.subr.bf16.mxu0 %v9245_v0 }
 0x134   : > { %851 = vmatpush1.bf16.msra.mxu1 %v8228_v22 }
 0x135   : > { %852 = vmatprep.subr.bf16.mxu1 %v8229_v35 }
 0x136   : > { %7983 = vmatpush3.bf16.msra.mxu0 %v8191_v16 }
 0x137   : > { %7984 = vmatprep.subr.bf16.mxu0 %v9245_v0  ;;  %v970_v0 = vunpack.c.l.s4 (!%p7154_p5), %v9248_v63 }
 0x138   : > { %853 = vmatpush1.bf16.msra.mxu1 %v8234_v38 }
 0x139   : > { %854 = vmatprep.subr.bf16.mxu1 %v8235_v39  ;;  %v971_v16 = vunpack.c.0.s8 (!%p7154_p5), %v970_v0 }
 0x13a   : > { %7985 = vmatpush3.bf16.msra.mxu0 %v8192_v17 }
 0x13b   : > { %881 = vmatprep.subr.bf16.mxu0 %v8197_v21 }
 0x13c   : > { %855 = vmatpush1.bf16.msra.mxu1 %v8240_v42 }
 0x13d   : > { %7987 = vmatmul.mubr.bf16.vlgmr.msra.gmra.mrb[0].mxu0 %v532_v23 }
 0x13e   : > { %882 = vmatpush1.bf16.msra.mxu0 %v8195_v24  ;;  %913 = vmatprep.mubr.bf16.mxu0 %v9247_v43 }
 0x13f   : > { %883 = vmatprep.subr.bf16.mxu0 %v8203_v25 }
 0x142   : > { %884 = vmatpush1.bf16.msra.mxu0 %v8201_v26 }
 0x143   : > { %885 = vmatprep.subr.bf16.mxu0 %v8209_v27 }
 0x146   : > { %886 = vmatpush1.bf16.msra.mxu0 %v8207_v28 }
 0x147   : > { %887 = vmatprep.subr.bf16.mxu0 %v8215_v29 }
 0x14a   : > { %888 = vmatpush1.bf16.msra.mxu0 %v8213_v30 }
 0x14b   : > { %889 = vmatprep.subr.bf16.mxu0 %v8221_v31 }
 0x14e   : > { %890 = vmatpush1.bf16.msra.mxu0 %v8219_v32 }
 0x14f   : > { %891 = vmatprep.subr.bf16.mxu0 %v8227_v33 }
 0x152   : > { %892 = vmatpush1.bf16.msra.mxu0 %v8225_v34 }
 0x153   : > { %893 = vmatprep.subr.bf16.mxu0 %v8233_v36  ;;  %v974_v36 = vsub.s32 (!%p7154_p5), %v971_v16, %v973_v8 }
 0x156   : > { %894 = vmatpush1.bf16.msra.mxu0 %v8231_v37 }
 0x157   : > { %895 = vmatprep.subr.bf16.mxu0 %v8239_v40 }
 0x15a   : > { %896 = vmatpush1.bf16.msra.mxu0 %v8237_v41 }
 0x210   : > { %v638_v45 = vpop.f32.mrb[0].mxu0 }
 0x211   : > { %v639_v46 = vadd.f32 %v7113_v44, %v638_v45  ;;  %v7988_v47 = vpop.f32.mrb[1].mxu0 }
 0x212   : > { %v641_v48 = vpop.f32.mrb[2].mxu0 }
 0x213   : > { %vm644_vm1 = vcmp.ge.f32.partialorder %v639_v46, 0.0  ;;  %v645_v49 = vmul.f32 0.2, %v639_v46  ;;  %v7989_v50 = vpop.f32.mrb[3].mxu0 }
 0x215   : > { %v646_v51 = vsel %vm644_vm1, %v639_v46, %v645_v49 }
 0x216   : > { %v647_v52 = vpack.c.bf16 %v646_v51, %v646_v51 }
 0x218   : > { %873 = vmatmul.mubr.bf16.vlgmr.msra.gmra.mrb[0].mxu1 %v647_v52  ;;  %914 = vmatmul.mubr.bf16.vlgmr.msra.gmra.mrb[4].mxu0 %v647_v52 }
 0x2e8   : > { %925 = sbr.rel (%p7154_p5) target bundleno = 774 (0x306), region = 108 }
 0x2eb   : > { %v9588_v53 = vpop.f32.mrb[0].mxu1  ;;  %v9590_v54 = vpop.f32.mrb[4].mxu0 }
 0x2ec   : > { %v9592_v55 = vpop.f32.mrb[1].mxu1  ;;  %v9594_v56 = vpop.f32.mrb[5].mxu0  ;;  %v939_v62 = vrot.slane (!%p7154_p5), %v9588_v53, 4  ;;  %v951_v3 = vrot.slane (!%p7154_p5), %v9590_v54, 4  ;;  %v999_v7 = vmul.f32 (!%p7154_p5), %v9588_v53, %v9588_v53  ;;  %v1001_v14 = vmul.f32 (!%p7154_p5), %v9590_v54, %v9590_v54 }
 0x2ed   : > { %v878_v57 = vpop.f32.mrb[2].mxu1  ;;  %v919_v58 = vpop.f32.mrb[6].mxu0  ;;  %v945_v2 = vrot.slane (!%p7154_p5), %v9592_v55, 4  ;;  %v957_v4 = vrot.slane (!%p7154_p5), %v9594_v56, 4  ;;  %v1000_v13 = vmul.f32 (!%p7154_p5), %v9592_v55, %v9592_v55  ;;  %v1002_v15 = vmul.f32 (!%p7154_p5), %v9594_v56, %v9594_v56 }
 0x2ee   : > { %v879_v59 = vpop.f32.mrb[3].mxu1  ;;  %v920_v60 = vpop.f32.mrb[7].mxu0  ;;  %v940_v6 = vadd.f32 (!%p7154_p5), %v939_v62, %v9588_v53  ;;  %v952_v10 = vadd.f32 (!%p7154_p5), %v951_v3, %v9590_v54  ;;  %v1003_v21 = vrot.slane (!%p7154_p5), %v999_v7, 4  ;;  %v1015_v23 = vrot.slane (!%p7154_p5), %v1001_v14, 4 }
 0x2ef   : > { %v946_v9 = vadd.f32 %v945_v2, %v9592_v55  ;;  %v958_v11 = vadd.f32 %v957_v4, %v9594_v56  ;;  %v1009_v22 = vrot.slane %v1000_v13, 4  ;;  %v1021_v27 = vrot.slane %v1002_v15, 4 }
 0x2f0   : > { %v941_v12 = vrot.slane %v940_v6, 2  ;;  %v953_v18 = vrot.slane %v952_v10, 2  ;;  %v1004_v29 = vadd.f32 %v1003_v21, %v999_v7  ;;  %v1016_v31 = vadd.f32 %v1015_v23, %v1001_v14 }
 0x2f1   : > { %v947_v17 = vrot.slane %v946_v9, 2  ;;  %v959_v19 = vrot.slane %v958_v11, 2  ;;  %v1010_v30 = vadd.f32 %v1009_v22, %v1000_v13  ;;  %v1022_v35 = vadd.f32 %v1021_v27, %v1002_v15 }
 0x2f2   : > { %v942_v20 = vadd.f32 %v941_v12, %v940_v6  ;;  %v954_v25 = vadd.f32 %v953_v18, %v952_v10  ;;  %v1005_v38 = vrot.slane %v1004_v29, 2  ;;  %v1017_v43 = vrot.slane %v1016_v31, 2 }
 0x2f3   : > { %v948_v24 = vadd.f32 %v947_v17, %v946_v9  ;;  %v960_v26 = vadd.f32 %v959_v19, %v958_v11  ;;  %v1011_v39 = vrot.slane %v1010_v30, 2  ;;  %v1023_v46 = vrot.slane %v1022_v35, 2  ;;  %v998_v11 = vld [vmem:[#allocation3] sm:$0xf] }
 0x2f4   : > { %v943_v28 = vrot.slane %v942_v20, 1  ;;  %v955_v33 = vrot.slane %v954_v25, 1  ;;  %v1006_v44 = vadd.f32 %v1005_v38, %v1004_v29  ;;  %v1018_v49 = vadd.f32 %v1017_v43, %v1016_v31 }
 0x2f5   : > { %v949_v32 = vrot.slane %v948_v24, 1  ;;  %v961_v34 = vrot.slane %v960_v26, 1  ;;  %v1012_v45 = vadd.f32 %v1011_v39, %v1010_v30  ;;  %v1024_v52 = vadd.f32 %v1023_v46, %v1022_v35 }
 0x2f6   : > { %v944_v37 = vadd.f32 %v943_v28, %v942_v20  ;;  %v956_v41 = vadd.f32 %v955_v33, %v954_v25  ;;  %v1007_v50 = vrot.slane %v1006_v44, 1  ;;  %v1019_v59 = vrot.slane %v1018_v49, 1 }
 0x2f7   : > { %v950_v40 = vadd.f32 %v949_v32, %v948_v24  ;;  %v962_v42 = vadd.f32 %v961_v34, %v960_v26  ;;  %v1013_v51 = vrot.slane %v1012_v45, 1  ;;  %v1025_v62 = vrot.slane %v1024_v52, 1 }
 0x2f8   : > { %v1008_v60 = vadd.f32 %v1007_v50, %v1006_v44  ;;  %v1020_v0 = vadd.f32 %v1019_v59, %v1018_v49 }
 0x2f9   : > { %v967_v47 = vcombine.low %v944_v37, %v950_v40  ;;  %v968_v48 = vcombine.low %v956_v41, %v962_v42  ;;  %v1014_v61 = vadd.f32 %v1013_v51, %v1012_v45  ;;  %v1026_v2 = vadd.f32 %v1025_v62, %v1024_v52 }
 0x2fb   : > { %v975_v57 = vrot.slane %v967_v47, %v974_v36  ;;  %v982_v58 = vrot.slane %v968_v48, %v974_v36  ;;  %v1031_v3 = vcombine.low %v1008_v60, %v1014_v61  ;;  %v1032_v6 = vcombine.low %v1020_v0, %v1026_v2 }
 0x2fd   : > { %v983_v63 = vcombine.low %v975_v57, %v982_v58  ;;  %v1039_v7 = vrot.slane %v1031_v3, %v974_v36  ;;  %v1046_v9 = vrot.slane %v1032_v6, %v974_v36 }
 0x2ff   : > { %v990_v4 = vrot.slane %v983_v63, %v974_v36  ;;  %v1047_v10 = vcombine.low %v1039_v7, %v1046_v9 }
 0x301   : > { %v992_v8 = vadd.f32 %v990_v4, %v938_v1  ;;  %v1054_v12 = vrot.slane %v1047_v10, %v974_v36 }
 0x303   : > { %997 = vst.msk [vmem:[#allocation2] sm:$0xf] %vm9601_vm2, %v992_v8  ;;  %v1056_v13 = vadd.f32 %v1054_v12, %v998_v11 }
 0x305   : > { %1057 = vst.msk [vmem:[#allocation3] sm:$0xf] %vm9601_vm2, %v1056_v13 }
 0x306 PF: > { %p7155_p7 = scmp.lt.s32.totalorder %s9217_s17, 1 }
 0x307   : > { %v1141_v14 = vld [vmem:[#allocation14] sm:$0xff] (!%p7155_p7)  ;;  %v1142_v16 = vld [vmem:[#allocation14 + $0x8] sm:$0xff] (!%p7155_p7)  ;;  %p7412_p0 = scmp.ne.s32.totalorder (!%p7155_p7), %s9217_s17, 1 }
 0x308   : > { %1061 = sbr.rel (%p7155_p7) target bundleno = 1974 (0x7b6), region = 116  ;;  %v1145_v15 = vld [vmem:[#allocation14 + $0x20] sm:$0xff] (!%p7155_p7)  ;;  %v1146_v18 = vld [vmem:[#allocation14 + $0x28] sm:$0xff] (!%p7155_p7) }
 0x309   : > { %v7157_v17 = vcombine.high (!%p7155_p7), %v1141_v14, %v1145_v15  ;;  %v7156_v19 = vcombine.low (!%p7155_p7), %v1141_v14, %v1145_v15  ;;  %v1149_v20 = vld [vmem:[#allocation14 + $0x40] sm:$0xff] (!%p7155_p7)  ;;  %v7159_v22 = vcombine.high (!%p7155_p7), %v1142_v16, %v1146_v18  ;;  %v7158_v23 = vcombine.low (!%p7155_p7), %v1142_v16, %v1146_v18  ;;  %v1150_v25 = vld [vmem:[#allocation14 + $0x48] sm:$0xff] (!%p7155_p7) }
 0x30a   : > { %v1153_v21 = vld [vmem:[#allocation14 + $0x60] sm:$0xff] (!%p7155_p7)  ;;  %v1154_v26 = vld [vmem:[#allocation14 + $0x68] sm:$0xff] (!%p7155_p7) }
 0x30b   : > { %v7165_v24 = vcombine.high (!%p7155_p7), %v1149_v20, %v1153_v21  ;;  %v1157_v27 = vld [vmem:[#allocation14 + $0x80] sm:$0xff] (!%p7155_p7)  ;;  %2677 = vmatprep.subr.bf16.mxu0 (!%p7155_p7), %v7157_v17  ;;  %v7167_v5 = vcombine.high (!%p7155_p7), %v1150_v25, %v1154_v26  ;;  %v1158_v29 = vld [vmem:[#allocation14 + $0x88] sm:$0xff] (!%p7155_p7)  ;;  %2759 = vmatprep.subr.bf16.mxu1 (!%p7155_p7), %v7159_v22  ;;  %v7164_v31 = vcombine.low (!%p7155_p7), %v1149_v20, %v1153_v21 }
 0x30c   : > { %v1161_v28 = vld [vmem:[#allocation14 + $0xa0] sm:$0xff] (!%p7155_p7)  ;;  %v1162_v30 = vld [vmem:[#allocation14 + $0xa8] sm:$0xff] (!%p7155_p7)  ;;  %2678 = vmatpush1.bf16.msra.mxu0 (!%p7155_p7), %v7156_v19  ;;  %2760 = vmatpush1.bf16.msra.mxu1 (!%p7155_p7), %v7158_v23  ;;  %v7166_v32 = vcombine.low (!%p7155_p7), %v1150_v25, %v1154_v26 }
 0x30d   : > { %2679 = vmatprep.subr.bf16.mxu0 (!%p7155_p7), %v7165_v24  ;;  %v7173_v33 = vcombine.high (!%p7155_p7), %v1157_v27, %v1161_v28  ;;  %2761 = vmatprep.subr.bf16.mxu1 (!%p7155_p7), %v7167_v5  ;;  %v7175_v34 = vcombine.high (!%p7155_p7), %v1158_v29, %v1162_v30  ;;  %v1165_v35 = vld [vmem:[#allocation14 + $0xc0] sm:$0xff] (!%p7155_p7)  ;;  %v1166_v37 = vld [vmem:[#allocation14 + $0xc8] sm:$0xff] (!%p7155_p7)  ;;  %v7172_v39 = vcombine.low (!%p7155_p7), %v1157_v27, %v1161_v28 }
 0x30e   : > { %v1169_v36 = vld [vmem:[#allocation14 + $0xe0] sm:$0xff] (!%p7155_p7)  ;;  %v1170_v38 = vld [vmem:[#allocation14 + $0xe8] sm:$0xff] (!%p7155_p7)  ;;  %v7174_v40 = vcombine.low (!%p7155_p7), %v1158_v29, %v1162_v30 }
 0x30f   : > { %v7181_v41 = vcombine.high %v1165_v35, %v1169_v36  ;;  %v7183_v42 = vcombine.high %v1166_v37, %v1170_v38  ;;  %v1173_v43 = vld [vmem:[#allocation14 + $0x100] sm:$0xff]  ;;  %v1174_v45 = vld [vmem:[#allocation14 + $0x108] sm:$0xff]  ;;  %v7180_v47 = vcombine.low %v1165_v35, %v1169_v36  ;;  %v7182_v48 = vcombine.low %v1166_v37, %v1170_v38 }
 0x310   : > { %2680 = vmatpush1.bf16.msra.mxu0 %v7164_v31  ;;  %2762 = vmatpush1.bf16.msra.mxu1 %v7166_v32  ;;  %v1177_v44 = vld [vmem:[#allocation14 + $0x120] sm:$0xff]  ;;  %v1178_v46 = vld [vmem:[#allocation14 + $0x128] sm:$0xff] }
 0x311   : > { %2681 = vmatprep.subr.bf16.mxu0 %v7173_v33  ;;  %2763 = vmatprep.subr.bf16.mxu1 %v7175_v34  ;;  %v7189_v49 = vcombine.high %v1173_v43, %v1177_v44  ;;  %v7191_v50 = vcombine.high %v1174_v45, %v1178_v46  ;;  %v1181_v51 = vld [vmem:[#allocation14 + $0x140] sm:$0xff]  ;;  %v1182_v57 = vld [vmem:[#allocation14 + $0x148] sm:$0xff]  ;;  %v7188_v59 = vcombine.low %v1173_v43, %v1177_v44  ;;  %v1076_v34 = vlaneseq }
 0x312   : > { %v1185_v52 = vld [vmem:[#allocation14 + $0x160] sm:$0xff]  ;;  %v1186_v58 = vld [vmem:[#allocation14 + $0x168] sm:$0xff]  ;;  %v7190_v60 = vcombine.low %v1174_v45, %v1178_v46 }
 0x313   : > { %v7197_v61 = vcombine.high %v1181_v51, %v1185_v52  ;;  %v7199_v62 = vcombine.high %v1182_v57, %v1186_v58  ;;  %v1189_v63 = vld [vmem:[#allocation14 + $0x180] sm:$0xff]  ;;  %v1190_v1 = vld [vmem:[#allocation14 + $0x188] sm:$0xff]  ;;  %v7196_v3 = vcombine.low %v1181_v51, %v1185_v52  ;;  %v7198_v4 = vcombine.low %v1182_v57, %v1186_v58 }
 0x314   : > { %2682 = vmatpush1.bf16.msra.mxu0 %v7172_v39  ;;  %2764 = vmatpush1.bf16.msra.mxu1 %v7174_v40  ;;  %v1193_v0 = vld [vmem:[#allocation14 + $0x1a0] sm:$0xff]  ;;  %v1194_v2 = vld [vmem:[#allocation14 + $0x1a8] sm:$0xff]  ;;  %v9630_v43 = vshrl.u32 %v1076_v34, 7 }
 0x315   : > { %2683 = vmatprep.subr.bf16.mxu0 %v7181_v41  ;;  %2765 = vmatprep.subr.bf16.mxu1 %v7183_v42  ;;  %v7205_v6 = vcombine.high %v1189_v63, %v1193_v0  ;;  %v1062_v7 = vld [vmem:[#allocation2] sm:$0xf]  ;;  %v1064_v8 = vld [vmem:[#allocation3] sm:$0xf]  ;;  %v7207_v9 = vcombine.high %v1190_v1, %v1194_v2  ;;  %v1198_v14 = vld [vmem:[#allocation14 + $0x1c8] sm:$0xff]  ;;  %v7204_v16 = vcombine.low %v1189_v63, %v1193_v0 }
 0x316   : > { %v1197_v10 = vld [vmem:[#allocation14 + $0x1c0] sm:$0xff]  ;;  %v9626_v12 = vmul.f32 0.125, %v1062_v7  ;;  %v1065_v13 = vmul.f32 0.125, %v1064_v8  ;;  %v1202_v15 = vld [vmem:[#allocation14 + $0x1e8] sm:$0xff]  ;;  %v7206_v18 = vcombine.low %v1190_v1, %v1194_v2  ;;  %v9633_v57 = vsub.s32 1, %v9630_v43 }
 0x317   : > { %v1201_v11 = vld [vmem:[#allocation14 + $0x1e0] sm:$0xff]  ;;  %v7215_v20 = vcombine.high %v1198_v14, %v1202_v15  ;;  %v1206_v24 = vld [vmem:[#allocation14 + $0x208] sm:$0xff]  ;;  %v7214_v5 = vcombine.low %v1198_v14, %v1202_v15 }
 0x318   : > { %2684 = vmatpush1.bf16.msra.mxu0 %v7180_v47  ;;  %2766 = vmatpush1.bf16.msra.mxu1 %v7182_v48  ;;  %v1066_v17 = vmul.f32 %v9626_v12, %v9626_v12  ;;  %v7213_v19 = vcombine.high %v1197_v10, %v1201_v11  ;;  %v1205_v21 = vld [vmem:[#allocation14 + $0x200] sm:$0xff]  ;;  %v1210_v25 = vld [vmem:[#allocation14 + $0x228] sm:$0xff]  ;;  %v7212_v26 = vcombine.low %v1197_v10, %v1201_v11  ;;  %v9644_v10 = vsub.s32 2, %v9630_v43 }
 0x319   : > { %2685 = vmatprep.subr.bf16.mxu0 %v7189_v49  ;;  %2767 = vmatprep.subr.bf16.mxu1 %v7191_v50  ;;  %v1209_v22 = vld [vmem:[#allocation14 + $0x220] sm:$0xff]  ;;  %v7223_v29 = vcombine.high %v1206_v24, %v1210_v25  ;;  %v1214_v32 = vld [vmem:[#allocation14 + $0x248] sm:$0xff]  ;;  %v7222_v36 = vcombine.low %v1206_v24, %v1210_v25  ;;  %v1068_v50 = vld [vmem:[#allocation11] sm:$0xf] }
 0x31a   : > { %v1067_v23 = vsub.f32 %v1065_v13, %v1066_v17  ;;  %v7221_v28 = vcombine.high %v1205_v21, %v1209_v22  ;;  %v1213_v30 = vld [vmem:[#allocation14 + $0x240] sm:$0xff]  ;;  %v1218_v33 = vld [vmem:[#allocation14 + $0x268] sm:$0xff]  ;;  %v7220_v35 = vcombine.low %v1205_v21, %v1209_v22 }
 0x31b   : > { %v1217_v31 = vld [vmem:[#allocation14 + $0x260] sm:$0xff]  ;;  %v7231_v38 = vcombine.high %v1214_v32, %v1218_v33  ;;  %v1222_v41 = vld [vmem:[#allocation14 + $0x288] sm:$0xff]  ;;  %v7230_v45 = vcombine.low %v1214_v32, %v1218_v33 }
 0x31c   : > { %2686 = vmatpush1.bf16.msra.mxu0 %v7188_v59  ;;  %2768 = vmatpush1.bf16.msra.mxu1 %v7190_v60  ;;  %v1069_v27 = vadd.f32 1e-05, %v1067_v23  ;;  %v7229_v37 = vcombine.high %v1213_v30, %v1217_v31  ;;  %v1221_v39 = vld [vmem:[#allocation14 + $0x280] sm:$0xff]  ;;  %v1226_v42 = vld [vmem:[#allocation14 + $0x2a8] sm:$0xff]  ;;  %v7228_v44 = vcombine.low %v1213_v30, %v1217_v31  ;;  %v9636_v60 = vsub.s32 0, %v9630_v43 }
 0x31d   : > { %2687 = vmatprep.subr.bf16.mxu0 %v7197_v61  ;;  %2769 = vmatprep.subr.bf16.mxu1 %v7199_v62  ;;  %v1225_v40 = vld [vmem:[#allocation14 + $0x2a0] sm:$0xff]  ;;  %v7239_v47 = vcombine.high %v1222_v41, %v1226_v42  ;;  %v1230_v51 = vld [vmem:[#allocation14 + $0x2c8] sm:$0xff]  ;;  %v7238_v61 = vcombine.low %v1222_v41, %v1226_v42 }
 0x31e   : > { %8241 = vrsqrt.f32 %v1069_v27  ;;  %v7237_v46 = vcombine.high %v1221_v39, %v1225_v40  ;;  %v1229_v48 = vld [vmem:[#allocation14 + $0x2c0] sm:$0xff]  ;;  %v1234_v52 = vld [vmem:[#allocation14 + $0x2e8] sm:$0xff]  ;;  %v7236_v59 = vcombine.low %v1221_v39, %v1225_v40 }
 0x31f   : > { %v1233_v49 = vld [vmem:[#allocation14 + $0x2e0] sm:$0xff]  ;;  %v7247_v0 = vcombine.high %v1230_v51, %v1234_v52  ;;  %v7246_v13 = vcombine.low %v1230_v51, %v1234_v52  ;;  %v1246_v21 = vld [vmem:[#allocation14 + $0x348] sm:$0xff] }
 0x320   : > { %2688 = vmatpush1.bf16.msra.mxu0 %v7196_v3  ;;  %2770 = vmatpush1.bf16.msra.mxu1 %v7198_v4  ;;  %v7245_v62 = vcombine.high %v1229_v48, %v1233_v49  ;;  %v1237_v1 = vld [vmem:[#allocation14 + $0x300] sm:$0xff]  ;;  %v1072_v3 = vld [vmem:[#allocation13] sm:$0xf]  ;;  %v1238_v4 = vld [vmem:[#allocation14 + $0x308] sm:$0xff]  ;;  %v7244_v11 = vcombine.low %v1229_v48, %v1233_v49 }
 0x321   : > { %2689 = vmatprep.subr.bf16.mxu0 %v7205_v6  ;;  %2771 = vmatprep.subr.bf16.mxu1 %v7207_v9  ;;  %v1241_v2 = vld [vmem:[#allocation14 + $0x320] sm:$0xff]  ;;  %v1242_v6 = vld [vmem:[#allocation14 + $0x328] sm:$0xff]  ;;  %v9641_v9 = vsub.s32 3, %v9630_v43 }
 0x322   : > { %v7253_v15 = vcombine.high %v1237_v1, %v1241_v2  ;;  %v1250_v22 = vld [vmem:[#allocation14 + $0x368] sm:$0xff]  ;;  %v1253_v32 = vld [vmem:[#allocation14 + $0x380] sm:$0xff] }
 0x323   : > { %v7263_v31 = vcombine.high %v1246_v21, %v1250_v22  ;;  %v1257_v33 = vld [vmem:[#allocation14 + $0x3a0] sm:$0xff]  ;;  %v1254_v34 = vld [vmem:[#allocation14 + $0x388] sm:$0xff] }
 0x324   : > { %2690 = vmatpush1.bf16.msra.mxu0 %v7204_v16  ;;  %2772 = vmatpush1.bf16.msra.mxu1 %v7206_v18  ;;  %v1245_v18 = vld [vmem:[#allocation14 + $0x340] sm:$0xff]  ;;  %v7269_v41 = vcombine.high %v1253_v32, %v1257_v33  ;;  %v1262_v48 = vld [vmem:[#allocation14 + $0x3c8] sm:$0xff] }
 0x325   : > { %2691 = vmatprep.subr.bf16.mxu0 %v7213_v19  ;;  %2773 = vmatprep.subr.bf16.mxu1 %v7215_v20  ;;  %v1249_v19 = vld [vmem:[#allocation14 + $0x360] sm:$0xff]  ;;  %v7252_v20 = vcombine.low %v1237_v1, %v1241_v2 }
 0x328   : > { %2692 = vmatpush1.bf16.msra.mxu0 %v7212_v26  ;;  %2774 = vmatpush1.bf16.msra.mxu1 %v7214_v5  ;;  %v8242_v58 = vpop.eup %8241  ;;  %v7254_v26 = vcombine.low %v1238_v4, %v1242_v6 }
 0x329   : > { %2693 = vmatprep.subr.bf16.mxu0 %v7221_v28  ;;  %2775 = vmatprep.subr.bf16.mxu1 %v7223_v29  ;;  %v1071_v63 = vmul.f32 %v8242_v58, %v1068_v50  ;;  %v7261_v28 = vcombine.high %v1245_v18, %v1249_v19  ;;  %v7268_v50 = vcombine.low %v1253_v32, %v1257_v33 }
 0x32b   : > { %v1073_v7 = vmul.f32 %v1071_v63, %v9626_v12  ;;  %v1083_v8 = vrot.slane %v1071_v63, %v9633_v57  ;;  %v1079_v14 = vrot.slane %v1071_v63, %v9636_v60  ;;  %v7255_v12 = vcombine.high %v1238_v4, %v1242_v6 }
 0x32c   : > { %2694 = vmatpush1.bf16.msra.mxu0 %v7220_v35  ;;  %2776 = vmatpush1.bf16.msra.mxu1 %v7222_v36  ;;  %v1091_v24 = vrot.slane %v1071_v63, %v9641_v9  ;;  %v1087_v25 = vrot.slane %v1071_v63, %v9644_v10  ;;  %v1258_v35 = vld [vmem:[#allocation14 + $0x3a8] sm:$0xff] }
 0x32d   : > { %2695 = vmatprep.subr.bf16.mxu0 %v7229_v37  ;;  %2777 = vmatprep.subr.bf16.mxu1 %v7231_v38  ;;  %v1074_v16 = vsub.f32 %v1072_v3, %v1073_v7  ;;  %v1097_v17 = vmul.f32 %v1083_v8, %v9592_v55  ;;  %v1096_v27 = vmul.f32 %v1079_v14, %v9588_v53  ;;  %v1270_v63 = vld [vmem:[#allocation14 + $0x408] sm:$0xff]  ;;  %v1277_v8 = vld [vmem:[#allocation14 + $0x440] sm:$0xff] }
 0x32e   : > { %v1098_v30 = vmul.f32 %v1087_v25, %v9590_v54  ;;  %v1099_v53 = vmul.f32 %v1091_v24, %v9594_v56  ;;  %v7260_v38 = vcombine.low %v1245_v18, %v1249_v19  ;;  %v7262_v54 = vcombine.low %v1246_v21, %v1250_v22  ;;  %v1266_v56 = vld [vmem:[#allocation14 + $0x3e8] sm:$0xff]  ;;  %v1289_v21 = vld [vmem:[#allocation14 + $0x4a0] sm:$0xff] }
 0x32f   : > { %v1108_v23 = vrot.slane %v1074_v16, %v9633_v57  ;;  %v1104_v5 = vrot.slane %v1074_v16, %v9636_v60  ;;  %v1112_v55 = vrot.slane %v1074_v16, %v9644_v10  ;;  %v1116_v37 = vrot.slane %v1074_v16, %v9641_v9  ;;  %v1278_v14 = vld [vmem:[#allocation14 + $0x448] sm:$0xff] }
 0x330   : > { %2696 = vmatpush1.bf16.msra.mxu0 %v7228_v44  ;;  %2778 = vmatpush1.bf16.msra.mxu1 %v7230_v45  ;;  %v7271_v44 = vcombine.high %v1254_v34, %v1258_v35  ;;  %v1261_v45 = vld [vmem:[#allocation14 + $0x3c0] sm:$0xff]  ;;  %v7270_v52 = vcombine.low %v1254_v34, %v1258_v35  ;;  %v7278_v4 = vcombine.low %v1262_v48, %v1266_v56  ;;  %v1290_v24 = vld [vmem:[#allocation14 + $0x4a8] sm:$0xff] }
 0x331   : > { %2697 = vmatprep.subr.bf16.mxu0 %v7237_v46  ;;  %2779 = vmatprep.subr.bf16.mxu1 %v7239_v47  ;;  %v1122_v29 = vadd.f32 %v1108_v23, %v1097_v17  ;;  %v1121_v39 = vadd.f32 %v1104_v5, %v1096_v27  ;;  %v9657_v40 = vadd.f32 %v1112_v55, %v1098_v30  ;;  %v1265_v46 = vld [vmem:[#allocation14 + $0x3e0] sm:$0xff]  ;;  %v1286_v23 = vld [vmem:[#allocation14 + $0x488] sm:$0xff] }
 0x332   : > { %v1124_v49 = vadd.f32 %v1116_v37, %v1099_v53  ;;  %v7277_v58 = vcombine.high %v1261_v45, %v1265_v46  ;;  %v7276_v2 = vcombine.low %v1261_v45, %v1265_v46  ;;  %v7303_v5 = vcombine.high %v1286_v23, %v1290_v24  ;;  %v1293_v55 = vld [vmem:[#allocation14 + $0x4c0] sm:$0xff]  ;;  %v1298_v30 = vld [vmem:[#allocation14 + $0x4e8] sm:$0xff] }
 0x333   : > { %vm1126_vm3 = vcmp.ge.f32.partialorder %v1122_v29, 0.0  ;;  %v1130_v36 = vmul.f32 0.2, %v1122_v29  ;;  %v1129_v51 = vmul.f32 0.2, %v1121_v39  ;;  %vm1125_vm4 = vcmp.ge.f32.partialorder %v1121_v39, 0.0 }
 0x334   : > { %2698 = vmatpush1.bf16.msra.mxu0 %v7236_v59  ;;  %2780 = vmatpush1.bf16.msra.mxu1 %v7238_v61  ;;  %v7279_v59 = vcombine.high %v1262_v48, %v1266_v56  ;;  %v1269_v61 = vld [vmem:[#allocation14 + $0x400] sm:$0xff]  ;;  %v1132_v1 = vmul.f32 0.2, %v1124_v49  ;;  %vm1128_vm5 = vcmp.ge.f32.partialorder %v1124_v49, 0.0  ;;  %v7302_v32 = vcombine.low %v1286_v23, %v1290_v24  ;;  %v1302_v53 = vld [vmem:[#allocation14 + $0x508] sm:$0xff] }
 0x335   : > { %2699 = vmatprep.subr.bf16.mxu0 %v7245_v62  ;;  %2781 = vmatprep.subr.bf16.mxu1 %v7247_v0  ;;  %v1134_v42 = vsel %vm1126_vm3, %v1122_v29, %v1130_v36  ;;  %v1273_v62 = vld [vmem:[#allocation14 + $0x420] sm:$0xff]  ;;  %v1274_v0 = vld [vmem:[#allocation14 + $0x428] sm:$0xff]  ;;  %v1133_v3 = vsel %vm1125_vm4, %v1121_v39, %v1129_v51  ;;  %vm1127_vm6 = vcmp.ge.f32.partialorder %v9657_v40, 0.0 }
 0x336   : > { %v9659_v47 = vpack.c.bf16 %v1134_v42, %v1134_v42  ;;  %v7285_v6 = vcombine.high %v1269_v61, %v1273_v62  ;;  %v7287_v7 = vcombine.high %v1270_v63, %v1274_v0  ;;  %v1136_v16 = vsel %vm1128_vm5, %v1124_v49, %v1132_v1  ;;  %v1294_v29 = vld [vmem:[#allocation14 + $0x4c8] sm:$0xff]  ;;  %v1301_v35 = vld [vmem:[#allocation14 + $0x500] sm:$0xff] }
 0x337   : > { %v7284_v17 = vcombine.low %v1269_v61, %v1273_v62  ;;  %v9665_v22 = vpack.c.bf16 %v1136_v16, %v1136_v16  ;;  %v7311_v34 = vcombine.high %v1294_v29, %v1298_v30  ;;  %v1305_v36 = vld [vmem:[#allocation14 + $0x520] sm:$0xff]  ;;  %v1306_v37 = vld [vmem:[#allocation14 + $0x528] sm:$0xff]  ;;  %v7310_v39 = vcombine.low %v1294_v29, %v1298_v30 }
 0x338   : > { %2700 = vmatpush1.bf16.msra.mxu0 %v7244_v11  ;;  %2782 = vmatpush1.bf16.msra.mxu1 %v7246_v13  ;;  %v1281_v11 = vld [vmem:[#allocation14 + $0x460] sm:$0xff]  ;;  %v9663_v13 = vpack.c.bf16 %v1133_v3, %v1133_v3  ;;  %v1310_v45 = vld [vmem:[#allocation14 + $0x548] sm:$0xff]  ;;  %v7316_v48 = vcombine.low %v1301_v35, %v1305_v36  ;;  %v7318_v56 = vcombine.low %v1302_v53, %v1306_v37 }
 0x339   : > { %2701 = vmatprep.subr.bf16.mxu0 %v7253_v15  ;;  %2783 = vmatprep.subr.bf16.mxu1 %v7255_v12  ;;  %v1282_v15 = vld [vmem:[#allocation14 + $0x468] sm:$0xff]  ;;  %v7286_v12 = vcombine.low %v1270_v63, %v1274_v0  ;;  %v7293_v18 = vcombine.high %v1277_v8, %v1281_v11  ;;  %v7292_v25 = vcombine.low %v1277_v8, %v1281_v11  ;;  %v1309_v42 = vld [vmem:[#allocation14 + $0x540] sm:$0xff] }
 0x33a   : > { %2709 = vmatprep.mubr.bf16.mxu0 %v9659_v47  ;;  %2791 = vmatprep.mubr.bf16.mxu1 %v9659_v47  ;;  %v7295_v19 = vcombine.high %v1278_v14, %v1282_v15  ;;  %v1314_v46 = vld [vmem:[#allocation14 + $0x568] sm:$0xff]  ;;  %v1317_v51 = vld [vmem:[#allocation14 + $0x580] sm:$0xff] }
 0x33b   : > { %v7326_v62 = vcombine.low %v1310_v45, %v1314_v46  ;;  %v1325_v1 = vld [vmem:[#allocation14 + $0x5c0] sm:$0xff]  ;;  %v1326_v3 = vld [vmem:[#allocation14 + $0x5c8] sm:$0xff] }
 0x33c   : > { %2702 = vmatpush1.bf16.msra.mxu0 %v7252_v20  ;;  %2784 = vmatpush1.bf16.msra.mxu1 %v7254_v26  ;;  %v1285_v20 = vld [vmem:[#allocation14 + $0x480] sm:$0xff]  ;;  %v7294_v26 = vcombine.low %v1278_v14, %v1282_v15  ;;  %v1334_v16 = vld [vmem:[#allocation14 + $0x608] sm:$0xff] }
 0x33d   : > { %2703 = vmatprep.subr.bf16.mxu0 %v7261_v28  ;;  %2785 = vmatprep.subr.bf16.mxu1 %v7263_v31  ;;  %v7301_v27 = vcombine.high %v1285_v20, %v1289_v21  ;;  %v1297_v28 = vld [vmem:[#allocation14 + $0x4e0] sm:$0xff]  ;;  %v7300_v31 = vcombine.low %v1285_v20, %v1289_v21  ;;  %v1342_v24 = vld [vmem:[#allocation14 + $0x648] sm:$0xff] }
 0x33e   : > { %v7309_v33 = vcombine.high %v1293_v55, %v1297_v28  ;;  %v1333_v14 = vld [vmem:[#allocation14 + $0x600] sm:$0xff]  ;;  %v1350_v30 = vld [vmem:[#allocation14 + $0x688] sm:$0xff] }
 0x33f   : > { %v1337_v15 = vld [vmem:[#allocation14 + $0x620] sm:$0xff] }
 0x340   : > { %2704 = vmatpush1.bf16.msra.mxu0 %v7260_v38  ;;  %2786 = vmatpush1.bf16.msra.mxu1 %v7262_v54  ;;  %v7308_v38 = vcombine.low %v1293_v55, %v1297_v28  ;;  %v7317_v54 = vcombine.high %v1301_v35, %v1305_v36  ;;  %v1341_v21 = vld [vmem:[#allocation14 + $0x640] sm:$0xff] }
 0x341   : > { %2705 = vmatprep.subr.bf16.mxu0 %v7269_v41  ;;  %2787 = vmatprep.subr.bf16.mxu1 %v7271_v44  ;;  %v7319_v41 = vcombine.high %v1302_v53, %v1306_v37  ;;  %v1313_v44 = vld [vmem:[#allocation14 + $0x560] sm:$0xff]  ;;  %v1358_v37 = vld [vmem:[#allocation14 + $0x6c8] sm:$0xff] }
 0x342   : > { %v7325_v49 = vcombine.high %v1309_v42, %v1313_v44  ;;  %v7324_v61 = vcombine.low %v1309_v42, %v1313_v44  ;;  %v1345_v23 = vld [vmem:[#allocation14 + $0x660] sm:$0xff] }
 0x343   : > { %v1349_v28 = vld [vmem:[#allocation14 + $0x680] sm:$0xff] }
 0x344   : > { %2706 = vmatpush1.bf16.msra.mxu0 %v7268_v50  ;;  %2788 = vmatpush1.bf16.msra.mxu1 %v7270_v52  ;;  %v7327_v50 = vcombine.high %v1310_v45, %v1314_v46  ;;  %v1321_v52 = vld [vmem:[#allocation14 + $0x5a0] sm:$0xff]  ;;  %v1366_v46 = vld [vmem:[#allocation14 + $0x708] sm:$0xff] }
 0x345   : > { %2707 = vmatprep.subr.bf16.mxu0 %v7277_v58  ;;  %2789 = vmatprep.subr.bf16.mxu1 %v7279_v59  ;;  %v1318_v58 = vld [vmem:[#allocation14 + $0x588] sm:$0xff]  ;;  %v7333_v63 = vcombine.high %v1317_v51, %v1321_v52  ;;  %v1353_v29 = vld [vmem:[#allocation14 + $0x6a0] sm:$0xff] }
 0x346   : > { %v1322_v59 = vld [vmem:[#allocation14 + $0x5a8] sm:$0xff]  ;;  %v1357_v36 = vld [vmem:[#allocation14 + $0x6c0] sm:$0xff] }
 0x347   : > { %v7335_v0 = vcombine.high %v1318_v58, %v1322_v59  ;;  %v1361_v53 = vld [vmem:[#allocation14 + $0x6e0] sm:$0xff] }
 0x348   : > { %2708 = vmatpush1.bf16.msra.mxu0 %v7276_v2  ;;  %2790 = vmatpush1.bf16.msra.mxu1 %v7278_v4  ;;  %v1329_v2 = vld [vmem:[#allocation14 + $0x5e0] sm:$0xff]  ;;  %v1330_v4 = vld [vmem:[#allocation14 + $0x5e8] sm:$0xff] }
 0x349   : > { %2718 = vmatprep.subr.bf16.mxu0 %v7285_v6  ;;  %2800 = vmatprep.subr.bf16.mxu1 %v7287_v7  ;;  %v7332_v6 = vcombine.low %v1317_v51, %v1321_v52  ;;  %v7334_v7 = vcombine.low %v1318_v58, %v1322_v59  ;;  %v7341_v8 = vcombine.high %v1325_v1, %v1329_v2  ;;  %v1365_v44 = vld [vmem:[#allocation14 + $0x700] sm:$0xff]  ;;  %v1374_v59 = vld [vmem:[#allocation14 + $0x748] sm:$0xff] }
 0x34a   : > { %v7343_v11 = vcombine.high %v1326_v3, %v1330_v4  ;;  %v1369_v45 = vld [vmem:[#allocation14 + $0x720] sm:$0xff] }
 0x34b   : > { %2710 = vmatmul.mubr.bf16.vlgmr.msra.gmra.mrb[0].mxu0 %v9663_v13  ;;  %2792 = vmatmul.mubr.bf16.vlgmr.msra.gmra.mrb[0].mxu1 %v9663_v13  ;;  %v1373_v52 = vld [vmem:[#allocation14 + $0x740] sm:$0xff] }
 0x34c   : > { %2719 = vmatpush1.bf16.msra.mxu0 %v7284_v17  ;;  %2801 = vmatpush1.bf16.msra.mxu1 %v7286_v12  ;;  %v1338_v17 = vld [vmem:[#allocation14 + $0x628] sm:$0xff]  ;;  %v7340_v12 = vcombine.low %v1325_v1, %v1329_v2  ;;  %v1377_v58 = vld [vmem:[#allocation14 + $0x760] sm:$0xff] }
 0x34d   : > { %2720 = vmatprep.subr.bf16.mxu0 %v7293_v18  ;;  %2802 = vmatprep.subr.bf16.mxu1 %v7295_v19  ;;  %v7342_v18 = vcombine.low %v1326_v3, %v1330_v4  ;;  %v7349_v19 = vcombine.high %v1333_v14, %v1337_v15  ;;  %v7351_v20 = vcombine.high %v1334_v16, %v1338_v17  ;;  %v1381_v2 = vld [vmem:[#allocation14 + $0x780] sm:$0xff]  ;;  %v1382_v4 = vld [vmem:[#allocation14 + $0x788] sm:$0xff] }
 0x34e   : > { %2750 = vmatprep.mubr.bf16.mxu0 %v9665_v22  ;;  %2832 = vmatprep.mubr.bf16.mxu1 %v9665_v22  ;;  %v1385_v3 = vld [vmem:[#allocation14 + $0x7a0] sm:$0xff] }
 0x350   : > { %2721 = vmatpush1.bf16.msra.mxu0 %v7292_v25  ;;  %2803 = vmatpush1.bf16.msra.mxu1 %v7294_v26  ;;  %v1346_v25 = vld [vmem:[#allocation14 + $0x668] sm:$0xff]  ;;  %v7348_v26 = vcombine.low %v1333_v14, %v1337_v15  ;;  %v1389_v15 = vld [vmem:[#allocation14 + $0x7c0] sm:$0xff] }
 0x351   : > { %2722 = vmatprep.subr.bf16.mxu0 %v7301_v27  ;;  %2804 = vmatprep.subr.bf16.mxu1 %v7303_v5  ;;  %v7350_v27 = vcombine.low %v1334_v16, %v1338_v17  ;;  %v7357_v5 = vcombine.high %v1341_v21, %v1345_v23  ;;  %v7359_v55 = vcombine.high %v1342_v24, %v1346_v25  ;;  %v1393_v16 = vld [vmem:[#allocation14 + $0x7e0] sm:$0xff]  ;;  %v1390_v17 = vld [vmem:[#allocation14 + $0x7c8] sm:$0xff] }
 0x354   : > { %2723 = vmatpush1.bf16.msra.mxu0 %v7300_v31  ;;  %2805 = vmatpush1.bf16.msra.mxu1 %v7302_v32  ;;  %v1354_v31 = vld [vmem:[#allocation14 + $0x6a8] sm:$0xff]  ;;  %v7356_v32 = vcombine.low %v1341_v21, %v1345_v23  ;;  %v7405_v21 = vcombine.high %v1389_v15, %v1393_v16 }
 0x355   : > { %2724 = vmatprep.subr.bf16.mxu0 %v7309_v33  ;;  %2806 = vmatprep.subr.bf16.mxu1 %v7311_v34  ;;  %v7358_v33 = vcombine.low %v1342_v24, %v1346_v25  ;;  %v7365_v34 = vcombine.high %v1349_v28, %v1353_v29  ;;  %v7367_v35 = vcombine.high %v1350_v30, %v1354_v31  ;;  %v1143_v24 = vld [vmem:[#allocation14 + $0x10] sm:$0xff] }
 0x356   : > { %v1147_v25 = vld [vmem:[#allocation14 + $0x30] sm:$0xff] }
 0x358   : > { %2725 = vmatpush1.bf16.msra.mxu0 %v7308_v38  ;;  %2807 = vmatpush1.bf16.msra.mxu1 %v7310_v39  ;;  %v1362_v38 = vld [vmem:[#allocation14 + $0x6e8] sm:$0xff]  ;;  %v7364_v39 = vcombine.low %v1349_v28, %v1353_v29  ;;  %v7161_v29 = vcombine.high %v1143_v24, %v1147_v25 }
 0x359   : > { %2726 = vmatprep.subr.bf16.mxu0 %v7317_v54  ;;  %2808 = vmatprep.subr.bf16.mxu1 %v7319_v41  ;;  %v7366_v54 = vcombine.low %v1350_v30, %v1354_v31  ;;  %v7373_v41 = vcombine.high %v1357_v36, %v1361_v53  ;;  %v7375_v42 = vcombine.high %v1358_v37, %v1362_v38  ;;  %v1151_v31 = vld [vmem:[#allocation14 + $0x50] sm:$0xff] }
 0x35c   : > { %2727 = vmatpush1.bf16.msra.mxu0 %v7316_v48  ;;  %2809 = vmatpush1.bf16.msra.mxu1 %v7318_v56  ;;  %v1370_v48 = vld [vmem:[#allocation14 + $0x728] sm:$0xff]  ;;  %v7372_v56 = vcombine.low %v1357_v36, %v1361_v53  ;;  %v7160_v36 = vcombine.low %v1143_v24, %v1147_v25  ;;  %v1199_v25 = vld [vmem:[#allocation14 + $0x1d0] sm:$0xff] }
 0x35d   : > { %2728 = vmatprep.subr.bf16.mxu0 %v7325_v49  ;;  %2810 = vmatprep.subr.bf16.mxu1 %v7327_v50  ;;  %v7374_v49 = vcombine.low %v1358_v37, %v1362_v38  ;;  %v7381_v50 = vcombine.high %v1365_v44, %v1369_v45  ;;  %v7383_v51 = vcombine.high %v1366_v46, %v1370_v48  ;;  %v1159_v38 = vld [vmem:[#allocation14 + $0x90] sm:$0xff] }
 0x360   : > { %2729 = vmatpush1.bf16.msra.mxu0 %v7324_v61  ;;  %2811 = vmatpush1.bf16.msra.mxu1 %v7326_v62  ;;  %v1378_v61 = vld [vmem:[#allocation14 + $0x768] sm:$0xff]  ;;  %v7380_v62 = vcombine.low %v1365_v44, %v1369_v45 }
 0x361   : > { %2730 = vmatprep.subr.bf16.mxu0 %v7333_v63  ;;  %2812 = vmatprep.subr.bf16.mxu1 %v7335_v0  ;;  %v7382_v63 = vcombine.low %v1366_v46, %v1370_v48  ;;  %v7389_v0 = vcombine.high %v1373_v52, %v1377_v58  ;;  %v7391_v1 = vcombine.high %v1374_v59, %v1378_v61  ;;  %v1167_v48 = vld [vmem:[#allocation14 + $0xd0] sm:$0xff] }
 0x364   : > { %2731 = vmatpush1.bf16.msra.mxu0 %v7332_v6  ;;  %2813 = vmatpush1.bf16.msra.mxu1 %v7334_v7  ;;  %v1386_v6 = vld [vmem:[#allocation14 + $0x7a8] sm:$0xff]  ;;  %v7388_v7 = vcombine.low %v1373_v52, %v1377_v58 }
 0x365   : > { %2732 = vmatprep.subr.bf16.mxu0 %v7341_v8  ;;  %2814 = vmatprep.subr.bf16.mxu1 %v7343_v11  ;;  %v7390_v8 = vcombine.low %v1374_v59, %v1378_v61  ;;  %v7397_v11 = vcombine.high %v1381_v2, %v1385_v3  ;;  %v7399_v14 = vcombine.high %v1382_v4, %v1386_v6  ;;  %v1175_v61 = vld [vmem:[#allocation14 + $0x110] sm:$0xff] }
 0x368   : > { %2733 = vmatpush1.bf16.msra.mxu0 %v7340_v12  ;;  %2815 = vmatpush1.bf16.msra.mxu1 %v7342_v18  ;;  %v1394_v12 = vld [vmem:[#allocation14 + $0x7e8] sm:$0xff]  ;;  %v7396_v18 = vcombine.low %v1381_v2, %v1385_v3 }
 0x369   : > { %2734 = vmatprep.subr.bf16.mxu0 %v7349_v19  ;;  %2816 = vmatprep.subr.bf16.mxu1 %v7351_v20  ;;  %v1131_v19 = vmul.f32 0.2, %v9657_v40  ;;  %v7398_v20 = vcombine.low %v1382_v4, %v1386_v6  ;;  %v7407_v23 = vcombine.high %v1390_v17, %v1394_v12  ;;  %v7406_v28 = vcombine.low %v1390_v17, %v1394_v12  ;;  %v1183_v4 = vld [vmem:[#allocation14 + $0x150] sm:$0xff] }
 0x36a   : > { %v1187_v6 = vld [vmem:[#allocation14 + $0x170] sm:$0xff] }
 0x36b   : > { %v1191_v17 = vld [vmem:[#allocation14 + $0x190] sm:$0xff] }
 0x36c   : > { %2735 = vmatpush1.bf16.msra.mxu0 %v7348_v26  ;;  %2817 = vmatpush1.bf16.msra.mxu1 %v7350_v27  ;;  %v1144_v26 = vld [vmem:[#allocation14 + $0x18] sm:$0xff]  ;;  %v1195_v12 = vld [vmem:[#allocation14 + $0x1b0] sm:$0xff] }
 0x36d   : > { %2736 = vmatprep.subr.bf16.mxu0 %v7357_v5  ;;  %2818 = vmatprep.subr.bf16.mxu1 %v7359_v55  ;;  %v1148_v27 = vld [vmem:[#allocation14 + $0x38] sm:$0xff]  ;;  %v7404_v5 = vcombine.low %v1389_v15, %v1393_v16  ;;  %v1135_v55 = vsel %vm1127_vm6, %v9657_v40, %v1131_v19  ;;  %v7201_v15 = vcombine.high %v1183_v4, %v1187_v6 }
 0x36e   : > { %v7163_v30 = vcombine.high %v1144_v26, %v1148_v27  ;;  %v7162_v53 = vcombine.low %v1144_v26, %v1148_v27  ;;  %v1196_v19 = vld [vmem:[#allocation14 + $0x1b8] sm:$0xff]  ;;  %v1203_v26 = vld [vmem:[#allocation14 + $0x1f0] sm:$0xff] }
 0x36f   : > { %v1200_v27 = vld [vmem:[#allocation14 + $0x1d8] sm:$0xff] }
 0x370   : > { %2737 = vmatpush1.bf16.msra.mxu0 %v7356_v32  ;;  %2819 = vmatpush1.bf16.msra.mxu1 %v7358_v33  ;;  %v1155_v32 = vld [vmem:[#allocation14 + $0x70] sm:$0xff]  ;;  %v9674_v33 = vpack.c.bf16 %v1135_v55, %v1135_v55  ;;  %v7208_v55 = vcombine.low %v1191_v17, %v1195_v12 }
 0x371   : > { %2738 = vmatprep.subr.bf16.mxu0 %v7365_v34  ;;  %2820 = vmatprep.subr.bf16.mxu1 %v7367_v35  ;;  %v1152_v34 = vld [vmem:[#allocation14 + $0x58] sm:$0xff]  ;;  %v7169_v37 = vcombine.high %v1151_v31, %v1155_v32 }
 0x372   : > { %v1156_v35 = vld [vmem:[#allocation14 + $0x78] sm:$0xff] }
 0x373   : > { %v7171_v40 = vcombine.high %v1152_v34, %v1156_v35  ;;  %v7170_v44 = vcombine.low %v1152_v34, %v1156_v35  ;;  %v1208_v34 = vld [vmem:[#allocation14 + $0x218] sm:$0xff] }
 0x374   : > { %2739 = vmatpush1.bf16.msra.mxu0 %v7364_v39  ;;  %2821 = vmatpush1.bf16.msra.mxu1 %v7366_v54  ;;  %v1163_v39 = vld [vmem:[#allocation14 + $0xb0] sm:$0xff]  ;;  %v1160_v54 = vld [vmem:[#allocation14 + $0x98] sm:$0xff] }
 0x375   : > { %2740 = vmatprep.subr.bf16.mxu0 %v7373_v41  ;;  %2822 = vmatprep.subr.bf16.mxu1 %v7375_v42  ;;  %v1164_v41 = vld [vmem:[#allocation14 + $0xb8] sm:$0xff]  ;;  %v7168_v42 = vcombine.low %v1151_v31, %v1155_v32  ;;  %v7177_v45 = vcombine.high %v1159_v38, %v1163_v39  ;;  %v1207_v31 = vld [vmem:[#allocation14 + $0x210] sm:$0xff] }
 0x376   : > { %v7179_v46 = vcombine.high %v1160_v54, %v1164_v41  ;;  %v7178_v52 = vcombine.low %v1160_v54, %v1164_v41  ;;  %v1211_v32 = vld [vmem:[#allocation14 + $0x230] sm:$0xff]  ;;  %v1212_v35 = vld [vmem:[#allocation14 + $0x238] sm:$0xff] }
 0x377   : > { %v1216_v54 = vld [vmem:[#allocation14 + $0x258] sm:$0xff] }
 0x378   : > { %2741 = vmatpush1.bf16.msra.mxu0 %v7372_v56  ;;  %2823 = vmatpush1.bf16.msra.mxu1 %v7374_v49  ;;  %v1171_v56 = vld [vmem:[#allocation14 + $0xf0] sm:$0xff]  ;;  %v1168_v49 = vld [vmem:[#allocation14 + $0xd8] sm:$0xff] }
 0x379   : > { %2742 = vmatprep.subr.bf16.mxu0 %v7381_v50  ;;  %2824 = vmatprep.subr.bf16.mxu1 %v7383_v51  ;;  %v1172_v50 = vld [vmem:[#allocation14 + $0xf8] sm:$0xff]  ;;  %v7176_v51 = vcombine.low %v1159_v38, %v1163_v39  ;;  %v7185_v58 = vcombine.high %v1167_v48, %v1171_v56  ;;  %v1215_v38 = vld [vmem:[#allocation14 + $0x250] sm:$0xff] }
 0x37a   : > { %v7187_v59 = vcombine.high %v1168_v49, %v1172_v50  ;;  %v7186_v2 = vcombine.low %v1168_v49, %v1172_v50  ;;  %v1219_v39 = vld [vmem:[#allocation14 + $0x270] sm:$0xff]  ;;  %v1220_v41 = vld [vmem:[#allocation14 + $0x278] sm:$0xff] }
 0x37b   : > { %v1224_v49 = vld [vmem:[#allocation14 + $0x298] sm:$0xff] }
 0x37c   : > { %2743 = vmatpush1.bf16.msra.mxu0 %v7380_v62  ;;  %2825 = vmatpush1.bf16.msra.mxu1 %v7382_v63  ;;  %v1179_v62 = vld [vmem:[#allocation14 + $0x130] sm:$0xff]  ;;  %v1176_v63 = vld [vmem:[#allocation14 + $0x118] sm:$0xff] }
 0x37d   : > { %2744 = vmatprep.subr.bf16.mxu0 %v7389_v0  ;;  %2826 = vmatprep.subr.bf16.mxu1 %v7391_v1  ;;  %v1180_v0 = vld [vmem:[#allocation14 + $0x138] sm:$0xff]  ;;  %v7184_v1 = vcombine.low %v1167_v48, %v1171_v56  ;;  %v7193_v3 = vcombine.high %v1175_v61, %v1179_v62  ;;  %v1223_v48 = vld [vmem:[#allocation14 + $0x290] sm:$0xff] }
 0x37e   : > { %v1227_v56 = vld [vmem:[#allocation14 + $0x2b0] sm:$0xff]  ;;  %v1228_v50 = vld [vmem:[#allocation14 + $0x2b8] sm:$0xff] }
 0x380   : > { %2745 = vmatpush1.bf16.msra.mxu0 %v7388_v7  ;;  %2827 = vmatpush1.bf16.msra.mxu1 %v7390_v8  ;;  %v1184_v7 = vld [vmem:[#allocation14 + $0x158] sm:$0xff] }
 0x381   : > { %2746 = vmatprep.subr.bf16.mxu0 %v7397_v11  ;;  %2828 = vmatprep.subr.bf16.mxu1 %v7399_v14  ;;  %v1188_v8 = vld [vmem:[#allocation14 + $0x178] sm:$0xff]  ;;  %v7192_v11 = vcombine.low %v1175_v61, %v1179_v62  ;;  %v7194_v14 = vcombine.low %v1176_v63, %v1180_v0  ;;  %v1231_v61 = vld [vmem:[#allocation14 + $0x2d0] sm:$0xff] }
 0x382   : > { %v7203_v16 = vcombine.high %v1184_v7, %v1188_v8  ;;  %v1235_v62 = vld [vmem:[#allocation14 + $0x2f0] sm:$0xff] }
 0x384   : > { %2747 = vmatpush1.bf16.msra.mxu0 %v7396_v18  ;;  %2829 = vmatpush1.bf16.msra.mxu1 %v7398_v20  ;;  %v1192_v18 = vld [vmem:[#allocation14 + $0x198] sm:$0xff]  ;;  %v7200_v20 = vcombine.low %v1183_v4, %v1187_v6  ;;  %v1239_v4 = vld [vmem:[#allocation14 + $0x310] sm:$0xff] }
 0x385   : > { %2748 = vmatprep.subr.bf16.mxu0 %v7405_v21  ;;  %2830 = vmatprep.subr.bf16.mxu1 %v7407_v23  ;;  %v7202_v21 = vcombine.low %v1184_v7, %v1188_v8  ;;  %v7209_v23 = vcombine.high %v1191_v17, %v1195_v12  ;;  %v7211_v24 = vcombine.high %v1192_v18, %v1196_v19  ;;  %v1243_v6 = vld [vmem:[#allocation14 + $0x330] sm:$0xff]  ;;  %v1240_v7 = vld [vmem:[#allocation14 + $0x318] sm:$0xff] }
 0x386   : > { %v1244_v8 = vld [vmem:[#allocation14 + $0x338] sm:$0xff]  ;;  %v1247_v17 = vld [vmem:[#allocation14 + $0x350] sm:$0xff] }
 0x387   : > { %v1251_v12 = vld [vmem:[#allocation14 + $0x370] sm:$0xff] }
 0x388   : > { %2749 = vmatpush1.bf16.msra.mxu0 %v7404_v5  ;;  %2831 = vmatpush1.bf16.msra.mxu1 %v7406_v28  ;;  %v1204_v5 = vld [vmem:[#allocation14 + $0x1f8] sm:$0xff]  ;;  %v7210_v28 = vcombine.low %v1192_v18, %v1196_v19 }
 0x389   : > { %2841 = vmatprep.subr.bf16.mxu0 %v7161_v29  ;;  %2923 = vmatprep.subr.bf16.mxu1 %v7163_v30  ;;  %v7217_v29 = vcombine.high %v1199_v25, %v1203_v26  ;;  %v7219_v30 = vcombine.high %v1200_v27, %v1204_v5  ;;  %v1248_v18 = vld [vmem:[#allocation14 + $0x358] sm:$0xff] }
 0x38a   : > { %v1252_v19 = vld [vmem:[#allocation14 + $0x378] sm:$0xff] }
 0x38b   : > { %2751 = vmatmul.mubr.bf16.vlgmr.msra.gmra.mrb[0].mxu0 %v9674_v33  ;;  %2833 = vmatmul.mubr.bf16.vlgmr.msra.gmra.mrb[0].mxu1 %v9674_v33 }
 0x38c   : > { %2842 = vmatpush1.bf16.msra.mxu0 %v7160_v36  ;;  %2924 = vmatpush1.bf16.msra.mxu1 %v7162_v53  ;;  %v7216_v36 = vcombine.low %v1199_v25, %v1203_v26  ;;  %v7218_v53 = vcombine.low %v1200_v27, %v1204_v5  ;;  %v1255_v25 = vld [vmem:[#allocation14 + $0x390] sm:$0xff]  ;;  %v1256_v27 = vld [vmem:[#allocation14 + $0x398] sm:$0xff] }
 0x38d   : > { %2843 = vmatprep.subr.bf16.mxu0 %v7169_v37  ;;  %2925 = vmatprep.subr.bf16.mxu1 %v7171_v40  ;;  %v7225_v37 = vcombine.high %v1207_v31, %v1211_v32  ;;  %v7227_v40 = vcombine.high %v1208_v34, %v1212_v35  ;;  %v1259_v26 = vld [vmem:[#allocation14 + $0x3b0] sm:$0xff]  ;;  %v1260_v5 = vld [vmem:[#allocation14 + $0x3b8] sm:$0xff] }
 0x38e   : > { %2873 = vmatprep.mubr.bf16.mxu0 %v9659_v47  ;;  %2955 = vmatprep.mubr.bf16.mxu1 %v9659_v47  ;;  %v7195_v47 = vcombine.high %v1176_v63, %v1180_v0  ;;  %v1232_v63 = vld [vmem:[#allocation14 + $0x2d8] sm:$0xff] }
 0x38f   : > { %v1236_v0 = vld [vmem:[#allocation14 + $0x2f8] sm:$0xff] }
 0x390   : > { %2844 = vmatpush1.bf16.msra.mxu0 %v7168_v42  ;;  %2926 = vmatpush1.bf16.msra.mxu1 %v7170_v44  ;;  %v7224_v42 = vcombine.low %v1207_v31, %v1211_v32  ;;  %v7226_v44 = vcombine.low %v1208_v34, %v1212_v35  ;;  %v1263_v31 = vld [vmem:[#allocation14 + $0x3d0] sm:$0xff]  ;;  %v1264_v34 = vld [vmem:[#allocation14 + $0x3d8] sm:$0xff] }
 0x391   : > { %2845 = vmatprep.subr.bf16.mxu0 %v7177_v45  ;;  %2927 = vmatprep.subr.bf16.mxu1 %v7179_v46  ;;  %v7233_v45 = vcombine.high %v1215_v38, %v1219_v39  ;;  %v7235_v46 = vcombine.high %v1216_v54, %v1220_v41  ;;  %v1267_v32 = vld [vmem:[#allocation14 + $0x3f0] sm:$0xff]  ;;  %v1268_v35 = vld [vmem:[#allocation14 + $0x3f8] sm:$0xff] }
 0x394   : > { %2846 = vmatpush1.bf16.msra.mxu0 %v7176_v51  ;;  %2928 = vmatpush1.bf16.msra.mxu1 %v7178_v52  ;;  %v7232_v51 = vcombine.low %v1215_v38, %v1219_v39  ;;  %v7234_v52 = vcombine.low %v1216_v54, %v1220_v41  ;;  %v1271_v38 = vld [vmem:[#allocation14 + $0x410] sm:$0xff]  ;;  %v1272_v54 = vld [vmem:[#allocation14 + $0x418] sm:$0xff] }
 0x395   : > { %2847 = vmatprep.subr.bf16.mxu0 %v7185_v58  ;;  %2929 = vmatprep.subr.bf16.mxu1 %v7187_v59  ;;  %v7241_v58 = vcombine.high %v1223_v48, %v1227_v56  ;;  %v7243_v59 = vcombine.high %v1224_v49, %v1228_v50  ;;  %v1275_v39 = vld [vmem:[#allocation14 + $0x430] sm:$0xff]  ;;  %v1276_v41 = vld [vmem:[#allocation14 + $0x438] sm:$0xff] }
 0x398   : > { %2848 = vmatpush1.bf16.msra.mxu0 %v7184_v1  ;;  %2930 = vmatpush1.bf16.msra.mxu1 %v7186_v2  ;;  %v7240_v1 = vcombine.low %v1223_v48, %v1227_v56  ;;  %v7242_v2 = vcombine.low %v1224_v49, %v1228_v50  ;;  %v1279_v48 = vld [vmem:[#allocation14 + $0x450] sm:$0xff]  ;;  %v1280_v49 = vld [vmem:[#allocation14 + $0x458] sm:$0xff] }
 0x399   : > { %2849 = vmatprep.subr.bf16.mxu0 %v7193_v3  ;;  %2931 = vmatprep.subr.bf16.mxu1 %v7195_v47  ;;  %v7249_v3 = vcombine.high %v1231_v61, %v1235_v62  ;;  %v7251_v47 = vcombine.high %v1232_v63, %v1236_v0  ;;  %v1283_v56 = vld [vmem:[#allocation14 + $0x470] sm:$0xff]  ;;  %v1284_v50 = vld [vmem:[#allocation14 + $0x478] sm:$0xff] }
 0x39c   : > { %2850 = vmatpush1.bf16.msra.mxu0 %v7192_v11  ;;  %2932 = vmatpush1.bf16.msra.mxu1 %v7194_v14  ;;  %v7248_v11 = vcombine.low %v1231_v61, %v1235_v62  ;;  %v7250_v14 = vcombine.low %v1232_v63, %v1236_v0  ;;  %v1287_v61 = vld [vmem:[#allocation14 + $0x490] sm:$0xff]  ;;  %v1288_v63 = vld [vmem:[#allocation14 + $0x498] sm:$0xff] }
 0x39d   : > { %2851 = vmatprep.subr.bf16.mxu0 %v7201_v15  ;;  %2933 = vmatprep.subr.bf16.mxu1 %v7203_v16  ;;  %v7257_v15 = vcombine.high %v1239_v4, %v1243_v6  ;;  %v7259_v16 = vcombine.high %v1240_v7, %v1244_v8  ;;  %v1291_v62 = vld [vmem:[#allocation14 + $0x4b0] sm:$0xff]  ;;  %v1292_v0 = vld [vmem:[#allocation14 + $0x4b8] sm:$0xff] }
 0x3a0   : > { %2852 = vmatpush1.bf16.msra.mxu0 %v7200_v20  ;;  %2934 = vmatpush1.bf16.msra.mxu1 %v7202_v21  ;;  %v7256_v20 = vcombine.low %v1239_v4, %v1243_v6  ;;  %v7258_v21 = vcombine.low %v1240_v7, %v1244_v8  ;;  %v1295_v4 = vld [vmem:[#allocation14 + $0x4d0] sm:$0xff]  ;;  %v1296_v7 = vld [vmem:[#allocation14 + $0x4d8] sm:$0xff] }
 0x3a1   : > { %2853 = vmatprep.subr.bf16.mxu0 %v7209_v23  ;;  %2935 = vmatprep.subr.bf16.mxu1 %v7211_v24  ;;  %v7265_v23 = vcombine.high %v1247_v17, %v1251_v12  ;;  %v7267_v24 = vcombine.high %v1248_v18, %v1252_v19  ;;  %v1299_v6 = vld [vmem:[#allocation14 + $0x4f0] sm:$0xff]  ;;  %v1300_v8 = vld [vmem:[#allocation14 + $0x4f8] sm:$0xff] }
 0x3a4   : > { %2854 = vmatpush1.bf16.msra.mxu0 %v7208_v55  ;;  %2936 = vmatpush1.bf16.msra.mxu1 %v7210_v28  ;;  %v7264_v55 = vcombine.low %v1247_v17, %v1251_v12  ;;  %v7266_v28 = vcombine.low %v1248_v18, %v1252_v19  ;;  %v1307_v17 = vld [vmem:[#allocation14 + $0x530] sm:$0xff]  ;;  %v1304_v12 = vld [vmem:[#allocation14 + $0x518] sm:$0xff]  ;;  %v7312_v19 = vcombine.low %v1295_v4, %v1299_v6 }
 0x3a5   : > { %2855 = vmatprep.subr.bf16.mxu0 %v7217_v29  ;;  %2937 = vmatprep.subr.bf16.mxu1 %v7219_v30  ;;  %v7273_v29 = vcombine.high %v1255_v25, %v1259_v26  ;;  %v7275_v30 = vcombine.high %v1256_v27, %v1260_v5  ;;  %v1308_v18 = vld [vmem:[#allocation14 + $0x538] sm:$0xff] }
 0x3a8   : > { %2856 = vmatpush1.bf16.msra.mxu0 %v7216_v36  ;;  %2938 = vmatpush1.bf16.msra.mxu1 %v7218_v53  ;;  %v7272_v36 = vcombine.low %v1255_v25, %v1259_v26  ;;  %v7274_v53 = vcombine.low %v1256_v27, %v1260_v5  ;;  %v1312_v25 = vld [vmem:[#allocation14 + $0x558] sm:$0xff]  ;;  %v7322_v5 = vcombine.low %v1304_v12, %v1308_v18 }
 0x3a9   : > { %2857 = vmatprep.subr.bf16.mxu0 %v7225_v37  ;;  %2939 = vmatprep.subr.bf16.mxu1 %v7227_v40  ;;  %v7281_v37 = vcombine.high %v1263_v31, %v1267_v32  ;;  %v7283_v40 = vcombine.high %v1264_v34, %v1268_v35  ;;  %v1316_v26 = vld [vmem:[#allocation14 + $0x578] sm:$0xff] }
 0x3ac   : > { %2858 = vmatpush1.bf16.msra.mxu0 %v7224_v42  ;;  %2940 = vmatpush1.bf16.msra.mxu1 %v7226_v44  ;;  %v7280_v42 = vcombine.low %v1263_v31, %v1267_v32  ;;  %v7282_v44 = vcombine.low %v1264_v34, %v1268_v35  ;;  %v1320_v31 = vld [vmem:[#allocation14 + $0x598] sm:$0xff]  ;;  %v7330_v35 = vcombine.low %v1312_v25, %v1316_v26 }
 0x3ad   : > { %2859 = vmatprep.subr.bf16.mxu0 %v7233_v45  ;;  %2941 = vmatprep.subr.bf16.mxu1 %v7235_v46  ;;  %v7289_v45 = vcombine.high %v1271_v38, %v1275_v39  ;;  %v7291_v46 = vcombine.high %v1272_v54, %v1276_v41  ;;  %v1324_v32 = vld [vmem:[#allocation14 + $0x5b8] sm:$0xff] }
 0x3b0   : > { %2860 = vmatpush1.bf16.msra.mxu0 %v7232_v51  ;;  %2942 = vmatpush1.bf16.msra.mxu1 %v7234_v52  ;;  %v7288_v51 = vcombine.low %v1271_v38, %v1275_v39  ;;  %v7290_v52 = vcombine.low %v1272_v54, %v1276_v41  ;;  %v1328_v38 = vld [vmem:[#allocation14 + $0x5d8] sm:$0xff]  ;;  %v7338_v41 = vcombine.low %v1320_v31, %v1324_v32 }
 0x3b1   : > { %2861 = vmatprep.subr.bf16.mxu0 %v7241_v58  ;;  %2943 = vmatprep.subr.bf16.mxu1 %v7243_v59  ;;  %v7297_v58 = vcombine.high %v1279_v48, %v1283_v56  ;;  %v7299_v59 = vcombine.high %v1280_v49, %v1284_v50  ;;  %v1332_v39 = vld [vmem:[#allocation14 + $0x5f8] sm:$0xff] }
 0x3b4   : > { %2862 = vmatpush1.bf16.msra.mxu0 %v7240_v1  ;;  %2944 = vmatpush1.bf16.msra.mxu1 %v7242_v2  ;;  %v7296_v1 = vcombine.low %v1279_v48, %v1283_v56  ;;  %v7298_v2 = vcombine.low %v1280_v49, %v1284_v50  ;;  %v1336_v48 = vld [vmem:[#allocation14 + $0x618] sm:$0xff]  ;;  %v7346_v50 = vcombine.low %v1328_v38, %v1332_v39 }
 0x3b5   : > { %2863 = vmatprep.subr.bf16.mxu0 %v7249_v3  ;;  %2945 = vmatprep.subr.bf16.mxu1 %v7251_v47  ;;  %v7305_v3 = vcombine.high %v1287_v61, %v1291_v62  ;;  %v7307_v47 = vcombine.high %v1288_v63, %v1292_v0  ;;  %v1340_v56 = vld [vmem:[#allocation14 + $0x638] sm:$0xff] }
 0x3b8   : > { %2864 = vmatpush1.bf16.msra.mxu0 %v7248_v11  ;;  %2946 = vmatpush1.bf16.msra.mxu1 %v7250_v14  ;;  %v7304_v11 = vcombine.low %v1287_v61, %v1291_v62  ;;  %v7313_v14 = vcombine.high %v1295_v4, %v1299_v6  ;;  %v1344_v61 = vld [vmem:[#allocation14 + $0x658] sm:$0xff] }
 0x3b9   : > { %2865 = vmatprep.subr.bf16.mxu0 %v7257_v15  ;;  %2947 = vmatprep.subr.bf16.mxu1 %v7259_v16  ;;  %v7315_v15 = vcombine.high %v1296_v7, %v1300_v8  ;;  %v1303_v16 = vld [vmem:[#allocation14 + $0x510] sm:$0xff]  ;;  %v1348_v62 = vld [vmem:[#allocation14 + $0x678] sm:$0xff] }
 0x3ba   : > { %v7320_v27 = vcombine.low %v1303_v16, %v1307_v17  ;;  %v1352_v4 = vld [vmem:[#allocation14 + $0x698] sm:$0xff] }
 0x3bb   : > { %v1356_v6 = vld [vmem:[#allocation14 + $0x6b8] sm:$0xff] }
 0x3bc   : > { %2866 = vmatpush1.bf16.msra.mxu0 %v7256_v20  ;;  %2948 = vmatpush1.bf16.msra.mxu1 %v7258_v21  ;;  %v7314_v20 = vcombine.low %v1296_v7, %v1300_v8  ;;  %v7321_v21 = vcombine.high %v1303_v16, %v1307_v17  ;;  %v7362_v8 = vcombine.low %v1344_v61, %v1348_v62  ;;  %v1360_v16 = vld [vmem:[#allocation14 + $0x6d8] sm:$0xff] }
 0x3bd   : > { %2867 = vmatprep.subr.bf16.mxu0 %v7265_v23  ;;  %2949 = vmatprep.subr.bf16.mxu1 %v7267_v24  ;;  %v1311_v23 = vld [vmem:[#allocation14 + $0x550] sm:$0xff]  ;;  %v1364_v17 = vld [vmem:[#allocation14 + $0x6f8] sm:$0xff] }
 0x3be   : > { %v1315_v24 = vld [vmem:[#allocation14 + $0x570] sm:$0xff] }
 0x3bf   : > { %v7328_v34 = vcombine.low %v1311_v23, %v1315_v24 }
 0x3c0   : > { %2868 = vmatpush1.bf16.msra.mxu0 %v7264_v55  ;;  %2950 = vmatpush1.bf16.msra.mxu1 %v7266_v28  ;;  %v7329_v55 = vcombine.high %v1311_v23, %v1315_v24  ;;  %v7331_v28 = vcombine.high %v1312_v25, %v1316_v26  ;;  %v1368_v23 = vld [vmem:[#allocation14 + $0x718] sm:$0xff]  ;;  %v7378_v26 = vcombine.low %v1360_v16, %v1364_v17 }
 0x3c1   : > { %2869 = vmatprep.subr.bf16.mxu0 %v7273_v29  ;;  %2951 = vmatprep.subr.bf16.mxu1 %v7275_v30  ;;  %v1319_v29 = vld [vmem:[#allocation14 + $0x590] sm:$0xff]  ;;  %v1372_v24 = vld [vmem:[#allocation14 + $0x738] sm:$0xff] }
 0x3c2   : > { %v1323_v30 = vld [vmem:[#allocation14 + $0x5b0] sm:$0xff] }
 0x3c3   : > { %v7336_v54 = vcombine.low %v1319_v29, %v1323_v30 }
 0x3c4   : > { %2870 = vmatpush1.bf16.msra.mxu0 %v7272_v36  ;;  %2952 = vmatpush1.bf16.msra.mxu1 %v7274_v53  ;;  %v7337_v36 = vcombine.high %v1319_v29, %v1323_v30  ;;  %v7339_v53 = vcombine.high %v1320_v31, %v1324_v32  ;;  %v1376_v29 = vld [vmem:[#allocation14 + $0x758] sm:$0xff]  ;;  %v7386_v32 = vcombine.low %v1368_v23, %v1372_v24 }
 0x3c5   : > { %2871 = vmatprep.subr.bf16.mxu0 %v7281_v37  ;;  %2953 = vmatprep.subr.bf16.mxu1 %v7283_v40  ;;  %v1327_v37 = vld [vmem:[#allocation14 + $0x5d0] sm:$0xff]  ;;  %v1380_v30 = vld [vmem:[#allocation14 + $0x778] sm:$0xff] }
 0x3c6   : > { %v1331_v40 = vld [vmem:[#allocation14 + $0x5f0] sm:$0xff] }
 0x3c7   : > { %v7344_v49 = vcombine.low %v1327_v37, %v1331_v40 }
 0x3c8   : > { %2872 = vmatpush1.bf16.msra.mxu0 %v7280_v42  ;;  %2954 = vmatpush1.bf16.msra.mxu1 %v7282_v44  ;;  %v7345_v42 = vcombine.high %v1327_v37, %v1331_v40  ;;  %v7347_v44 = vcombine.high %v1328_v38, %v1332_v39  ;;  %v1384_v37 = vld [vmem:[#allocation14 + $0x798] sm:$0xff]  ;;  %v7394_v39 = vcombine.low %v1376_v29, %v1380_v30 }
 0x3c9   : > { %2882 = vmatprep.subr.bf16.mxu0 %v7289_v45  ;;  %2964 = vmatprep.subr.bf16.mxu1 %v7291_v46  ;;  %v1335_v45 = vld [vmem:[#allocation14 + $0x610] sm:$0xff]  ;;  %v1388_v40 = vld [vmem:[#allocation14 + $0x7b8] sm:$0xff] }
 0x3ca   : > { %v1339_v46 = vld [vmem:[#allocation14 + $0x630] sm:$0xff] }
 0x3cb   : > { %2874 = vmatmul.mubr.bf16.vlgmr.msra.gmra.mrb[4].mxu0 %v9663_v13  ;;  %2956 = vmatmul.mubr.bf16.vlgmr.msra.gmra.mrb[4].mxu1 %v9663_v13  ;;  %v7306_v13 = vcombine.low %v1288_v63, %v1292_v0  ;;  %v7352_v63 = vcombine.low %v1335_v45, %v1339_v46  ;;  %v7354_v0 = vcombine.low %v1336_v48, %v1340_v56 }
 0x3cc   : > { %2883 = vmatpush1.bf16.msra.mxu0 %v7288_v51  ;;  %2965 = vmatpush1.bf16.msra.mxu1 %v7290_v52  ;;  %v7353_v51 = vcombine.high %v1335_v45, %v1339_v46  ;;  %v7355_v52 = vcombine.high %v1336_v48, %v1340_v56  ;;  %v1392_v45 = vld [vmem:[#allocation14 + $0x7d8] sm:$0xff]  ;;  %v7402_v56 = vcombine.low %v1384_v37, %v1388_v40 }
 0x3cd   : > { %2884 = vmatprep.subr.bf16.mxu0 %v7297_v58  ;;  %2966 = vmatprep.subr.bf16.mxu1 %v7299_v59  ;;  %v1343_v58 = vld [vmem:[#allocation14 + $0x650] sm:$0xff]  ;;  %v1396_v46 = vld [vmem:[#allocation14 + $0x7f8] sm:$0xff] }
 0x3ce   : > { %2914 = vmatprep.mubr.bf16.mxu0 %v9665_v22  ;;  %2996 = vmatprep.mubr.bf16.mxu1 %v9665_v22  ;;  %v7323_v22 = vcombine.high %v1304_v12, %v1308_v18  ;;  %v1347_v59 = vld [vmem:[#allocation14 + $0x670] sm:$0xff]  ;;  %v7370_v18 = vcombine.low %v1352_v4, %v1356_v6 }
 0x3cf   : > { %v7360_v7 = vcombine.low %v1343_v58, %v1347_v59 }
 0x3d0   : > { %2885 = vmatpush1.bf16.msra.mxu0 %v7296_v1  ;;  %2967 = vmatpush1.bf16.msra.mxu1 %v7298_v2  ;;  %v7361_v1 = vcombine.high %v1343_v58, %v1347_v59  ;;  %v7363_v2 = vcombine.high %v1344_v61, %v1348_v62 }
 0x3d1   : > { %2886 = vmatprep.subr.bf16.mxu0 %v7305_v3  ;;  %2968 = vmatprep.subr.bf16.mxu1 %v7307_v47  ;;  %v1351_v3 = vld [vmem:[#allocation14 + $0x690] sm:$0xff] }
 0x3d2   : > { %v1355_v47 = vld [vmem:[#allocation14 + $0x6b0] sm:$0xff] }
 0x3d3   : > { %v7368_v12 = vcombine.low %v1351_v3, %v1355_v47 }
 0x3d4   : > { %2887 = vmatpush1.bf16.msra.mxu0 %v7304_v11  ;;  %2969 = vmatpush1.bf16.msra.mxu1 %v7306_v13  ;;  %v7369_v11 = vcombine.high %v1351_v3, %v1355_v47  ;;  %v7371_v13 = vcombine.high %v1352_v4, %v1356_v6 }
 0x3d5   : > { %2888 = vmatprep.subr.bf16.mxu0 %v7313_v14  ;;  %2970 = vmatprep.subr.bf16.mxu1 %v7315_v15  ;;  %v1359_v14 = vld [vmem:[#allocation14 + $0x6d0] sm:$0xff] }
 0x3d6   : > { %v1363_v15 = vld [vmem:[#allocation14 + $0x6f0] sm:$0xff] }
 0x3d7   : > { %v7376_v25 = vcombine.low %v1359_v14, %v1363_v15 }
 0x3d8   : > { %2889 = vmatpush1.bf16.msra.mxu0 %v7312_v19  ;;  %2971 = vmatpush1.bf16.msra.mxu1 %v7314_v20  ;;  %v7377_v19 = vcombine.high %v1359_v14, %v1363_v15  ;;  %v7379_v20 = vcombine.high %v1360_v16, %v1364_v17 }
 0x3d9   : > { %2890 = vmatprep.subr.bf16.mxu0 %v7321_v21  ;;  %2972 = vmatprep.subr.bf16.mxu1 %v7323_v22  ;;  %v1367_v21 = vld [vmem:[#allocation14 + $0x710] sm:$0xff] }
 0x3da   : > { %v1371_v22 = vld [vmem:[#allocation14 + $0x730] sm:$0xff] }
 0x3db   : > { %v7384_v31 = vcombine.low %v1367_v21, %v1371_v22 }
 0x3dc   : > { %2891 = vmatpush1.bf16.msra.mxu0 %v7320_v27  ;;  %2973 = vmatpush1.bf16.msra.mxu1 %v7322_v5  ;;  %v7385_v27 = vcombine.high %v1367_v21, %v1371_v22  ;;  %v7387_v5 = vcombine.high %v1368_v23, %v1372_v24 }
 0x3dd   : > { %2892 = vmatprep.subr.bf16.mxu0 %v7329_v55  ;;  %2974 = vmatprep.subr.bf16.mxu1 %v7331_v28  ;;  %v1375_v55 = vld [vmem:[#allocation14 + $0x750] sm:$0xff] }
 0x3de   : > { %v1379_v28 = vld [vmem:[#allocation14 + $0x770] sm:$0xff] }
 0x3df   : > { %v7392_v38 = vcombine.low %v1375_v55, %v1379_v28 }
 0x3e0   : > { %2893 = vmatpush1.bf16.msra.mxu0 %v7328_v34  ;;  %2975 = vmatpush1.bf16.msra.mxu1 %v7330_v35  ;;  %v7393_v34 = vcombine.high %v1375_v55, %v1379_v28  ;;  %v7395_v35 = vcombine.high %v1376_v29, %v1380_v30 }
 0x3e1   : > { %2894 = vmatprep.subr.bf16.mxu0 %v7337_v36  ;;  %2976 = vmatprep.subr.bf16.mxu1 %v7339_v53  ;;  %v1383_v36 = vld [vmem:[#allocation14 + $0x790] sm:$0xff] }
 0x3e2   : > { %v1387_v53 = vld [vmem:[#allocation14 + $0x7b0] sm:$0xff] }
 0x3e3   : > { %v7400_v48 = vcombine.low %v1383_v36, %v1387_v53 }
 0x3e4   : > { %2895 = vmatpush1.bf16.msra.mxu0 %v7336_v54  ;;  %2977 = vmatpush1.bf16.msra.mxu1 %v7338_v41  ;;  %v7401_v54 = vcombine.high %v1383_v36, %v1387_v53  ;;  %v7403_v41 = vcombine.high %v1384_v37, %v1388_v40 }
 0x3e5   : > { %2896 = vmatprep.subr.bf16.mxu0 %v7345_v42  ;;  %2978 = vmatprep.subr.bf16.mxu1 %v7347_v44  ;;  %v1391_v42 = vld [vmem:[#allocation14 + $0x7d0] sm:$0xff] }
 0x3e6   : > { %v1395_v44 = vld [vmem:[#allocation14 + $0x7f0] sm:$0xff] }
 0x3e8   : > { %2897 = vmatpush1.bf16.msra.mxu0 %v7344_v49  ;;  %2979 = vmatpush1.bf16.msra.mxu1 %v7346_v50  ;;  %v7409_v49 = vcombine.high %v1391_v42, %v1395_v44  ;;  %v7411_v50 = vcombine.high %v1392_v45, %v1396_v46 }
 0x3e9   : > { %2898 = vmatprep.subr.bf16.mxu0 %v7353_v51  ;;  %2980 = vmatprep.subr.bf16.mxu1 %v7355_v52  ;;  %v7408_v51 = vcombine.low %v1391_v42, %v1395_v44  ;;  %v7410_v52 = vcombine.low %v1392_v45, %v1396_v46 }
 0x3ec   : > { %2899 = vmatpush1.bf16.msra.mxu0 %v7352_v63  ;;  %2981 = vmatpush1.bf16.msra.mxu1 %v7354_v0 }
 0x3ed   : > { %2900 = vmatprep.subr.bf16.mxu0 %v7361_v1  ;;  %2982 = vmatprep.subr.bf16.mxu1 %v7363_v2 }
 0x3f0   : > { %2901 = vmatpush1.bf16.msra.mxu0 %v7360_v7  ;;  %2983 = vmatpush1.bf16.msra.mxu1 %v7362_v8 }
 0x3f1   : > { %2902 = vmatprep.subr.bf16.mxu0 %v7369_v11  ;;  %2984 = vmatprep.subr.bf16.mxu1 %v7371_v13 }
 0x3f4   : > { %2903 = vmatpush1.bf16.msra.mxu0 %v7368_v12  ;;  %2985 = vmatpush1.bf16.msra.mxu1 %v7370_v18 }
 0x3f5   : > { %2904 = vmatprep.subr.bf16.mxu0 %v7377_v19  ;;  %2986 = vmatprep.subr.bf16.mxu1 %v7379_v20 }
 0x3f8   : > { %2905 = vmatpush1.bf16.msra.mxu0 %v7376_v25  ;;  %2987 = vmatpush1.bf16.msra.mxu1 %v7378_v26 }
 0x3f9   : > { %2906 = vmatprep.subr.bf16.mxu0 %v7385_v27  ;;  %2988 = vmatprep.subr.bf16.mxu1 %v7387_v5 }
 0x3fc   : > { %2907 = vmatpush1.bf16.msra.mxu0 %v7384_v31  ;;  %2989 = vmatpush1.bf16.msra.mxu1 %v7386_v32 }
 0x3fd   : > { %2908 = vmatprep.subr.bf16.mxu0 %v7393_v34  ;;  %2990 = vmatprep.subr.bf16.mxu1 %v7395_v35 }
 0x400   : > { %2909 = vmatpush1.bf16.msra.mxu0 %v7392_v38  ;;  %2991 = vmatpush1.bf16.msra.mxu1 %v7394_v39 }
 0x401   : > { %2910 = vmatprep.subr.bf16.mxu0 %v7401_v54  ;;  %2992 = vmatprep.subr.bf16.mxu1 %v7403_v41 }
 0x404   : > { %2911 = vmatpush1.bf16.msra.mxu0 %v7400_v48  ;;  %2993 = vmatpush1.bf16.msra.mxu1 %v7402_v56 }
 0x405   : > { %2912 = vmatprep.subr.bf16.mxu0 %v7409_v49  ;;  %2994 = vmatprep.subr.bf16.mxu1 %v7411_v50 }
 0x408   : > { %2913 = vmatpush1.bf16.msra.mxu0 %v7408_v51  ;;  %2995 = vmatpush1.bf16.msra.mxu1 %v7410_v52 }
 0x40b   : > { %2915 = vmatmul.mubr.bf16.vlgmr.msra.gmra.mrb[4].mxu0 %v9674_v33  ;;  %2997 = vmatmul.mubr.bf16.vlgmr.msra.gmra.mrb[4].mxu1 %v9674_v33 }
 0x45e   : > { %v9686_v58 = vpop.f32.mrb[0].mxu0  ;;  %v9688_v59 = vpop.f32.mrb[0].mxu1 }
 0x45f   : > { %v9690_v61 = vpop.f32.mrb[1].mxu0  ;;  %v9692_v62 = vpop.f32.mrb[1].mxu1  ;;  %v3010_v13 = vrot.slane (!%p7412_p0), %v9686_v58, 4  ;;  %v3022_v15 = vrot.slane (!%p7412_p0), %v9688_v59, 4 }
 0x460   : > { %v2756_v63 = vpop.f32.mrb[2].mxu0  ;;  %v2838_v0 = vpop.f32.mrb[2].mxu1  ;;  %v3016_v14 = vrot.slane (!%p7412_p0), %v9690_v61, 4  ;;  %v3028_v16 = vrot.slane (!%p7412_p0), %v9692_v62, 4 }
 0x461   : > { %v2757_v1 = vpop.f32.mrb[3].mxu0  ;;  %v2839_v2 = vpop.f32.mrb[3].mxu1  ;;  %v3011_v20 = vadd.f32 (!%p7412_p0), %v3010_v13, %v9686_v58  ;;  %v3023_v22 = vadd.f32 (!%p7412_p0), %v3022_v15, %v9688_v59  ;;  %v9250_v15 = vmov (!%p7412_p0), 1966171168  }
 0x462   : > { %v3017_v21 = vadd.f32 (!%p7412_p0), %v3016_v14, %v9690_v61  ;;  %v3029_v23 = vadd.f32 (!%p7412_p0), %v3028_v16, %v9692_v62  ;;  %v3071_v16 = vunpack.c.l.s4 (!%p7412_p0), %v9250_v15 }
 0x463   : > { %v3012_v5 = vrot.slane (!%p7412_p0), %v3011_v20, 2  ;;  %v3024_v28 = vrot.slane (!%p7412_p0), %v3023_v22, 2 }
 0x464   : > { %v3018_v55 = vrot.slane (!%p7412_p0), %v3017_v21, 2  ;;  %v3030_v29 = vrot.slane (!%p7412_p0), %v3029_v23, 2 }
 0x465   : > { %v3013_v35 = vadd.f32 (!%p7412_p0), %v3012_v5, %v3011_v20  ;;  %v3025_v53 = vadd.f32 (!%p7412_p0), %v3024_v28, %v3023_v22 }
 0x466   : > { %v3019_v36 = vadd.f32 (!%p7412_p0), %v3018_v55, %v3017_v21  ;;  %v3031_v37 = vadd.f32 (!%p7412_p0), %v3030_v29, %v3029_v23  ;;  %v3072_v21 = vunpack.c.0.s8 (!%p7412_p0), %v3071_v16 }
 0x467   : > { %v3014_v41 = vrot.slane (!%p7412_p0), %v3013_v35, 1  ;;  %v3026_v44 = vrot.slane (!%p7412_p0), %v3025_v53, 1 }
 0x468   : > { %v3020_v42 = vrot.slane (!%p7412_p0), %v3019_v36, 1  ;;  %v3032_v45 = vrot.slane (!%p7412_p0), %v3031_v37, 1  ;;  %v9736_v55 = vsub.s32 (!%p7412_p0), %v3072_v21, %v9630_v43 }
 0x469   : > { %v3015_v50 = vadd.f32 (!%p7412_p0), %v3014_v41, %v3013_v35  ;;  %v3027_v52 = vadd.f32 (!%p7412_p0), %v3026_v44, %v3025_v53 }
 0x46a   : > { %v3021_v51 = vadd.f32 (!%p7412_p0), %v3020_v42, %v3019_v36  ;;  %v3033_v63 = vadd.f32 (!%p7412_p0), %v3032_v45, %v3031_v37 }
 0x4db   : > { %3008 = sbr.rel (%p7412_p0) target bundleno = 1292 (0x50c), region = 120 }
 0x4de   : > { %v9694_v3 = vpop.f32.mrb[4].mxu0  ;;  %v9696_v47 = vpop.f32.mrb[4].mxu1 }
 0x4df   : > { %v9698_v4 = vpop.f32.mrb[5].mxu0  ;;  %v9700_v6 = vpop.f32.mrb[5].mxu1  ;;  %v3034_v17 = vrot.slane (!%p7412_p0), %v9694_v3, 4  ;;  %v3046_v18 = vrot.slane (!%p7412_p0), %v9696_v47, 4  ;;  %v3125_v22 = vmul.f32 (!%p7412_p0), %v9696_v47, %v9696_v47 }
 0x4e0   : > { %v2920_v33 = vpop.f32.mrb[6].mxu0  ;;  %v3002_v7 = vpop.f32.mrb[6].mxu1  ;;  %v3040_v12 = vrot.slane (!%p7412_p0), %v9698_v4, 4  ;;  %v3052_v19 = vrot.slane (!%p7412_p0), %v9700_v6, 4  ;;  %v3124_v20 = vmul.f32 (!%p7412_p0), %v9698_v4, %v9698_v4  ;;  %v3126_v23 = vmul.f32 (!%p7412_p0), %v9700_v6, %v9700_v6 }
 0x4e1   : > { %v2921_v8 = vpop.f32.mrb[7].mxu0  ;;  %v3003_v11 = vpop.f32.mrb[7].mxu1  ;;  %v3035_v24 = vadd.f32 (!%p7412_p0), %v3034_v17, %v9694_v3  ;;  %v3047_v26 = vadd.f32 (!%p7412_p0), %v3046_v18, %v9696_v47  ;;  %v3066_v7 = vcombine.low (!%p7412_p0), %v3015_v50, %v3021_v51  ;;  %v3120_v17 = vmul.f32 (!%p7412_p0), %v9690_v61, %v9690_v61 }
 0x4e2   : > { %v3041_v25 = vadd.f32 %v3040_v12, %v9698_v4  ;;  %v3053_v27 = vadd.f32 %v3052_v19, %v9700_v6  ;;  %v3067_v8 = vcombine.low %v3027_v52, %v3033_v63  ;;  %v3119_v11 = vmul.f32 %v9686_v58, %v9686_v58 }
 0x4e3   : > { %v3036_v30 = vrot.slane %v3035_v24, 2  ;;  %v3048_v32 = vrot.slane %v3047_v26, 2  ;;  %v3121_v12 = vmul.f32 %v9688_v59, %v9688_v59  ;;  %v3122_v18 = vmul.f32 %v9692_v62, %v9692_v62 }
 0x4e4   : > { %v3042_v31 = vrot.slane %v3041_v25, 2  ;;  %v3054_v34 = vrot.slane %v3053_v27, 2  ;;  %v3123_v19 = vmul.f32 %v9694_v3, %v9694_v3  ;;  %v3157_v29 = vrot.slane %v3124_v20, 4 }
 0x4e5   : > { %v3037_v40 = vadd.f32 %v3036_v30, %v3035_v24  ;;  %v3049_v39 = vadd.f32 %v3048_v32, %v3047_v26  ;;  %v3127_v24 = vrot.slane %v3119_v11, 4  ;;  %v3139_v26 = vrot.slane %v3121_v12, 4 }
 0x4e6   : > { %v3043_v38 = vadd.f32 %v3042_v31, %v3041_v25  ;;  %v3055_v54 = vadd.f32 %v3054_v34, %v3053_v27  ;;  %v3133_v25 = vrot.slane %v3120_v17, 4  ;;  %v3145_v27 = vrot.slane %v3122_v18, 4 }
 0x4e7   : > { %v3038_v46 = vrot.slane %v3037_v40, 1  ;;  %v3050_v56 = vrot.slane %v3049_v39, 1  ;;  %v3151_v5 = vrot.slane %v3123_v19, 4  ;;  %v3128_v28 = vadd.f32 %v3127_v24, %v3119_v11 }
 0x4e8   : > { %v3044_v48 = vrot.slane %v3043_v38, 1  ;;  %v3056_v49 = vrot.slane %v3055_v54, 1  ;;  %v3163_v30 = vrot.slane %v3125_v22, 4  ;;  %v3134_v31 = vadd.f32 %v3133_v25, %v3120_v17 }
 0x4e9   : > { %v3039_v0 = vadd.f32 %v3038_v46, %v3037_v40  ;;  %v3051_v2 = vadd.f32 %v3050_v56, %v3049_v39  ;;  %v3140_v32 = vadd.f32 %v3139_v26, %v3121_v12  ;;  %v3146_v34 = vadd.f32 %v3145_v27, %v3122_v18 }
 0x4ea   : > { %v3045_v1 = vadd.f32 %v3044_v48, %v3043_v38  ;;  %v3057_v33 = vadd.f32 %v3056_v49, %v3055_v54  ;;  %v3152_v35 = vadd.f32 %v3151_v5, %v3123_v19  ;;  %v3076_v36 = vrot.slane %v3066_v7, %v9736_v55 }
 0x4eb   : > { %v3083_v53 = vrot.slane %v3067_v8, %v9736_v55  ;;  %v3129_v38 = vrot.slane %v3128_v28, 2  ;;  %v3135_v39 = vrot.slane %v3134_v31, 2  ;;  %v3141_v54 = vrot.slane %v3140_v32, 2 }
 0x4ec   : > { %v3068_v13 = vcombine.low %v3039_v0, %v3045_v1  ;;  %v3069_v14 = vcombine.low %v3051_v2, %v3057_v33  ;;  %v3147_v41 = vrot.slane %v3146_v34, 2  ;;  %v3153_v45 = vrot.slane %v3152_v35, 2  ;;  %v3009_v1 = vld [vmem:[#allocation4] sm:$0xff] }
 0x4ed   : > { %v3098_v42 = vcombine.low %v3076_v36, %v3083_v53  ;;  %v3158_v46 = vadd.f32 %v3157_v29, %v3124_v20  ;;  %v3130_v48 = vadd.f32 %v3129_v38, %v3128_v28  ;;  %v3136_v56 = vadd.f32 %v3135_v39, %v3134_v31 }
 0x4ee   : > { %v3090_v37 = vrot.slane %v3068_v13, %v9736_v55  ;;  %v3097_v40 = vrot.slane %v3069_v14, %v9736_v55  ;;  %v3142_v49 = vadd.f32 %v3141_v54, %v3140_v32  ;;  %v3148_v50 = vadd.f32 %v3147_v41, %v3146_v34 }
 0x4ef   : > { %v3106_v51 = vrot.slane %v3098_v42, %v9736_v55  ;;  %v3154_v63 = vadd.f32 %v3153_v45, %v3152_v35  ;;  %v3159_v0 = vrot.slane %v3158_v46, 2  ;;  %v3131_v2 = vrot.slane %v3130_v48, 1 }
 0x4f0   : > { %v3099_v44 = vcombine.low %v3090_v37, %v3097_v40  ;;  %v3137_v33 = vrot.slane %v3136_v56, 1  ;;  %v3143_v7 = vrot.slane %v3142_v49, 1  ;;  %v3149_v8 = vrot.slane %v3148_v50, 1 }
 0x4f1   : > { %v3160_v13 = vadd.f32 %v3159_v0, %v3158_v46  ;;  %v3164_v14 = vadd.f32 %v3163_v30, %v3125_v22  ;;  %v3155_v15 = vrot.slane %v3154_v63, 1  ;;  %v3132_v17 = vadd.f32 %v3131_v2, %v3130_v48 }
 0x4f2   : > { %v3113_v52 = vrot.slane %v3099_v44, %v9736_v55  ;;  %v3138_v12 = vadd.f32 %v3137_v33, %v3136_v56  ;;  %v3144_v19 = vadd.f32 %v3143_v7, %v3142_v49  ;;  %v3150_v20 = vadd.f32 %v3149_v8, %v3148_v50  ;;  %v3118_v44 = vld [vmem:[#allocation5] sm:$0xff] }
 0x4f3   : > { %v3165_v18 = vrot.slane %v3164_v14, 2  ;;  %v3161_v21 = vrot.slane %v3160_v13, 1  ;;  %v3169_v24 = vrot.slane %v3126_v23, 4  ;;  %v3156_v27 = vadd.f32 %v3155_v15, %v3154_v63 }
 0x4f4   : > { %v3114_v11 = vcombine.low %v3106_v51, %v3113_v52  ;;  %v3183_v5 = vcombine.low %v3132_v17, %v3138_v12  ;;  %v3184_v32 = vcombine.low %v3144_v19, %v3150_v20 }
 0x4f5   : > { %v3166_v25 = vadd.f32 %v3165_v18, %v3164_v14  ;;  %v3170_v26 = vadd.f32 %v3169_v24, %v3126_v23  ;;  %v3162_v28 = vadd.f32 %v3161_v21, %v3160_v13 }
 0x4f6   : > { %v3116_v16 = vadd.f32 %v3114_v11, %v3009_v1  ;;  %v3193_v22 = vrot.slane %v3183_v5, %v9736_v55  ;;  %v3200_v53 = vrot.slane %v3184_v32, %v9736_v55 }
 0x4f7   : > { %v3167_v29 = vrot.slane %v3166_v25, 1  ;;  %v3171_v31 = vrot.slane %v3170_v26, 2  ;;  %v3185_v36 = vcombine.low %v3156_v27, %v3162_v28 }
 0x4f8   : > { %3117 = vst [vmem:[#allocation4] sm:$0xff] %v3116_v16  ;;  %v3215_v39 = vcombine.low %v3193_v22, %v3200_v53 }
 0x4f9   : > { %v3172_v34 = vadd.f32 %v3171_v31, %v3170_v26  ;;  %v3168_v30 = vadd.f32 %v3167_v29, %v3166_v25  ;;  %v3207_v38 = vrot.slane %v3185_v36, %v9736_v55 }
 0x4fa   : > { %v3223_v41 = vrot.slane %v3215_v39, %v9736_v55 }
 0x4fb   : > { %v3173_v35 = vrot.slane %v3172_v34, 1 }
 0x4fd   : > { %v3174_v37 = vadd.f32 %v3173_v35, %v3172_v34 }
 0x4ff   : > { %v3186_v40 = vcombine.low %v3168_v30, %v3174_v37 }
 0x501   : > { %v3214_v23 = vrot.slane %v3186_v40, %v9736_v55 }
 0x503   : > { %v3216_v54 = vcombine.low %v3207_v38, %v3214_v23 }
 0x505   : > { %v3230_v42 = vrot.slane %v3216_v54, %v9736_v55 }
 0x507   : > { %v3231_v45 = vcombine.low %v3223_v41, %v3230_v42 }
 0x509   : > { %v3233_v46 = vadd.f32 %v3231_v45, %v3118_v44 }
 0x50b   : > { %3234 = vst [vmem:[#allocation5] sm:$0xff] %v3233_v46 }
 0x50c PF: > { %p7413_p1 = scmp.ne.s32.totalorder %s9217_s17, 2 }
 0x50d   : > { %v8243_v48 = vld [vmem:[#allocation19 + $0x4] ss:$28 sps:$4 sm:$0xff] (!%p7413_p1)   ;;  %v8249_v51 = vld [vmem:[#allocation19 + $0x3c] ss:$28 sps:$4 sm:$0xff] (!%p7413_p1)   ;;  %v8255_v0 = vld [vmem:[#allocation19 + $0x74] ss:$28 sps:$4 sm:$0xff] (!%p7413_p1)  }
 0x50e   : > { %3238 = sbr.rel (%p7413_p1) target bundleno = 1974 (0x7b6), region = 124  ;;  %v8245_v56 = vld [vmem:[#allocation19 + $0x384] ss:$28 sps:$4 sm:$0xff] (!%p7413_p1)   ;;  %6235 = vmatprep.subr.bf16.mxu1 (!%p7413_p1), %v8243_v48  ;;  %v8251_v52 = vld [vmem:[#allocation19 + $0x3bc] ss:$28 sps:$4 sm:$0xff] (!%p7413_p1)  }
 0x50f   : > { %v8247_v49 = vld [vmem:[#allocation19] ss:$28 sps:$4 sm:$0xff] (!%p7413_p1)   ;;  %6276 = vmatprep.subr.bf16.mxu0 (!%p7413_p1), %v8245_v56  ;;  %v8253_v63 = vld [vmem:[#allocation19 + $0x38] ss:$28 sps:$4 sm:$0xff] (!%p7413_p1)   ;;  %v8259_v2 = vld [vmem:[#allocation19 + $0x70] ss:$28 sps:$4 sm:$0xff] (!%p7413_p1)  }
 0x510   : > { %v8248_v50 = vld [vmem:[#allocation19 + $0x380] ss:$28 sps:$4 sm:$0xff] (!%p7413_p1)   ;;  %6236 = vmatpush1.bf16.msra.mxu1 (!%p7413_p1), %v8247_v49  ;;  %v8254_v55 = vld [vmem:[#allocation19 + $0x3b8] ss:$28 sps:$4 sm:$0xff] (!%p7413_p1)   ;;  %v8260_v33 = vld [vmem:[#allocation19 + $0x3f0] ss:$28 sps:$4 sm:$0xff] (!%p7413_p1)  }
 0x511   : > { %6277 = vmatpush1.bf16.msra.mxu0 (!%p7413_p1), %v8248_v50  ;;  %6237 = vmatprep.subr.bf16.mxu1 (!%p7413_p1), %v8249_v51  ;;  %v8257_v1 = vld [vmem:[#allocation19 + $0x3f4] ss:$28 sps:$4 sm:$0xff] (!%p7413_p1)   ;;  %v8261_v7 = vld [vmem:[#allocation19 + $0xac] ss:$28 sps:$4 sm:$0xff] (!%p7413_p1)   ;;  %v8267_v14 = vld [vmem:[#allocation19 + $0xe4] ss:$28 sps:$4 sm:$0xff] (!%p7413_p1)  }
 0x512   : > { %6278 = vmatprep.subr.bf16.mxu0 (!%p7413_p1), %v8251_v52  ;;  %v8263_v8 = vld [vmem:[#allocation19 + $0x42c] ss:$28 sps:$4 sm:$0xff] (!%p7413_p1)   ;;  %v8269_v15 = vld [vmem:[#allocation19 + $0x464] ss:$28 sps:$4 sm:$0xff] (!%p7413_p1)   ;;  %v8273_v12 = vld [vmem:[#allocation19 + $0x11c] ss:$28 sps:$4 sm:$0xff] (!%p7413_p1)  }
 0x513   : > { %v8265_v11 = vld [vmem:[#allocation19 + $0xa8] ss:$28 sps:$4 sm:$0xff] (!%p7413_p1)   ;;  %v8271_v16 = vld [vmem:[#allocation19 + $0xe0] ss:$28 sps:$4 sm:$0xff] (!%p7413_p1)   ;;  %v8277_v19 = vld [vmem:[#allocation19 + $0x118] ss:$28 sps:$4 sm:$0xff] (!%p7413_p1)  }
 0x514   : > { %6238 = vmatpush1.bf16.msra.mxu1 (!%p7413_p1), %v8253_v63  ;;  %v8266_v13 = vld [vmem:[#allocation19 + $0x428] ss:$28 sps:$4 sm:$0xff] (!%p7413_p1)   ;;  %v8272_v17 = vld [vmem:[#allocation19 + $0x460] ss:$28 sps:$4 sm:$0xff] (!%p7413_p1)   ;;  %v8278_v20 = vld [vmem:[#allocation19 + $0x498] ss:$28 sps:$4 sm:$0xff] (!%p7413_p1)  }
 0x515   : > { %6279 = vmatpush1.bf16.msra.mxu0 %v8254_v55  ;;  %6239 = vmatprep.subr.bf16.mxu1 %v8255_v0  ;;  %v8275_v18 = vld [vmem:[#allocation19 + $0x49c] ss:$28 sps:$4 sm:$0xff]   ;;  %v8279_v21 = vld [vmem:[#allocation19 + $0x154] ss:$28 sps:$4 sm:$0xff]   ;;  %v8285_v27 = vld [vmem:[#allocation19 + $0x18c] ss:$28 sps:$4 sm:$0xff]  }
 0x516   : > { %6280 = vmatprep.subr.bf16.mxu0 %v8257_v1  ;;  %v8281_v24 = vld [vmem:[#allocation19 + $0x4d4] ss:$28 sps:$4 sm:$0xff]   ;;  %v8287_v5 = vld [vmem:[#allocation19 + $0x50c] ss:$28 sps:$4 sm:$0xff]   ;;  %v8291_v31 = vld [vmem:[#allocation19 + $0x1c4] ss:$28 sps:$4 sm:$0xff]  }
 0x517   : > { %v8283_v25 = vld [vmem:[#allocation19 + $0x150] ss:$28 sps:$4 sm:$0xff]   ;;  %v8289_v28 = vld [vmem:[#allocation19 + $0x188] ss:$28 sps:$4 sm:$0xff]   ;;  %v8295_v34 = vld [vmem:[#allocation19 + $0x1c0] ss:$28 sps:$4 sm:$0xff]  }
 0x518   : > { %6240 = vmatpush1.bf16.msra.mxu1 %v8259_v2  ;;  %v8284_v26 = vld [vmem:[#allocation19 + $0x4d0] ss:$28 sps:$4 sm:$0xff]   ;;  %v8290_v29 = vld [vmem:[#allocation19 + $0x508] ss:$28 sps:$4 sm:$0xff]   ;;  %v8296_v22 = vld [vmem:[#allocation19 + $0x540] ss:$28 sps:$4 sm:$0xff]  }
 0x519   : > { %6281 = vmatpush1.bf16.msra.mxu0 %v8260_v33  ;;  %6241 = vmatprep.subr.bf16.mxu1 %v8261_v7  ;;  %v8293_v32 = vld [vmem:[#allocation19 + $0x544] ss:$28 sps:$4 sm:$0xff]   ;;  %v8297_v30 = vld [vmem:[#allocation19 + $0x1fc] ss:$28 sps:$4 sm:$0xff]   ;;  %v8303_v37 = vld [vmem:[#allocation19 + $0x234] ss:$28 sps:$4 sm:$0xff]  }
 0x51a   : > { %6282 = vmatprep.subr.bf16.mxu0 %v8263_v8  ;;  %v8299_v35 = vld [vmem:[#allocation19 + $0x57c] ss:$28 sps:$4 sm:$0xff]   ;;  %v8305_v40 = vld [vmem:[#allocation19 + $0x5b4] ss:$28 sps:$4 sm:$0xff]   ;;  %v8309_v23 = vld [vmem:[#allocation19 + $0x26c] ss:$28 sps:$4 sm:$0xff]  }
 0x51b   : > { %v8301_v36 = vld [vmem:[#allocation19 + $0x1f8] ss:$28 sps:$4 sm:$0xff]   ;;  %v8307_v38 = vld [vmem:[#allocation19 + $0x230] ss:$28 sps:$4 sm:$0xff]   ;;  %v8313_v42 = vld [vmem:[#allocation19 + $0x268] ss:$28 sps:$4 sm:$0xff]  }
 0x51c   : > { %6242 = vmatpush1.bf16.msra.mxu1 %v8265_v11  ;;  %v8302_v53 = vld [vmem:[#allocation19 + $0x578] ss:$28 sps:$4 sm:$0xff]   ;;  %v8308_v39 = vld [vmem:[#allocation19 + $0x5b0] ss:$28 sps:$4 sm:$0xff]   ;;  %v8314_v44 = vld [vmem:[#allocation19 + $0x5e8] ss:$28 sps:$4 sm:$0xff]  }
 0x51d   : > { %6283 = vmatpush1.bf16.msra.mxu0 %v8266_v13  ;;  %6243 = vmatprep.subr.bf16.mxu1 %v8267_v14  ;;  %v8311_v54 = vld [vmem:[#allocation19 + $0x5ec] ss:$28 sps:$4 sm:$0xff]   ;;  %v3239_v41 = vld [vmem:[#allocation4] sm:$0xff]  ;;  %v3241_v46 = vld [vmem:[#allocation5] sm:$0xff] }
 0x51e   : > { %6284 = vmatprep.subr.bf16.mxu0 %v8269_v15  ;;  %v3240_v45 = vmul.f32 0.125, %v3239_v41  ;;  %v8315_v48 = vld [vmem:[#allocation19 + $0x2a4] ss:$28 sps:$4 sm:$0xff]   ;;  %v3242_v56 = vmul.f32 0.125, %v3241_v46  ;;  %v8321_v55 = vld [vmem:[#allocation19 + $0x2dc] ss:$28 sps:$4 sm:$0xff]  }
 0x51f   : > { %v8317_v49 = vld [vmem:[#allocation19 + $0x624] ss:$28 sps:$4 sm:$0xff]   ;;  %v8323_v0 = vld [vmem:[#allocation19 + $0x65c] ss:$28 sps:$4 sm:$0xff]   ;;  %v8327_v7 = vld [vmem:[#allocation19 + $0x314] ss:$28 sps:$4 sm:$0xff]  }
 0x520   : > { %6244 = vmatpush1.bf16.msra.mxu1 %v8271_v16  ;;  %v3243_v50 = vmul.f32 %v3240_v45, %v3240_v45  ;;  %v8319_v51 = vld [vmem:[#allocation19 + $0x2a0] ss:$28 sps:$4 sm:$0xff]   ;;  %v8325_v2 = vld [vmem:[#allocation19 + $0x2d8] ss:$28 sps:$4 sm:$0xff]   ;;  %v8331_v11 = vld [vmem:[#allocation19 + $0x310] ss:$28 sps:$4 sm:$0xff]  }
 0x521   : > { %6285 = vmatpush1.bf16.msra.mxu0 %v8272_v17  ;;  %6245 = vmatprep.subr.bf16.mxu1 %v8273_v12  ;;  %v8320_v52 = vld [vmem:[#allocation19 + $0x620] ss:$28 sps:$4 sm:$0xff]   ;;  %v8326_v33 = vld [vmem:[#allocation19 + $0x658] ss:$28 sps:$4 sm:$0xff]   ;;  %v8332_v13 = vld [vmem:[#allocation19 + $0x690] ss:$28 sps:$4 sm:$0xff]  }
 0x522   : > { %6286 = vmatprep.subr.bf16.mxu0 %v8275_v18  ;;  %v3244_v63 = vsub.f32 %v3242_v56, %v3243_v50  ;;  %v8329_v8 = vld [vmem:[#allocation19 + $0x694] ss:$28 sps:$4 sm:$0xff]   ;;  %v8333_v14 = vld [vmem:[#allocation19 + $0x34c] ss:$28 sps:$4 sm:$0xff]   ;;  %v8341_v18 = vld [vmem:[#allocation19 + $0x704] ss:$28 sps:$4 sm:$0xff]  }
 0x523   : > { %v8335_v15 = vld [vmem:[#allocation19 + $0x6cc] ss:$28 sps:$4 sm:$0xff]   ;;  %v3245_v12 = vld [vmem:[#allocation16] sm:$0xff] }
 0x524   : > { %6246 = vmatpush1.bf16.msra.mxu1 %v8277_v19  ;;  %v3246_v1 = vadd.f32 1e-05, %v3244_v63  ;;  %v8337_v16 = vld [vmem:[#allocation19 + $0x348] ss:$28 sps:$4 sm:$0xff]  }
 0x525   : > { %6287 = vmatpush1.bf16.msra.mxu0 %v8278_v20  ;;  %6247 = vmatprep.subr.bf16.mxu1 %v8279_v21  ;;  %v8338_v17 = vld [vmem:[#allocation19 + $0x6c8] ss:$28 sps:$4 sm:$0xff]   ;;  %v9752_v21 = vsub.s32 5, %v9630_v43 }
 0x526   : > { %6288 = vmatprep.subr.bf16.mxu0 %v8281_v24  ;;  %8883 = vrsqrt.f32 %v3246_v1  ;;  %v8344_v20 = vld [vmem:[#allocation19 + $0xc] ss:$28 sps:$4 sm:$0xff]  }
 0x528   : > { %6248 = vmatpush1.bf16.msra.mxu1 %v8283_v25  ;;  %v9757_v25 = vsub.s32 4, %v9630_v43 }
 0x529   : > { %6289 = vmatpush1.bf16.msra.mxu0 %v8284_v26  ;;  %6249 = vmatprep.subr.bf16.mxu1 %v8285_v27  ;;  %v3249_v26 = vld [vmem:[#allocation17] sm:$0xff] }
 0x52a   : > { %6290 = vmatprep.subr.bf16.mxu0 %v8287_v5 }
 0x52c   : > { %6250 = vmatpush1.bf16.msra.mxu1 %v8289_v28 }
 0x52d   : > { %6291 = vmatpush1.bf16.msra.mxu0 %v8290_v29  ;;  %6251 = vmatprep.subr.bf16.mxu1 %v8291_v31 }
 0x52e   : > { %6292 = vmatprep.subr.bf16.mxu0 %v8293_v32 }
 0x530   : > { %6252 = vmatpush1.bf16.msra.mxu1 %v8295_v34  ;;  %v8884_v19 = vpop.eup %8883  ;;  %v3283_v34 = vsub.s32 7, %v9630_v43 }
 0x531   : > { %6293 = vmatpush1.bf16.msra.mxu0 %v8296_v22  ;;  %6253 = vmatprep.subr.bf16.mxu1 %v8297_v30  ;;  %v9754_v24 = vmul.f32 %v8884_v19, %v3245_v12  ;;  %v8345_v19 = vld [vmem:[#allocation19 + $0x738] ss:$28 sps:$4 sm:$0xff]  }
 0x532   : > { %6294 = vmatprep.subr.bf16.mxu0 %v8299_v35 }
 0x533   : > { %v3250_v27 = vmul.f32 %v9754_v24, %v3240_v45  ;;  %v3260_v5 = vrot.slane %v9754_v24, %v9633_v57  ;;  %v3256_v28 = vrot.slane %v9754_v24, %v9636_v60  ;;  %v3268_v29 = vrot.slane %v9754_v24, %v9641_v9 }
 0x534   : > { %6254 = vmatpush1.bf16.msra.mxu1 %v8301_v36  ;;  %v3264_v31 = vrot.slane %v9754_v24, %v9644_v10  ;;  %v3276_v32 = vrot.slane %v9754_v24, %v9752_v21  ;;  %v3272_v36 = vrot.slane %v9754_v24, %v9757_v25 }
 0x535   : > { %6295 = vmatpush1.bf16.msra.mxu0 %v8302_v53  ;;  %6255 = vmatprep.subr.bf16.mxu1 %v8303_v37  ;;  %v3251_v22 = vsub.f32 %v3249_v26, %v3250_v27  ;;  %v3294_v30 = vmul.f32 %v3260_v5, %v9690_v61  ;;  %v3293_v35 = vmul.f32 %v3256_v28, %v9686_v58  ;;  %v8353_v27 = vld [vmem:[#allocation19 + $0x774] ss:$28 sps:$4 sm:$0xff]  }
 0x536   : > { %6296 = vmatprep.subr.bf16.mxu0 %v8305_v40  ;;  %v3296_v53 = vmul.f32 %v3268_v29, %v9692_v62  ;;  %v3295_v37 = vmul.f32 %v3264_v31, %v9688_v59  ;;  %v3298_v40 = vmul.f32 %v3276_v32, %v9698_v4  ;;  %v3297_v41 = vmul.f32 %v3272_v36, %v9694_v3  ;;  %v8354_v28 = vld [vmem:[#allocation19 + $0x78] ss:$28 sps:$4 sm:$0xff]   ;;  %v8359_v31 = vld [vmem:[#allocation19 + $0x7ac] ss:$28 sps:$4 sm:$0xff]   ;;  %v8363_v36 = vld [vmem:[#allocation19 + $0x7e0] ss:$28 sps:$4 sm:$0xff]  }
 0x537   : > { %v3313_v61 = vrot.slane %v3251_v22, %v9644_v10  ;;  %v3325_v58 = vrot.slane %v3251_v22, %v9752_v21  ;;  %v3321_v62 = vrot.slane %v3251_v22, %v9757_v25  ;;  %v3333_v56 = vrot.slane %v3251_v22, %v3283_v34  ;;  %v8362_v29 = vld [vmem:[#allocation19 + $0xb4] ss:$28 sps:$4 sm:$0xff]  }
 0x538   : > { %6256 = vmatpush1.bf16.msra.mxu1 %v8307_v38  ;;  %v3284_v38 = vrot.slane %v9754_v24, %v3283_v34  ;;  %v8360_v32 = vld [vmem:[#allocation19 + $0xb0] ss:$28 sps:$4 sm:$0xff]   ;;  %v8357_v34 = vld [vmem:[#allocation19 + $0x7a8] ss:$28 sps:$4 sm:$0xff]  }
 0x539   : > { %6297 = vmatpush1.bf16.msra.mxu0 %v8308_v39  ;;  %6257 = vmatprep.subr.bf16.mxu1 %v8309_v23  ;;  %v3309_v39 = vrot.slane %v3251_v22, %v9633_v57  ;;  %v3305_v23 = vrot.slane %v3251_v22, %v9636_v60  ;;  %v3344_v45 = vadd.f32 %v3313_v61, %v3295_v37  ;;  %v8371_v37 = vld [vmem:[#allocation19 + $0x81c] ss:$28 sps:$4 sm:$0xff]   ;;  %v8375_v61 = vld [vmem:[#allocation19 + $0x850] ss:$28 sps:$4 sm:$0xff]  }
 0x53a   : > { %6298 = vmatprep.subr.bf16.mxu0 %v8311_v54  ;;  %v3317_v54 = vrot.slane %v3251_v22, %v9641_v9  ;;  %v3300_v59 = vmul.f32 %v3284_v38, %v9700_v6  ;;  %v3347_v46 = vadd.f32 %v3325_v58, %v3298_v40  ;;  %v8372_v40 = vld [vmem:[#allocation19 + $0x120] ss:$28 sps:$4 sm:$0xff]   ;;  %v8369_v38 = vld [vmem:[#allocation19 + $0x818] ss:$28 sps:$4 sm:$0xff]  }
 0x53b   : > { %v3342_v4 = vadd.f32 %v3305_v23, %v3293_v35  ;;  %vm3352_vm10 = vcmp.ge.f32.partialorder %v3344_v45, 0.0  ;;  %v8366_v35 = vld [vmem:[#allocation19 + $0xe8] ss:$28 sps:$4 sm:$0xff]   ;;  %v8377_v23 = vld [vmem:[#allocation19 + $0x854] ss:$28 sps:$4 sm:$0xff]  }
 0x53c   : > { %6258 = vmatpush1.bf16.msra.mxu1 %v8313_v42  ;;  %v3343_v42 = vadd.f32 %v3309_v39, %v3294_v30  ;;  %vm3355_vm11 = vcmp.ge.f32.partialorder %v3347_v46, 0.0  ;;  %v8365_v30 = vld [vmem:[#allocation19 + $0x7e4] ss:$28 sps:$4 sm:$0xff]   ;;  %v8380_v39 = vld [vmem:[#allocation19 + $0x15c] ss:$28 sps:$4 sm:$0xff]  }
 0x53d   : > { %6299 = vmatpush1.bf16.msra.mxu0 %v8314_v44  ;;  %6259 = vmatprep.subr.bf16.mxu1 %v8315_v48  ;;  %v3345_v44 = vadd.f32 %v3317_v54, %v3296_v53  ;;  %v9787_v48 = vadd.f32 %v3321_v62, %v3297_v41  ;;  %vm3350_vm8 = vcmp.ge.f32.partialorder %v3342_v4, 0.0  ;;  %v8374_v53 = vld [vmem:[#allocation19 + $0x124] ss:$28 sps:$4 sm:$0xff]   ;;  %v8378_v54 = vld [vmem:[#allocation19 + $0x158] ss:$28 sps:$4 sm:$0xff]  }
 0x53e   : > { %6300 = vmatprep.subr.bf16.mxu0 %v8317_v49  ;;  %v9790_v49 = vsub.s32 6, %v9630_v43  ;;  %vm3351_vm7 = vcmp.ge.f32.partialorder %v3343_v42, 0.0  ;;  %v3359_v50 = vmul.f32 0.2, %v3343_v42  ;;  %v8339_v43 = vld [vmem:[#allocation19 + $0x700] ss:$28 sps:$4 sm:$0xff]  }
 0x53f   : > { %vm3353_vm9 = vcmp.ge.f32.partialorder %v3345_v44, 0.0  ;;  %v3361_v3 = vmul.f32 0.2, %v3345_v44  ;;  %v8386_v58 = vld [vmem:[#allocation19 + $0x194] ss:$28 sps:$4 sm:$0xff]   ;;  %vm3354_vm12 = vcmp.ge.f32.partialorder %v9787_v48, 0.0 }
 0x540   : > { %6260 = vmatpush1.bf16.msra.mxu1 %v8319_v51  ;;  %v3358_v51 = vmul.f32 0.2, %v3342_v4  ;;  %v3367_v6 = vsel %vm3351_vm7, %v3343_v42, %v3359_v50  ;;  %v8383_v41 = vld [vmem:[#allocation19 + $0x88c] ss:$28 sps:$4 sm:$0xff]   ;;  %v8396_v50 = vld [vmem:[#allocation19 + $0x200] ss:$28 sps:$4 sm:$0xff]  }
 0x541   : > { %6301 = vmatpush1.bf16.msra.mxu0 %v8320_v52  ;;  %6261 = vmatprep.subr.bf16.mxu1 %v8321_v55  ;;  %v3360_v52 = vmul.f32 0.2, %v3344_v45  ;;  %v9792_v55 = vpack.c.bf16 %v3367_v6, %v3367_v6  ;;  %v3369_v1 = vsel %vm3353_vm9, %v3345_v44, %v3361_v3  ;;  %v8384_v62 = vld [vmem:[#allocation19 + $0x190] ss:$28 sps:$4 sm:$0xff]   ;;  %v8390_v44 = vld [vmem:[#allocation19 + $0x1c8] ss:$28 sps:$4 sm:$0xff]  }
 0x542   : > { %6302 = vmatprep.subr.bf16.mxu0 %v8323_v0  ;;  %v3366_v63 = vsel %vm3350_vm8, %v3342_v4, %v3358_v51  ;;  %v8392_v42 = vld [vmem:[#allocation19 + $0x1cc] ss:$28 sps:$4 sm:$0xff]   ;;  %v8389_v4 = vld [vmem:[#allocation19 + $0x8c4] ss:$28 sps:$4 sm:$0xff]   ;;  %v8393_v51 = vld [vmem:[#allocation19 + $0x8f8] ss:$28 sps:$4 sm:$0xff]  }
 0x543   : > { %v9794_v0 = vpack.c.bf16 %v3366_v63, %v3366_v63  ;;  %6267 = vmatprep.mubr.bf16.mxu1 %v9792_v55  ;;  %v8404_v3 = vld [vmem:[#allocation19 + $0x23c] ss:$28 sps:$4 sm:$0xff]   ;;  %v8399_v63 = vld [vmem:[#allocation19 + $0x930] ss:$28 sps:$4 sm:$0xff]  }
 0x544   : > { %6262 = vmatpush1.bf16.msra.mxu1 %v8325_v2  ;;  %v8342_v2 = vld [vmem:[#allocation19 + $0x8] ss:$28 sps:$4 sm:$0xff]   ;;  %v8402_v6 = vld [vmem:[#allocation19 + $0x238] ss:$28 sps:$4 sm:$0xff]  }
 0x545   : > { %6303 = vmatpush1.bf16.msra.mxu0 %v8326_v33  ;;  %6263 = vmatprep.subr.bf16.mxu1 %v8327_v7  ;;  %v3368_v33 = vsel %vm3352_vm10, %v3344_v45, %v3360_v52  ;;  %v9796_v7 = vpack.c.bf16 %v3369_v1, %v3369_v1  ;;  %v8387_v45 = vld [vmem:[#allocation19 + $0x8c0] ss:$28 sps:$4 sm:$0xff]   ;;  %v8401_v52 = vld [vmem:[#allocation19 + $0x934] ss:$28 sps:$4 sm:$0xff]  }
 0x546   : > { %6304 = vmatprep.subr.bf16.mxu0 %v8329_v8  ;;  %v9798_v8 = vpack.c.bf16 %v3368_v33, %v3368_v33  ;;  %v8410_v1 = vld [vmem:[#allocation19 + $0x274] ss:$28 sps:$4 sm:$0xff]  }
 0x547   : > { %6308 = vmatprep.mubr.bf16.mxu0 %v9796_v7  ;;  %v8408_v33 = vld [vmem:[#allocation19 + $0x270] ss:$28 sps:$4 sm:$0xff]  }
 0x548   : > { %6264 = vmatpush1.bf16.msra.mxu1 %v8331_v11  ;;  %v8350_v11 = vld [vmem:[#allocation19 + $0x44] ss:$28 sps:$4 sm:$0xff]  }
 0x549   : > { %6305 = vmatpush1.bf16.msra.mxu0 %v8332_v13  ;;  %6265 = vmatprep.subr.bf16.mxu1 %v8333_v14  ;;  %v9800_v13 = vadd.f32 %v3333_v56, %v3300_v59  ;;  %v3280_v14 = vrot.slane %v9754_v24, %v9790_v49  ;;  %v8381_v59 = vld [vmem:[#allocation19 + $0x888] ss:$28 sps:$4 sm:$0xff]   ;;  %v8395_v56 = vld [vmem:[#allocation19 + $0x8fc] ss:$28 sps:$4 sm:$0xff]  }
 0x54a   : > { %6306 = vmatprep.subr.bf16.mxu0 %v8335_v15  ;;  %v8347_v15 = vld [vmem:[#allocation19 + $0x73c] ss:$28 sps:$4 sm:$0xff]  }
 0x54b   : > { %v3299_v12 = vmul.f32 %v3280_v14, %v9696_v47  ;;  %v8351_v47 = vld [vmem:[#allocation19 + $0x770] ss:$28 sps:$4 sm:$0xff]   ;;  %v8413_v14 = vld [vmem:[#allocation19 + $0x9a4] ss:$28 sps:$4 sm:$0xff]   ;;  %vm3357_vm13 = vcmp.ge.f32.partialorder %v9800_v13, 0.0 }
 0x54c   : > { %6266 = vmatpush1.bf16.msra.mxu1 %v8337_v16  ;;  %v3329_v16 = vrot.slane %v3251_v22, %v9790_v49  ;;  %v8368_v22 = vld [vmem:[#allocation19 + $0xec] ss:$28 sps:$4 sm:$0xff]  }
 0x54d   : > { %6307 = vmatpush1.bf16.msra.mxu0 %v8338_v17  ;;  %6399 = vmatprep.subr.bf16.mxu1 %v8344_v20  ;;  %v3363_v17 = vmul.f32 0.2, %v3347_v46  ;;  %v8356_v20 = vld [vmem:[#allocation19 + $0x7c] ss:$28 sps:$4 sm:$0xff]  }
 0x54e   : > { %6317 = vmatprep.subr.bf16.mxu0 %v8341_v18  ;;  %v8348_v18 = vld [vmem:[#allocation19 + $0x40] ss:$28 sps:$4 sm:$0xff]   ;;  %v9810_v26 = vadd.f32 %v3329_v16, %v3299_v12 }
 0x54f   : > { %6268 = vmatmul.mubr.bf16.vlgmr.msra.gmra.mrb[0].mxu1 %v9794_v0  ;;  %v3371_v24 = vsel %vm3355_vm11, %v3347_v46, %v3363_v17  ;;  %v8398_v46 = vld [vmem:[#allocation19 + $0x204] ss:$28 sps:$4 sm:$0xff]   ;;  %v8419_v12 = vld [vmem:[#allocation19 + $0x9dc] ss:$28 sps:$4 sm:$0xff]  }
 0x550   : > { %6309 = vmatmul.mubr.bf16.vlgmr.msra.gmra.mrb[0].mxu0 %v9798_v8  ;;  %6400 = vmatpush1.bf16.msra.mxu1 %v8342_v2  ;;  %v9812_v5 = vpack.c.bf16 %v3371_v24, %v3371_v24  ;;  %v8407_v2 = vld [vmem:[#allocation19 + $0x96c] ss:$28 sps:$4 sm:$0xff]   ;;  %v8411_v16 = vld [vmem:[#allocation19 + $0x9a0] ss:$28 sps:$4 sm:$0xff]   ;;  %v8425_v24 = vld [vmem:[#allocation19 + $0xa14] ss:$28 sps:$4 sm:$0xff]  }
 0x551   : > { %6318 = vmatpush1.bf16.msra.mxu0 %v8339_v43  ;;  %6401 = vmatprep.subr.bf16.mxu1 %v8350_v11  ;;  %v8405_v43 = vld [vmem:[#allocation19 + $0x968] ss:$28 sps:$4 sm:$0xff]   ;;  %vm3356_vm14 = vcmp.ge.f32.partialorder %v9810_v26, 0.0 }
 0x552   : > { %6319 = vmatprep.subr.bf16.mxu0 %v8347_v15  ;;  %6431 = vmatprep.mubr.bf16.mxu1 %v9792_v55  ;;  %v8416_v11 = vld [vmem:[#allocation19 + $0x2ac] ss:$28 sps:$4 sm:$0xff]   ;;  %v8422_v17 = vld [vmem:[#allocation19 + $0x2e4] ss:$28 sps:$4 sm:$0xff]  }
 0x553   : > { %6349 = vmatprep.mubr.bf16.mxu0 %v9812_v5  ;;  %v8414_v15 = vld [vmem:[#allocation19 + $0x2a8] ss:$28 sps:$4 sm:$0xff]  }
 0x554   : > { %6402 = vmatpush1.bf16.msra.mxu1 %v8348_v18  ;;  %v8420_v18 = vld [vmem:[#allocation19 + $0x2e0] ss:$28 sps:$4 sm:$0xff]  }
 0x555   : > { %6320 = vmatpush1.bf16.msra.mxu0 %v8345_v19  ;;  %6403 = vmatprep.subr.bf16.mxu1 %v8356_v20  ;;  %v8417_v19 = vld [vmem:[#allocation19 + $0x9d8] ss:$28 sps:$4 sm:$0xff]  }
 0x556   : > { %6321 = vmatprep.subr.bf16.mxu0 %v8353_v27  ;;  %v8428_v20 = vld [vmem:[#allocation19 + $0x31c] ss:$28 sps:$4 sm:$0xff]  }
 0x557   : > { %v8426_v27 = vld [vmem:[#allocation19 + $0x318] ss:$28 sps:$4 sm:$0xff]  }
 0x558   : > { %6404 = vmatpush1.bf16.msra.mxu1 %v8354_v28  ;;  %v3362_v28 = vmul.f32 0.2, %v9787_v48 }
 0x559   : > { %6322 = vmatpush1.bf16.msra.mxu0 %v8351_v47  ;;  %6405 = vmatprep.subr.bf16.mxu1 %v8362_v29  ;;  %v8423_v47 = vld [vmem:[#allocation19 + $0xa10] ss:$28 sps:$4 sm:$0xff]  }
 0x55a   : > { %6323 = vmatprep.subr.bf16.mxu0 %v8359_v31  ;;  %v8434_v29 = vld [vmem:[#allocation19 + $0x354] ss:$28 sps:$4 sm:$0xff]   ;;  %v8431_v31 = vld [vmem:[#allocation19 + $0xa4c] ss:$28 sps:$4 sm:$0xff]  }
 0x55c   : > { %6406 = vmatpush1.bf16.msra.mxu1 %v8360_v32  ;;  %v3365_v32 = vmul.f32 0.2, %v9800_v13 }
 0x55d   : > { %6324 = vmatpush1.bf16.msra.mxu0 %v8357_v34  ;;  %6407 = vmatprep.subr.bf16.mxu1 %v8368_v22  ;;  %v8432_v34 = vld [vmem:[#allocation19 + $0x350] ss:$28 sps:$4 sm:$0xff]   ;;  %v8429_v22 = vld [vmem:[#allocation19 + $0xa48] ss:$28 sps:$4 sm:$0xff]  }
 0x55e   : > { %6325 = vmatprep.subr.bf16.mxu0 %v8365_v30  ;;  %v8440_v30 = vld [vmem:[#allocation19 + $0x38c] ss:$28 sps:$4 sm:$0xff]  }
 0x560   : > { %6408 = vmatpush1.bf16.msra.mxu1 %v8366_v35  ;;  %v3370_v35 = vsel %vm3354_vm12, %v9787_v48, %v3362_v28  ;;  %v8444_v48 = vld [vmem:[#allocation19 + $0x3c0] ss:$28 sps:$4 sm:$0xff]  }
 0x561   : > { %6326 = vmatpush1.bf16.msra.mxu0 %v8363_v36  ;;  %6409 = vmatprep.subr.bf16.mxu1 %v8374_v53  ;;  %v8437_v36 = vld [vmem:[#allocation19 + $0xa84] ss:$28 sps:$4 sm:$0xff]   ;;  %v3373_v53 = vsel %vm3357_vm13, %v9800_v13, %v3365_v32  ;;  %v8441_v13 = vld [vmem:[#allocation19 + $0xab8] ss:$28 sps:$4 sm:$0xff]  }
 0x562   : > { %6327 = vmatprep.subr.bf16.mxu0 %v8371_v37  ;;  %v8438_v37 = vld [vmem:[#allocation19 + $0x388] ss:$28 sps:$4 sm:$0xff]   ;;  %v8500_v28 = vld [vmem:[#allocation19 + $0x5bc] ss:$28 sps:$4 sm:$0xff]   ;;  %v8506_v32 = vld [vmem:[#allocation19 + $0x5f4] ss:$28 sps:$4 sm:$0xff]  }
 0x564   : > { %6410 = vmatpush1.bf16.msra.mxu1 %v8372_v40  ;;  %v9822_v40 = vpack.c.bf16 %v3370_v35, %v3370_v35  ;;  %v8512_v35 = vld [vmem:[#allocation19 + $0x62c] ss:$28 sps:$4 sm:$0xff]  }
 0x565   : > { %6328 = vmatpush1.bf16.msra.mxu0 %v8369_v38  ;;  %6411 = vmatprep.subr.bf16.mxu1 %v8380_v39  ;;  %v8435_v38 = vld [vmem:[#allocation19 + $0xa80] ss:$28 sps:$4 sm:$0xff]  }
 0x566   : > { %6329 = vmatprep.subr.bf16.mxu0 %v8377_v23  ;;  %v8446_v39 = vld [vmem:[#allocation19 + $0x3c4] ss:$28 sps:$4 sm:$0xff]   ;;  %v8443_v23 = vld [vmem:[#allocation19 + $0xabc] ss:$28 sps:$4 sm:$0xff]  }
 0x568   : > { %6412 = vmatpush1.bf16.msra.mxu1 %v8378_v54  ;;  %v9824_v54 = vpack.c.bf16 %v3373_v53, %v3373_v53  ;;  %v8510_v53 = vld [vmem:[#allocation19 + $0x628] ss:$28 sps:$4 sm:$0xff]  }
 0x569   : > { %6330 = vmatpush1.bf16.msra.mxu0 %v8375_v61  ;;  %6413 = vmatprep.subr.bf16.mxu1 %v8386_v58  ;;  %v8452_v61 = vld [vmem:[#allocation19 + $0x3fc] ss:$28 sps:$4 sm:$0xff]   ;;  %v8449_v58 = vld [vmem:[#allocation19 + $0xaf4] ss:$28 sps:$4 sm:$0xff]  }
 0x56a   : > { %6331 = vmatprep.subr.bf16.mxu0 %v8383_v41  ;;  %v8450_v41 = vld [vmem:[#allocation19 + $0x3f8] ss:$28 sps:$4 sm:$0xff]  }
 0x56c   : > { %6414 = vmatpush1.bf16.msra.mxu1 %v8384_v62  ;;  %v8447_v62 = vld [vmem:[#allocation19 + $0xaf0] ss:$28 sps:$4 sm:$0xff]  }
 0x56d   : > { %6332 = vmatpush1.bf16.msra.mxu0 %v8381_v59  ;;  %6415 = vmatprep.subr.bf16.mxu1 %v8392_v42  ;;  %v8458_v59 = vld [vmem:[#allocation19 + $0x434] ss:$28 sps:$4 sm:$0xff]   ;;  %v8455_v42 = vld [vmem:[#allocation19 + $0xb2c] ss:$28 sps:$4 sm:$0xff]  }
 0x56e   : > { %6333 = vmatprep.subr.bf16.mxu0 %v8389_v4  ;;  %v8456_v4 = vld [vmem:[#allocation19 + $0x430] ss:$28 sps:$4 sm:$0xff]  }
 0x570   : > { %6416 = vmatpush1.bf16.msra.mxu1 %v8390_v44  ;;  %v8453_v44 = vld [vmem:[#allocation19 + $0xb28] ss:$28 sps:$4 sm:$0xff]  }
 0x571   : > { %6334 = vmatpush1.bf16.msra.mxu0 %v8387_v45  ;;  %6417 = vmatprep.subr.bf16.mxu1 %v8398_v46  ;;  %v8464_v45 = vld [vmem:[#allocation19 + $0x46c] ss:$28 sps:$4 sm:$0xff]   ;;  %v8461_v46 = vld [vmem:[#allocation19 + $0xb64] ss:$28 sps:$4 sm:$0xff]  }
 0x572   : > { %6335 = vmatprep.subr.bf16.mxu0 %v8395_v56  ;;  %v8462_v56 = vld [vmem:[#allocation19 + $0x468] ss:$28 sps:$4 sm:$0xff]  }
 0x574   : > { %6418 = vmatpush1.bf16.msra.mxu1 %v8396_v50  ;;  %v8459_v50 = vld [vmem:[#allocation19 + $0xb60] ss:$28 sps:$4 sm:$0xff]  }
 0x575   : > { %6336 = vmatpush1.bf16.msra.mxu0 %v8393_v51  ;;  %6419 = vmatprep.subr.bf16.mxu1 %v8404_v3  ;;  %v8470_v51 = vld [vmem:[#allocation19 + $0x4a4] ss:$28 sps:$4 sm:$0xff]   ;;  %v8467_v3 = vld [vmem:[#allocation19 + $0xb9c] ss:$28 sps:$4 sm:$0xff]  }
 0x576   : > { %6337 = vmatprep.subr.bf16.mxu0 %v8401_v52  ;;  %v8468_v52 = vld [vmem:[#allocation19 + $0x4a0] ss:$28 sps:$4 sm:$0xff]  }
 0x578   : > { %6420 = vmatpush1.bf16.msra.mxu1 %v8402_v6  ;;  %v8465_v6 = vld [vmem:[#allocation19 + $0xb98] ss:$28 sps:$4 sm:$0xff]  }
 0x579   : > { %6338 = vmatpush1.bf16.msra.mxu0 %v8399_v63  ;;  %6421 = vmatprep.subr.bf16.mxu1 %v8410_v1  ;;  %v8476_v63 = vld [vmem:[#allocation19 + $0x4dc] ss:$28 sps:$4 sm:$0xff]   ;;  %v8473_v1 = vld [vmem:[#allocation19 + $0xbd4] ss:$28 sps:$4 sm:$0xff]  }
 0x57a   : > { %6339 = vmatprep.subr.bf16.mxu0 %v8407_v2  ;;  %v8474_v2 = vld [vmem:[#allocation19 + $0x4d8] ss:$28 sps:$4 sm:$0xff]  }
 0x57c   : > { %6422 = vmatpush1.bf16.msra.mxu1 %v8408_v33  ;;  %v8471_v33 = vld [vmem:[#allocation19 + $0xbd0] ss:$28 sps:$4 sm:$0xff]  }
 0x57d   : > { %6340 = vmatpush1.bf16.msra.mxu0 %v8405_v43  ;;  %6423 = vmatprep.subr.bf16.mxu1 %v8416_v11  ;;  %v8482_v43 = vld [vmem:[#allocation19 + $0x514] ss:$28 sps:$4 sm:$0xff]   ;;  %v8479_v11 = vld [vmem:[#allocation19 + $0xc0c] ss:$28 sps:$4 sm:$0xff]  }
 0x57e   : > { %6341 = vmatprep.subr.bf16.mxu0 %v8413_v14  ;;  %v8480_v14 = vld [vmem:[#allocation19 + $0x510] ss:$28 sps:$4 sm:$0xff]  }
 0x580   : > { %6424 = vmatpush1.bf16.msra.mxu1 %v8414_v15  ;;  %v8477_v15 = vld [vmem:[#allocation19 + $0xc08] ss:$28 sps:$4 sm:$0xff]  }
 0x581   : > { %6342 = vmatpush1.bf16.msra.mxu0 %v8411_v16  ;;  %6425 = vmatprep.subr.bf16.mxu1 %v8422_v17  ;;  %v8488_v16 = vld [vmem:[#allocation19 + $0x54c] ss:$28 sps:$4 sm:$0xff]   ;;  %v8485_v17 = vld [vmem:[#allocation19 + $0xc44] ss:$28 sps:$4 sm:$0xff]  }
 0x582   : > { %6343 = vmatprep.subr.bf16.mxu0 %v8419_v12  ;;  %v8486_v12 = vld [vmem:[#allocation19 + $0x548] ss:$28 sps:$4 sm:$0xff]  }
 0x584   : > { %6426 = vmatpush1.bf16.msra.mxu1 %v8420_v18  ;;  %v8483_v18 = vld [vmem:[#allocation19 + $0xc40] ss:$28 sps:$4 sm:$0xff]  }
 0x585   : > { %6344 = vmatpush1.bf16.msra.mxu0 %v8417_v19  ;;  %6427 = vmatprep.subr.bf16.mxu1 %v8428_v20  ;;  %v8494_v19 = vld [vmem:[#allocation19 + $0x584] ss:$28 sps:$4 sm:$0xff]   ;;  %v8491_v20 = vld [vmem:[#allocation19 + $0xc7c] ss:$28 sps:$4 sm:$0xff]  }
 0x586   : > { %6345 = vmatprep.subr.bf16.mxu0 %v8425_v24  ;;  %v8492_v24 = vld [vmem:[#allocation19 + $0x580] ss:$28 sps:$4 sm:$0xff]  }
 0x588   : > { %6428 = vmatpush1.bf16.msra.mxu1 %v8426_v27  ;;  %v8489_v27 = vld [vmem:[#allocation19 + $0xc78] ss:$28 sps:$4 sm:$0xff]  }
 0x589   : > { %6346 = vmatpush1.bf16.msra.mxu0 %v8423_v47  ;;  %6429 = vmatprep.subr.bf16.mxu1 %v8434_v29  ;;  %v8497_v47 = vld [vmem:[#allocation19 + $0xcb4] ss:$28 sps:$4 sm:$0xff]  }
 0x58a   : > { %6347 = vmatprep.subr.bf16.mxu0 %v8431_v31  ;;  %v8498_v29 = vld [vmem:[#allocation19 + $0x5b8] ss:$28 sps:$4 sm:$0xff]   ;;  %v8495_v31 = vld [vmem:[#allocation19 + $0xcb0] ss:$28 sps:$4 sm:$0xff]  }
 0x58c   : > { %6430 = vmatpush1.bf16.msra.mxu1 %v8432_v34  ;;  %v8503_v34 = vld [vmem:[#allocation19 + $0xcec] ss:$28 sps:$4 sm:$0xff]  }
 0x58d   : > { %6348 = vmatpush1.bf16.msra.mxu0 %v8429_v22  ;;  %6440 = vmatprep.subr.bf16.mxu1 %v8440_v30  ;;  %v8504_v22 = vld [vmem:[#allocation19 + $0x5f0] ss:$28 sps:$4 sm:$0xff]   ;;  %v8501_v30 = vld [vmem:[#allocation19 + $0xce8] ss:$28 sps:$4 sm:$0xff]  }
 0x58e   : > { %6358 = vmatprep.subr.bf16.mxu0 %v8437_v36  ;;  %v8509_v36 = vld [vmem:[#allocation19 + $0xd24] ss:$28 sps:$4 sm:$0xff]  }
 0x58f   : > { %6432 = vmatmul.mubr.bf16.vlgmr.msra.gmra.mrb[4].mxu1 %v9794_v0 }
 0x590   : > { %6350 = vmatmul.mubr.bf16.vlgmr.msra.gmra.mrb[0].mxu0 %v9822_v40  ;;  %6441 = vmatpush1.bf16.msra.mxu1 %v8438_v37  ;;  %v8507_v37 = vld [vmem:[#allocation19 + $0xd20] ss:$28 sps:$4 sm:$0xff]  }
 0x591   : > { %6359 = vmatpush1.bf16.msra.mxu0 %v8435_v38  ;;  %6442 = vmatprep.subr.bf16.mxu1 %v8446_v39  ;;  %v8518_v38 = vld [vmem:[#allocation19 + $0x664] ss:$28 sps:$4 sm:$0xff]   ;;  %v8515_v39 = vld [vmem:[#allocation19 + $0xd5c] ss:$28 sps:$4 sm:$0xff]  }
 0x592   : > { %6360 = vmatprep.subr.bf16.mxu0 %v8443_v23  ;;  %6390 = vmatprep.mubr.bf16.mxu0 %v9824_v54  ;;  %v8516_v23 = vld [vmem:[#allocation19 + $0x660] ss:$28 sps:$4 sm:$0xff]  }
 0x593   : > { %6472 = vmatprep.mubr.bf16.mxu1 %v9796_v7 }
 0x594   : > { %6443 = vmatpush1.bf16.msra.mxu1 %v8444_v48  ;;  %v8513_v48 = vld [vmem:[#allocation19 + $0xd58] ss:$28 sps:$4 sm:$0xff]  }
 0x595   : > { %6361 = vmatpush1.bf16.msra.mxu0 %v8441_v13  ;;  %6444 = vmatprep.subr.bf16.mxu1 %v8452_v61  ;;  %v8524_v13 = vld [vmem:[#allocation19 + $0x69c] ss:$28 sps:$4 sm:$0xff]   ;;  %v8521_v61 = vld [vmem:[#allocation19 + $0xd94] ss:$28 sps:$4 sm:$0xff]  }
 0x596   : > { %6362 = vmatprep.subr.bf16.mxu0 %v8449_v58  ;;  %v8522_v58 = vld [vmem:[#allocation19 + $0x698] ss:$28 sps:$4 sm:$0xff]  }
 0x598   : > { %6445 = vmatpush1.bf16.msra.mxu1 %v8450_v41  ;;  %v3364_v41 = vmul.f32 0.2, %v9810_v26 }
 0x599   : > { %6363 = vmatpush1.bf16.msra.mxu0 %v8447_v62  ;;  %6446 = vmatprep.subr.bf16.mxu1 %v8458_v59  ;;  %v8519_v62 = vld [vmem:[#allocation19 + $0xd90] ss:$28 sps:$4 sm:$0xff]  }
 0x59a   : > { %6364 = vmatprep.subr.bf16.mxu0 %v8455_v42  ;;  %v8530_v59 = vld [vmem:[#allocation19 + $0x6d4] ss:$28 sps:$4 sm:$0xff]   ;;  %v8527_v42 = vld [vmem:[#allocation19 + $0xdcc] ss:$28 sps:$4 sm:$0xff]  }
 0x59c   : > { %6447 = vmatpush1.bf16.msra.mxu1 %v8456_v4  ;;  %v8528_v4 = vld [vmem:[#allocation19 + $0x6d0] ss:$28 sps:$4 sm:$0xff]  }
 0x59d   : > { %6365 = vmatpush1.bf16.msra.mxu0 %v8453_v44  ;;  %6448 = vmatprep.subr.bf16.mxu1 %v8464_v45  ;;  %v8525_v44 = vld [vmem:[#allocation19 + $0xdc8] ss:$28 sps:$4 sm:$0xff]   ;;  %v3372_v45 = vsel %vm3356_vm14, %v9810_v26, %v3364_v41  ;;  %v8591_v41 = vld [vmem:[#allocation19 + $0x938] ss:$28 sps:$4 sm:$0xff]  }
 0x59e   : > { %6366 = vmatprep.subr.bf16.mxu0 %v8461_v46  ;;  %v8533_v46 = vld [vmem:[#allocation19 + $0x70c] ss:$28 sps:$4 sm:$0xff]  }
 0x59f   : > { %v8540_v26 = vld [vmem:[#allocation19 + $0x48] ss:$28 sps:$4 sm:$0xff]  }
 0x5a0   : > { %6449 = vmatpush1.bf16.msra.mxu1 %v8462_v56  ;;  %v8536_v56 = vld [vmem:[#allocation19 + $0x14] ss:$28 sps:$4 sm:$0xff]  }
 0x5a1   : > { %6367 = vmatpush1.bf16.msra.mxu0 %v8459_v50  ;;  %6450 = vmatprep.subr.bf16.mxu1 %v8470_v51  ;;  %v9833_v50 = vpack.c.bf16 %v3372_v45, %v3372_v45  ;;  %v8531_v51 = vld [vmem:[#allocation19 + $0x708] ss:$28 sps:$4 sm:$0xff]  }
 0x5a2   : > { %6368 = vmatprep.subr.bf16.mxu0 %v8467_v3  ;;  %v8534_v3 = vld [vmem:[#allocation19 + $0x10] ss:$28 sps:$4 sm:$0xff]  }
 0x5a3   : > { %v8605_v45 = vld [vmem:[#allocation19 + $0x9ac] ss:$28 sps:$4 sm:$0xff]  }
 0x5a4   : > { %6451 = vmatpush1.bf16.msra.mxu1 %v8468_v52  ;;  %v8539_v52 = vld [vmem:[#allocation19 + $0x744] ss:$28 sps:$4 sm:$0xff]  }
 0x5a5   : > { %6369 = vmatpush1.bf16.msra.mxu0 %v8465_v6  ;;  %6452 = vmatprep.subr.bf16.mxu1 %v8476_v63  ;;  %v8542_v6 = vld [vmem:[#allocation19 + $0x4c] ss:$28 sps:$4 sm:$0xff]   ;;  %v8537_v63 = vld [vmem:[#allocation19 + $0x740] ss:$28 sps:$4 sm:$0xff]  }
 0x5a6   : > { %6370 = vmatprep.subr.bf16.mxu0 %v8473_v1  ;;  %v8545_v1 = vld [vmem:[#allocation19 + $0x77c] ss:$28 sps:$4 sm:$0xff]  }
 0x5a8   : > { %6453 = vmatpush1.bf16.msra.mxu1 %v8474_v2  ;;  %v8548_v2 = vld [vmem:[#allocation19 + $0x84] ss:$28 sps:$4 sm:$0xff]  }
 0x5a9   : > { %6371 = vmatpush1.bf16.msra.mxu0 %v8471_v33  ;;  %6454 = vmatprep.subr.bf16.mxu1 %v8482_v43  ;;  %v8543_v33 = vld [vmem:[#allocation19 + $0x778] ss:$28 sps:$4 sm:$0xff]   ;;  %v8546_v43 = vld [vmem:[#allocation19 + $0x80] ss:$28 sps:$4 sm:$0xff]  }
 0x5aa   : > { %6372 = vmatprep.subr.bf16.mxu0 %v8479_v11  ;;  %v8551_v11 = vld [vmem:[#allocation19 + $0x7b4] ss:$28 sps:$4 sm:$0xff]  }
 0x5ac   : > { %6455 = vmatpush1.bf16.msra.mxu1 %v8480_v14  ;;  %v8554_v14 = vld [vmem:[#allocation19 + $0xbc] ss:$28 sps:$4 sm:$0xff]  }
 0x5ad   : > { %6373 = vmatpush1.bf16.msra.mxu0 %v8477_v15  ;;  %6456 = vmatprep.subr.bf16.mxu1 %v8488_v16  ;;  %v8549_v15 = vld [vmem:[#allocation19 + $0x7b0] ss:$28 sps:$4 sm:$0xff]   ;;  %v8552_v16 = vld [vmem:[#allocation19 + $0xb8] ss:$28 sps:$4 sm:$0xff]  }
 0x5ae   : > { %6374 = vmatprep.subr.bf16.mxu0 %v8485_v17  ;;  %v8557_v17 = vld [vmem:[#allocation19 + $0x7ec] ss:$28 sps:$4 sm:$0xff]  }
 0x5b0   : > { %6457 = vmatpush1.bf16.msra.mxu1 %v8486_v12  ;;  %v8560_v12 = vld [vmem:[#allocation19 + $0xf4] ss:$28 sps:$4 sm:$0xff]  }
 0x5b1   : > { %6375 = vmatpush1.bf16.msra.mxu0 %v8483_v18  ;;  %6458 = vmatprep.subr.bf16.mxu1 %v8494_v19  ;;  %v8555_v18 = vld [vmem:[#allocation19 + $0x7e8] ss:$28 sps:$4 sm:$0xff]   ;;  %v8558_v19 = vld [vmem:[#allocation19 + $0xf0] ss:$28 sps:$4 sm:$0xff]  }
 0x5b2   : > { %6376 = vmatprep.subr.bf16.mxu0 %v8491_v20  ;;  %v8563_v20 = vld [vmem:[#allocation19 + $0x824] ss:$28 sps:$4 sm:$0xff]  }
 0x5b4   : > { %6459 = vmatpush1.bf16.msra.mxu1 %v8492_v24  ;;  %v8566_v24 = vld [vmem:[#allocation19 + $0x12c] ss:$28 sps:$4 sm:$0xff]  }
 0x5b5   : > { %6377 = vmatpush1.bf16.msra.mxu0 %v8489_v27  ;;  %6460 = vmatprep.subr.bf16.mxu1 %v8500_v28  ;;  %v8561_v27 = vld [vmem:[#allocation19 + $0x820] ss:$28 sps:$4 sm:$0xff]   ;;  %v8564_v28 = vld [vmem:[#allocation19 + $0x128] ss:$28 sps:$4 sm:$0xff]  }
 0x5b6   : > { %6378 = vmatprep.subr.bf16.mxu0 %v8497_v47  ;;  %v8569_v47 = vld [vmem:[#allocation19 + $0x85c] ss:$28 sps:$4 sm:$0xff]  }
 0x5b8   : > { %6461 = vmatpush1.bf16.msra.mxu1 %v8498_v29  ;;  %v8572_v29 = vld [vmem:[#allocation19 + $0x164] ss:$28 sps:$4 sm:$0xff]  }
 0x5b9   : > { %6379 = vmatpush1.bf16.msra.mxu0 %v8495_v31  ;;  %6462 = vmatprep.subr.bf16.mxu1 %v8506_v32  ;;  %v8567_v31 = vld [vmem:[#allocation19 + $0x858] ss:$28 sps:$4 sm:$0xff]   ;;  %v8570_v32 = vld [vmem:[#allocation19 + $0x160] ss:$28 sps:$4 sm:$0xff]  }
 0x5ba   : > { %6380 = vmatprep.subr.bf16.mxu0 %v8503_v34  ;;  %v8575_v34 = vld [vmem:[#allocation19 + $0x894] ss:$28 sps:$4 sm:$0xff]  }
 0x5bc   : > { %6463 = vmatpush1.bf16.msra.mxu1 %v8504_v22  ;;  %v8578_v22 = vld [vmem:[#allocation19 + $0x19c] ss:$28 sps:$4 sm:$0xff]  }
 0x5bd   : > { %6381 = vmatpush1.bf16.msra.mxu0 %v8501_v30  ;;  %6464 = vmatprep.subr.bf16.mxu1 %v8512_v35  ;;  %v8573_v30 = vld [vmem:[#allocation19 + $0x890] ss:$28 sps:$4 sm:$0xff]   ;;  %v8576_v35 = vld [vmem:[#allocation19 + $0x198] ss:$28 sps:$4 sm:$0xff]  }
 0x5be   : > { %6382 = vmatprep.subr.bf16.mxu0 %v8509_v36  ;;  %v8581_v36 = vld [vmem:[#allocation19 + $0x8cc] ss:$28 sps:$4 sm:$0xff]  }
 0x5c0   : > { %6465 = vmatpush1.bf16.msra.mxu1 %v8510_v53  ;;  %v8584_v53 = vld [vmem:[#allocation19 + $0x1d4] ss:$28 sps:$4 sm:$0xff]  }
 0x5c1   : > { %6383 = vmatpush1.bf16.msra.mxu0 %v8507_v37  ;;  %6466 = vmatprep.subr.bf16.mxu1 %v8518_v38  ;;  %v8579_v37 = vld [vmem:[#allocation19 + $0x8c8] ss:$28 sps:$4 sm:$0xff]   ;;  %v8582_v38 = vld [vmem:[#allocation19 + $0x1d0] ss:$28 sps:$4 sm:$0xff]  }
 0x5c2   : > { %6384 = vmatprep.subr.bf16.mxu0 %v8515_v39  ;;  %v8587_v39 = vld [vmem:[#allocation19 + $0x904] ss:$28 sps:$4 sm:$0xff]  }
 0x5c4   : > { %6467 = vmatpush1.bf16.msra.mxu1 %v8516_v23  ;;  %v8590_v23 = vld [vmem:[#allocation19 + $0x20c] ss:$28 sps:$4 sm:$0xff]  }
 0x5c5   : > { %6385 = vmatpush1.bf16.msra.mxu0 %v8513_v48  ;;  %6468 = vmatprep.subr.bf16.mxu1 %v8524_v13  ;;  %v8585_v48 = vld [vmem:[#allocation19 + $0x900] ss:$28 sps:$4 sm:$0xff]   ;;  %v8588_v13 = vld [vmem:[#allocation19 + $0x208] ss:$28 sps:$4 sm:$0xff]  }
 0x5c6   : > { %6386 = vmatprep.subr.bf16.mxu0 %v8521_v61  ;;  %v8593_v61 = vld [vmem:[#allocation19 + $0x93c] ss:$28 sps:$4 sm:$0xff]  }
 0x5c8   : > { %6469 = vmatpush1.bf16.msra.mxu1 %v8522_v58  ;;  %v8596_v58 = vld [vmem:[#allocation19 + $0x244] ss:$28 sps:$4 sm:$0xff]  }
 0x5c9   : > { %6387 = vmatpush1.bf16.msra.mxu0 %v8519_v62  ;;  %6470 = vmatprep.subr.bf16.mxu1 %v8530_v59  ;;  %v8594_v62 = vld [vmem:[#allocation19 + $0x240] ss:$28 sps:$4 sm:$0xff]   ;;  %v8599_v59 = vld [vmem:[#allocation19 + $0x974] ss:$28 sps:$4 sm:$0xff]  }
 0x5ca   : > { %6388 = vmatprep.subr.bf16.mxu0 %v8527_v42  ;;  %v8602_v42 = vld [vmem:[#allocation19 + $0x27c] ss:$28 sps:$4 sm:$0xff]  }
 0x5cc   : > { %6471 = vmatpush1.bf16.msra.mxu1 %v8528_v4  ;;  %v8597_v4 = vld [vmem:[#allocation19 + $0x970] ss:$28 sps:$4 sm:$0xff]  }
 0x5cd   : > { %6389 = vmatpush1.bf16.msra.mxu0 %v8525_v44  ;;  %6481 = vmatprep.subr.bf16.mxu1 %v8533_v46  ;;  %v8600_v44 = vld [vmem:[#allocation19 + $0x278] ss:$28 sps:$4 sm:$0xff]  }
 0x5ce   : > { %6563 = vmatprep.subr.bf16.mxu0 %v8536_v56  ;;  %v8608_v46 = vld [vmem:[#allocation19 + $0x2b4] ss:$28 sps:$4 sm:$0xff]   ;;  %v8603_v56 = vld [vmem:[#allocation19 + $0x9a8] ss:$28 sps:$4 sm:$0xff]  }
 0x5cf   : > { %6473 = vmatmul.mubr.bf16.vlgmr.msra.gmra.mrb[4].mxu1 %v9798_v8 }
 0x5d0   : > { %6391 = vmatmul.mubr.bf16.vlgmr.msra.gmra.mrb[0].mxu0 %v9833_v50  ;;  %6482 = vmatpush1.bf16.msra.mxu1 %v8531_v51  ;;  %v8606_v51 = vld [vmem:[#allocation19 + $0x2b0] ss:$28 sps:$4 sm:$0xff]  }
 0x5d1   : > { %6564 = vmatpush1.bf16.msra.mxu0 %v8534_v3  ;;  %6483 = vmatprep.subr.bf16.mxu1 %v8539_v52  ;;  %v8611_v3 = vld [vmem:[#allocation19 + $0x9e4] ss:$28 sps:$4 sm:$0xff]   ;;  %v8614_v52 = vld [vmem:[#allocation19 + $0x2ec] ss:$28 sps:$4 sm:$0xff]  }
 0x5d2   : > { %6565 = vmatprep.subr.bf16.mxu0 %v8542_v6  ;;  %6513 = vmatprep.mubr.bf16.mxu1 %v9812_v5  ;;  %v8609_v6 = vld [vmem:[#allocation19 + $0x9e0] ss:$28 sps:$4 sm:$0xff]  }
 0x5d3   : > { %6595 = vmatprep.mubr.bf16.mxu0 %v9792_v55 }
 0x5d4   : > { %6484 = vmatpush1.bf16.msra.mxu1 %v8537_v63  ;;  %v8612_v63 = vld [vmem:[#allocation19 + $0x2e8] ss:$28 sps:$4 sm:$0xff]  }
 0x5d5   : > { %6566 = vmatpush1.bf16.msra.mxu0 %v8540_v26  ;;  %6485 = vmatprep.subr.bf16.mxu1 %v8545_v1  ;;  %v8617_v26 = vld [vmem:[#allocation19 + $0xa1c] ss:$28 sps:$4 sm:$0xff]   ;;  %v8620_v1 = vld [vmem:[#allocation19 + $0x324] ss:$28 sps:$4 sm:$0xff]  }
 0x5d6   : > { %6567 = vmatprep.subr.bf16.mxu0 %v8548_v2  ;;  %v8615_v2 = vld [vmem:[#allocation19 + $0xa18] ss:$28 sps:$4 sm:$0xff]  }
 0x5d8   : > { %6486 = vmatpush1.bf16.msra.mxu1 %v8543_v33  ;;  %v8618_v33 = vld [vmem:[#allocation19 + $0x320] ss:$28 sps:$4 sm:$0xff]  }
 0x5d9   : > { %6568 = vmatpush1.bf16.msra.mxu0 %v8546_v43  ;;  %6487 = vmatprep.subr.bf16.mxu1 %v8551_v11  ;;  %v8623_v43 = vld [vmem:[#allocation19 + $0xa54] ss:$28 sps:$4 sm:$0xff]   ;;  %v8626_v11 = vld [vmem:[#allocation19 + $0x35c] ss:$28 sps:$4 sm:$0xff]  }
 0x5da   : > { %6569 = vmatprep.subr.bf16.mxu0 %v8554_v14  ;;  %v8621_v14 = vld [vmem:[#allocation19 + $0xa50] ss:$28 sps:$4 sm:$0xff]  }
 0x5dc   : > { %6488 = vmatpush1.bf16.msra.mxu1 %v8549_v15  ;;  %v8624_v15 = vld [vmem:[#allocation19 + $0x358] ss:$28 sps:$4 sm:$0xff]  }
 0x5dd   : > { %6570 = vmatpush1.bf16.msra.mxu0 %v8552_v16  ;;  %6489 = vmatprep.subr.bf16.mxu1 %v8557_v17  ;;  %v8629_v16 = vld [vmem:[#allocation19 + $0xa8c] ss:$28 sps:$4 sm:$0xff]   ;;  %v8632_v17 = vld [vmem:[#allocation19 + $0x394] ss:$28 sps:$4 sm:$0xff]  }
 0x5de   : > { %6571 = vmatprep.subr.bf16.mxu0 %v8560_v12  ;;  %v8627_v12 = vld [vmem:[#allocation19 + $0xa88] ss:$28 sps:$4 sm:$0xff]  }
 0x5e0   : > { %6490 = vmatpush1.bf16.msra.mxu1 %v8555_v18  ;;  %v8630_v18 = vld [vmem:[#allocation19 + $0x390] ss:$28 sps:$4 sm:$0xff]  }
 0x5e1   : > { %6572 = vmatpush1.bf16.msra.mxu0 %v8558_v19  ;;  %6491 = vmatprep.subr.bf16.mxu1 %v8563_v20  ;;  %v8635_v19 = vld [vmem:[#allocation19 + $0xac4] ss:$28 sps:$4 sm:$0xff]   ;;  %v8638_v20 = vld [vmem:[#allocation19 + $0x3cc] ss:$28 sps:$4 sm:$0xff]  }
 0x5e2   : > { %6573 = vmatprep.subr.bf16.mxu0 %v8566_v24  ;;  %v8633_v24 = vld [vmem:[#allocation19 + $0xac0] ss:$28 sps:$4 sm:$0xff]  }
 0x5e4   : > { %6492 = vmatpush1.bf16.msra.mxu1 %v8561_v27  ;;  %v8636_v27 = vld [vmem:[#allocation19 + $0x3c8] ss:$28 sps:$4 sm:$0xff]  }
 0x5e5   : > { %6574 = vmatpush1.bf16.msra.mxu0 %v8564_v28  ;;  %6493 = vmatprep.subr.bf16.mxu1 %v8569_v47  ;;  %v8641_v28 = vld [vmem:[#allocation19 + $0xafc] ss:$28 sps:$4 sm:$0xff]   ;;  %v8644_v47 = vld [vmem:[#allocation19 + $0x404] ss:$28 sps:$4 sm:$0xff]  }
 0x5e6   : > { %6575 = vmatprep.subr.bf16.mxu0 %v8572_v29  ;;  %v8639_v29 = vld [vmem:[#allocation19 + $0xaf8] ss:$28 sps:$4 sm:$0xff]  }
 0x5e8   : > { %6494 = vmatpush1.bf16.msra.mxu1 %v8567_v31  ;;  %v8642_v31 = vld [vmem:[#allocation19 + $0x400] ss:$28 sps:$4 sm:$0xff]  }
 0x5e9   : > { %6576 = vmatpush1.bf16.msra.mxu0 %v8570_v32  ;;  %6495 = vmatprep.subr.bf16.mxu1 %v8575_v34  ;;  %v8647_v32 = vld [vmem:[#allocation19 + $0xb34] ss:$28 sps:$4 sm:$0xff]   ;;  %v8650_v34 = vld [vmem:[#allocation19 + $0x43c] ss:$28 sps:$4 sm:$0xff]  }
 0x5ea   : > { %6577 = vmatprep.subr.bf16.mxu0 %v8578_v22  ;;  %v8645_v22 = vld [vmem:[#allocation19 + $0xb30] ss:$28 sps:$4 sm:$0xff]  }
 0x5ec   : > { %6496 = vmatpush1.bf16.msra.mxu1 %v8573_v30  ;;  %v8648_v30 = vld [vmem:[#allocation19 + $0x438] ss:$28 sps:$4 sm:$0xff]  }
 0x5ed   : > { %6578 = vmatpush1.bf16.msra.mxu0 %v8576_v35  ;;  %6497 = vmatprep.subr.bf16.mxu1 %v8581_v36  ;;  %v8653_v35 = vld [vmem:[#allocation19 + $0xb6c] ss:$28 sps:$4 sm:$0xff]   ;;  %v8656_v36 = vld [vmem:[#allocation19 + $0x474] ss:$28 sps:$4 sm:$0xff]  }
 0x5ee   : > { %6579 = vmatprep.subr.bf16.mxu0 %v8584_v53  ;;  %v8651_v53 = vld [vmem:[#allocation19 + $0xb68] ss:$28 sps:$4 sm:$0xff]  }
 0x5f0   : > { %6498 = vmatpush1.bf16.msra.mxu1 %v8579_v37  ;;  %v8654_v37 = vld [vmem:[#allocation19 + $0x470] ss:$28 sps:$4 sm:$0xff]  }
 0x5f1   : > { %6580 = vmatpush1.bf16.msra.mxu0 %v8582_v38  ;;  %6499 = vmatprep.subr.bf16.mxu1 %v8587_v39  ;;  %v8659_v38 = vld [vmem:[#allocation19 + $0xba4] ss:$28 sps:$4 sm:$0xff]  }
 0x5f2   : > { %6581 = vmatprep.subr.bf16.mxu0 %v8590_v23  ;;  %v8657_v39 = vld [vmem:[#allocation19 + $0xba0] ss:$28 sps:$4 sm:$0xff]   ;;  %v8662_v23 = vld [vmem:[#allocation19 + $0x4ac] ss:$28 sps:$4 sm:$0xff]  }
 0x5f4   : > { %6500 = vmatpush1.bf16.msra.mxu1 %v8585_v48  ;;  %v8660_v48 = vld [vmem:[#allocation19 + $0x4a8] ss:$28 sps:$4 sm:$0xff]  }
 0x5f5   : > { %6582 = vmatpush1.bf16.msra.mxu0 %v8588_v13  ;;  %6501 = vmatprep.subr.bf16.mxu1 %v8593_v61  ;;  %v8665_v13 = vld [vmem:[#allocation19 + $0xbdc] ss:$28 sps:$4 sm:$0xff]  }
 0x5f6   : > { %6583 = vmatprep.subr.bf16.mxu0 %v8596_v58  ;;  %v8663_v58 = vld [vmem:[#allocation19 + $0xbd8] ss:$28 sps:$4 sm:$0xff]  }
 0x5f8   : > { %6502 = vmatpush1.bf16.msra.mxu1 %v8591_v41  ;;  %v8668_v41 = vld [vmem:[#allocation19 + $0x4e4] ss:$28 sps:$4 sm:$0xff]  }
 0x5f9   : > { %6584 = vmatpush1.bf16.msra.mxu0 %v8594_v62  ;;  %6503 = vmatprep.subr.bf16.mxu1 %v8599_v59  ;;  %v8666_v59 = vld [vmem:[#allocation19 + $0x4e0] ss:$28 sps:$4 sm:$0xff]  }
 0x5fa   : > { %6585 = vmatprep.subr.bf16.mxu0 %v8602_v42  ;;  %v8671_v42 = vld [vmem:[#allocation19 + $0xc14] ss:$28 sps:$4 sm:$0xff]  }
 0x5fc   : > { %6504 = vmatpush1.bf16.msra.mxu1 %v8597_v4 }
 0x5fd   : > { %6586 = vmatpush1.bf16.msra.mxu0 %v8600_v44  ;;  %6505 = vmatprep.subr.bf16.mxu1 %v8605_v45  ;;  %v8669_v45 = vld [vmem:[#allocation19 + $0xc10] ss:$28 sps:$4 sm:$0xff]  }
 0x5fe   : > { %6587 = vmatprep.subr.bf16.mxu0 %v8608_v46  ;;  %v8674_v46 = vld [vmem:[#allocation19 + $0x51c] ss:$28 sps:$4 sm:$0xff]  }
 0x600   : > { %6506 = vmatpush1.bf16.msra.mxu1 %v8603_v56  ;;  %v8672_v56 = vld [vmem:[#allocation19 + $0x518] ss:$28 sps:$4 sm:$0xff]  }
 0x601   : > { %6588 = vmatpush1.bf16.msra.mxu0 %v8606_v51  ;;  %6507 = vmatprep.subr.bf16.mxu1 %v8611_v3  ;;  %v8677_v51 = vld [vmem:[#allocation19 + $0xc4c] ss:$28 sps:$4 sm:$0xff]  }
 0x602   : > { %6589 = vmatprep.subr.bf16.mxu0 %v8614_v52  ;;  %v8675_v3 = vld [vmem:[#allocation19 + $0xc48] ss:$28 sps:$4 sm:$0xff]   ;;  %v8680_v52 = vld [vmem:[#allocation19 + $0x554] ss:$28 sps:$4 sm:$0xff]  }
 0x604   : > { %6508 = vmatpush1.bf16.msra.mxu1 %v8609_v6  ;;  %v8678_v6 = vld [vmem:[#allocation19 + $0x550] ss:$28 sps:$4 sm:$0xff]  }
 0x605   : > { %6590 = vmatpush1.bf16.msra.mxu0 %v8612_v63  ;;  %6509 = vmatprep.subr.bf16.mxu1 %v8617_v26  ;;  %v8683_v63 = vld [vmem:[#allocation19 + $0xc84] ss:$28 sps:$4 sm:$0xff]  }
 0x606   : > { %6591 = vmatprep.subr.bf16.mxu0 %v8620_v1  ;;  %v8681_v26 = vld [vmem:[#allocation19 + $0xc80] ss:$28 sps:$4 sm:$0xff]   ;;  %v8686_v1 = vld [vmem:[#allocation19 + $0x58c] ss:$28 sps:$4 sm:$0xff]  }
 0x608   : > { %6510 = vmatpush1.bf16.msra.mxu1 %v8615_v2  ;;  %v8684_v2 = vld [vmem:[#allocation19 + $0x588] ss:$28 sps:$4 sm:$0xff]  }
 0x609   : > { %6592 = vmatpush1.bf16.msra.mxu0 %v8618_v33  ;;  %6511 = vmatprep.subr.bf16.mxu1 %v8623_v43  ;;  %v8689_v33 = vld [vmem:[#allocation19 + $0xcbc] ss:$28 sps:$4 sm:$0xff]   ;;  %v8692_v43 = vld [vmem:[#allocation19 + $0x5c4] ss:$28 sps:$4 sm:$0xff]  }
 0x60a   : > { %6593 = vmatprep.subr.bf16.mxu0 %v8626_v11  ;;  %v8687_v11 = vld [vmem:[#allocation19 + $0xcb8] ss:$28 sps:$4 sm:$0xff]  }
 0x60c   : > { %6512 = vmatpush1.bf16.msra.mxu1 %v8621_v14  ;;  %v8690_v14 = vld [vmem:[#allocation19 + $0x5c0] ss:$28 sps:$4 sm:$0xff]  }
 0x60d   : > { %6594 = vmatpush1.bf16.msra.mxu0 %v8624_v15  ;;  %6522 = vmatprep.subr.bf16.mxu1 %v8629_v16  ;;  %v8695_v15 = vld [vmem:[#allocation19 + $0xcf4] ss:$28 sps:$4 sm:$0xff]   ;;  %v8698_v16 = vld [vmem:[#allocation19 + $0x5fc] ss:$28 sps:$4 sm:$0xff]  }
 0x60e   : > { %6604 = vmatprep.subr.bf16.mxu0 %v8632_v17  ;;  %v8693_v17 = vld [vmem:[#allocation19 + $0xcf0] ss:$28 sps:$4 sm:$0xff]  }
 0x60f   : > { %6514 = vmatmul.mubr.bf16.vlgmr.msra.gmra.mrb[4].mxu1 %v9822_v40 }
 0x610   : > { %6523 = vmatpush1.bf16.msra.mxu1 %v8627_v12  ;;  %6596 = vmatmul.mubr.bf16.vlgmr.msra.gmra.mrb[4].mxu0 %v9794_v0  ;;  %v8696_v12 = vld [vmem:[#allocation19 + $0x5f8] ss:$28 sps:$4 sm:$0xff]  }
 0x611   : > { %6605 = vmatpush1.bf16.msra.mxu0 %v8630_v18  ;;  %6524 = vmatprep.subr.bf16.mxu1 %v8635_v19  ;;  %v8701_v18 = vld [vmem:[#allocation19 + $0xd2c] ss:$28 sps:$4 sm:$0xff]   ;;  %v8704_v19 = vld [vmem:[#allocation19 + $0x634] ss:$28 sps:$4 sm:$0xff]  }
 0x612   : > { %6606 = vmatprep.subr.bf16.mxu0 %v8638_v20  ;;  %6554 = vmatprep.mubr.bf16.mxu1 %v9824_v54  ;;  %v8699_v20 = vld [vmem:[#allocation19 + $0xd28] ss:$28 sps:$4 sm:$0xff]  }
 0x613   : > { %6636 = vmatprep.mubr.bf16.mxu0 %v9796_v7 }
 0x614   : > { %6525 = vmatpush1.bf16.msra.mxu1 %v8633_v24  ;;  %v8702_v24 = vld [vmem:[#allocation19 + $0x630] ss:$28 sps:$4 sm:$0xff]  }
 0x615   : > { %6607 = vmatpush1.bf16.msra.mxu0 %v8636_v27  ;;  %6526 = vmatprep.subr.bf16.mxu1 %v8641_v28  ;;  %v8707_v27 = vld [vmem:[#allocation19 + $0xd64] ss:$28 sps:$4 sm:$0xff]   ;;  %v8710_v28 = vld [vmem:[#allocation19 + $0x66c] ss:$28 sps:$4 sm:$0xff]  }
 0x616   : > { %6608 = vmatprep.subr.bf16.mxu0 %v8644_v47  ;;  %v8705_v47 = vld [vmem:[#allocation19 + $0xd60] ss:$28 sps:$4 sm:$0xff]  }
 0x618   : > { %6527 = vmatpush1.bf16.msra.mxu1 %v8639_v29  ;;  %v8708_v29 = vld [vmem:[#allocation19 + $0x668] ss:$28 sps:$4 sm:$0xff]  }
 0x619   : > { %6609 = vmatpush1.bf16.msra.mxu0 %v8642_v31  ;;  %6528 = vmatprep.subr.bf16.mxu1 %v8647_v32  ;;  %v8713_v31 = vld [vmem:[#allocation19 + $0xd9c] ss:$28 sps:$4 sm:$0xff]   ;;  %v8716_v32 = vld [vmem:[#allocation19 + $0x6a4] ss:$28 sps:$4 sm:$0xff]  }
 0x61a   : > { %6610 = vmatprep.subr.bf16.mxu0 %v8650_v34  ;;  %v8711_v34 = vld [vmem:[#allocation19 + $0xd98] ss:$28 sps:$4 sm:$0xff]  }
 0x61c   : > { %6529 = vmatpush1.bf16.msra.mxu1 %v8645_v22  ;;  %v8714_v22 = vld [vmem:[#allocation19 + $0x6a0] ss:$28 sps:$4 sm:$0xff]  }
 0x61d   : > { %6611 = vmatpush1.bf16.msra.mxu0 %v8648_v30  ;;  %6530 = vmatprep.subr.bf16.mxu1 %v8653_v35  ;;  %v8719_v30 = vld [vmem:[#allocation19 + $0xdd4] ss:$28 sps:$4 sm:$0xff]   ;;  %v8722_v35 = vld [vmem:[#allocation19 + $0x6dc] ss:$28 sps:$4 sm:$0xff]  }
 0x61e   : > { %6612 = vmatprep.subr.bf16.mxu0 %v8656_v36  ;;  %v8717_v36 = vld [vmem:[#allocation19 + $0xdd0] ss:$28 sps:$4 sm:$0xff]  }
 0x620   : > { %6531 = vmatpush1.bf16.msra.mxu1 %v8651_v53  ;;  %v8720_v53 = vld [vmem:[#allocation19 + $0x6d8] ss:$28 sps:$4 sm:$0xff]  }
 0x621   : > { %6613 = vmatpush1.bf16.msra.mxu0 %v8654_v37  ;;  %6532 = vmatprep.subr.bf16.mxu1 %v8659_v38  ;;  %v8726_v37 = vld [vmem:[#allocation19 + $0x1d8] ss:$28 sps:$4 sm:$0xff]  }
 0x622   : > { %v9843_v61 = vpop.f32.mrb[0].mxu1  ;;  %6614 = vmatprep.subr.bf16.mxu0 %v8662_v23  ;;  %v8725_v38 = vld [vmem:[#allocation19 + $0x714] ss:$28 sps:$4 sm:$0xff]  }
 0x623   : > { %v9845_v62 = vpop.f32.mrb[1].mxu1  ;;  %v8723_v23 = vld [vmem:[#allocation19 + $0x710] ss:$28 sps:$4 sm:$0xff]  }
 0x624   : > { %v6273_v4 = vpop.f32.mrb[2].mxu1  ;;  %6533 = vmatpush1.bf16.msra.mxu1 %v8657_v39  ;;  %v8727_v39 = vld [vmem:[#allocation19 + $0x18] ss:$28 sps:$4 sm:$0xff]  }
 0x625   : > { %6615 = vmatpush1.bf16.msra.mxu0 %v8660_v48  ;;  %v6274_v44 = vpop.f32.mrb[3].mxu1  ;;  %6534 = vmatprep.subr.bf16.mxu1 %v8665_v13  ;;  %v8731_v48 = vld [vmem:[#allocation19 + $0x210] ss:$28 sps:$4 sm:$0xff]   ;;  %v8737_v4 = vld [vmem:[#allocation19 + $0x88] ss:$28 sps:$4 sm:$0xff]  }
 0x626   : > { %6616 = vmatprep.subr.bf16.mxu0 %v8668_v41  ;;  %v8730_v13 = vld [vmem:[#allocation19 + $0x74c] ss:$28 sps:$4 sm:$0xff]   ;;  %v8733_v44 = vld [vmem:[#allocation19 + $0x780] ss:$28 sps:$4 sm:$0xff]  }
 0x627   : > { %v8728_v41 = vld [vmem:[#allocation19 + $0x748] ss:$28 sps:$4 sm:$0xff]  }
 0x628   : > { %6535 = vmatpush1.bf16.msra.mxu1 %v8663_v58  ;;  %v8732_v58 = vld [vmem:[#allocation19 + $0x50] ss:$28 sps:$4 sm:$0xff]  }
 0x629   : > { %6617 = vmatpush1.bf16.msra.mxu0 %v8666_v59  ;;  %6536 = vmatprep.subr.bf16.mxu1 %v8671_v42  ;;  %v8736_v59 = vld [vmem:[#allocation19 + $0x248] ss:$28 sps:$4 sm:$0xff]  }
 0x62a   : > { %6618 = vmatprep.subr.bf16.mxu0 %v8674_v46  ;;  %v8735_v42 = vld [vmem:[#allocation19 + $0x784] ss:$28 sps:$4 sm:$0xff]   ;;  %v8740_v46 = vld [vmem:[#allocation19 + $0x7bc] ss:$28 sps:$4 sm:$0xff]  }
 0x62c   : > { %6537 = vmatpush1.bf16.msra.mxu1 %v8669_v45  ;;  %v8741_v45 = vld [vmem:[#allocation19 + $0x280] ss:$28 sps:$4 sm:$0xff]  }
 0x62d   : > { %6619 = vmatpush1.bf16.msra.mxu0 %v8672_v56  ;;  %6538 = vmatprep.subr.bf16.mxu1 %v8677_v51  ;;  %v8742_v56 = vld [vmem:[#allocation19 + $0xc0] ss:$28 sps:$4 sm:$0xff]   ;;  %v8738_v51 = vld [vmem:[#allocation19 + $0x7b8] ss:$28 sps:$4 sm:$0xff]  }
 0x62e   : > { %6620 = vmatprep.subr.bf16.mxu0 %v8680_v52  ;;  %v8745_v52 = vld [vmem:[#allocation19 + $0x7f4] ss:$28 sps:$4 sm:$0xff]  }
 0x630   : > { %6539 = vmatpush1.bf16.msra.mxu1 %v8675_v3  ;;  %v8746_v3 = vld [vmem:[#allocation19 + $0x2b8] ss:$28 sps:$4 sm:$0xff]  }
 0x631   : > { %6621 = vmatpush1.bf16.msra.mxu0 %v8678_v6  ;;  %6540 = vmatprep.subr.bf16.mxu1 %v8683_v63  ;;  %v8743_v6 = vld [vmem:[#allocation19 + $0x7f0] ss:$28 sps:$4 sm:$0xff]  }
 0x632   : > { %6622 = vmatprep.subr.bf16.mxu0 %v8686_v1  ;;  %v8751_v63 = vld [vmem:[#allocation19 + $0x2f0] ss:$28 sps:$4 sm:$0xff]  }
 0x633   : > { %v8752_v1 = vld [vmem:[#allocation19 + $0x130] ss:$28 sps:$4 sm:$0xff]  }
 0x634   : > { %6541 = vmatpush1.bf16.msra.mxu1 %v8681_v26  ;;  %v8750_v26 = vld [vmem:[#allocation19 + $0x82c] ss:$28 sps:$4 sm:$0xff]  }
 0x635   : > { %6623 = vmatpush1.bf16.msra.mxu0 %v8684_v2  ;;  %6542 = vmatprep.subr.bf16.mxu1 %v8689_v33  ;;  %v8748_v2 = vld [vmem:[#allocation19 + $0x828] ss:$28 sps:$4 sm:$0xff]  }
 0x636   : > { %6624 = vmatprep.subr.bf16.mxu0 %v8692_v43  ;;  %v8756_v33 = vld [vmem:[#allocation19 + $0x328] ss:$28 sps:$4 sm:$0xff]  }
 0x637   : > { %v8755_v43 = vld [vmem:[#allocation19 + $0x864] ss:$28 sps:$4 sm:$0xff]  }
 0x638   : > { %6543 = vmatpush1.bf16.msra.mxu1 %v8687_v11  ;;  %v8757_v11 = vld [vmem:[#allocation19 + $0x168] ss:$28 sps:$4 sm:$0xff]  }
 0x639   : > { %6625 = vmatpush1.bf16.msra.mxu0 %v8690_v14  ;;  %6544 = vmatprep.subr.bf16.mxu1 %v8695_v15  ;;  %v8753_v14 = vld [vmem:[#allocation19 + $0x860] ss:$28 sps:$4 sm:$0xff]  }
 0x63a   : > { %6626 = vmatprep.subr.bf16.mxu0 %v8698_v16  ;;  %v8761_v15 = vld [vmem:[#allocation19 + $0x360] ss:$28 sps:$4 sm:$0xff]  }
 0x63b   : > { %v8760_v16 = vld [vmem:[#allocation19 + $0x89c] ss:$28 sps:$4 sm:$0xff]  }
 0x63c   : > { %6545 = vmatpush1.bf16.msra.mxu1 %v8693_v17  ;;  %v8762_v17 = vld [vmem:[#allocation19 + $0x1a0] ss:$28 sps:$4 sm:$0xff]  }
 0x63d   : > { %6627 = vmatpush1.bf16.msra.mxu0 %v8696_v12  ;;  %6546 = vmatprep.subr.bf16.mxu1 %v8701_v18  ;;  %v8758_v12 = vld [vmem:[#allocation19 + $0x898] ss:$28 sps:$4 sm:$0xff]  }
 0x63e   : > { %6628 = vmatprep.subr.bf16.mxu0 %v8704_v19  ;;  %v8766_v18 = vld [vmem:[#allocation19 + $0x558] ss:$28 sps:$4 sm:$0xff]  }
 0x63f   : > { %v8765_v19 = vld [vmem:[#allocation19 + $0x8d4] ss:$28 sps:$4 sm:$0xff]  }
 0x640   : > { %6547 = vmatpush1.bf16.msra.mxu1 %v8699_v20  ;;  %v8767_v20 = vld [vmem:[#allocation19 + $0x398] ss:$28 sps:$4 sm:$0xff]  }
 0x641   : > { %6629 = vmatpush1.bf16.msra.mxu0 %v8702_v24  ;;  %6548 = vmatprep.subr.bf16.mxu1 %v8707_v27  ;;  %v8763_v24 = vld [vmem:[#allocation19 + $0x8d0] ss:$28 sps:$4 sm:$0xff]  }
 0x642   : > { %6630 = vmatprep.subr.bf16.mxu0 %v8710_v28  ;;  %v8771_v27 = vld [vmem:[#allocation19 + $0x590] ss:$28 sps:$4 sm:$0xff]  }
 0x643   : > { %v8770_v28 = vld [vmem:[#allocation19 + $0x90c] ss:$28 sps:$4 sm:$0xff]  }
 0x644   : > { %6549 = vmatpush1.bf16.msra.mxu1 %v8705_v47  ;;  %v8772_v47 = vld [vmem:[#allocation19 + $0x3d0] ss:$28 sps:$4 sm:$0xff]  }
 0x645   : > { %6631 = vmatpush1.bf16.msra.mxu0 %v8708_v29  ;;  %6550 = vmatprep.subr.bf16.mxu1 %v8713_v31  ;;  %v8768_v29 = vld [vmem:[#allocation19 + $0x908] ss:$28 sps:$4 sm:$0xff]  }
 0x646   : > { %6632 = vmatprep.subr.bf16.mxu0 %v8716_v32  ;;  %v8776_v31 = vld [vmem:[#allocation19 + $0x5c8] ss:$28 sps:$4 sm:$0xff]  }
 0x647   : > { %v8775_v32 = vld [vmem:[#allocation19 + $0x944] ss:$28 sps:$4 sm:$0xff]  }
 0x648   : > { %6551 = vmatpush1.bf16.msra.mxu1 %v8711_v34  ;;  %v8777_v34 = vld [vmem:[#allocation19 + $0x408] ss:$28 sps:$4 sm:$0xff]  }
 0x649   : > { %6633 = vmatpush1.bf16.msra.mxu0 %v8714_v22  ;;  %6552 = vmatprep.subr.bf16.mxu1 %v8719_v30  ;;  %v8773_v22 = vld [vmem:[#allocation19 + $0x940] ss:$28 sps:$4 sm:$0xff]  }
 0x64a   : > { %6634 = vmatprep.subr.bf16.mxu0 %v8722_v35  ;;  %v8781_v30 = vld [vmem:[#allocation19 + $0x600] ss:$28 sps:$4 sm:$0xff]  }
 0x64b   : > { %v8780_v35 = vld [vmem:[#allocation19 + $0x97c] ss:$28 sps:$4 sm:$0xff]  }
 0x64c   : > { %6553 = vmatpush1.bf16.msra.mxu1 %v8717_v36  ;;  %v8778_v36 = vld [vmem:[#allocation19 + $0x978] ss:$28 sps:$4 sm:$0xff]  }
 0x64d   : > { %6635 = vmatpush1.bf16.msra.mxu0 %v8720_v53  ;;  %7882 = vmatprep.subr.bf16.mxu1 %v8726_v37  ;;  %v8785_v53 = vld [vmem:[#allocation19 + $0x9b4] ss:$28 sps:$4 sm:$0xff]  }
 0x64e   : > { %6645 = vmatprep.subr.bf16.mxu0 %v8725_v38  ;;  %v8787_v37 = vld [vmem:[#allocation19 + $0x478] ss:$28 sps:$4 sm:$0xff]   ;;  %v8783_v38 = vld [vmem:[#allocation19 + $0x9b0] ss:$28 sps:$4 sm:$0xff]  }
 0x64f   : > { %6555 = vmatmul.mubr.bf16.vlgmr.msra.gmra.mrb[4].mxu1 %v9833_v50 }
 0x650   : > { %6637 = vmatmul.mubr.bf16.vlgmr.msra.gmra.mrb[4].mxu0 %v9798_v8  ;;  %7883 = vmatpush3.bf16.msra.mxu1 %v8727_v39  ;;  %v8791_v39 = vld [vmem:[#allocation19 + $0x670] ss:$28 sps:$4 sm:$0xff]  }
 0x651   : > { %6646 = vmatpush1.bf16.msra.mxu0 %v8723_v23  ;;  %7884 = vmatprep.subr.bf16.mxu1 %v8731_v48  ;;  %v8790_v23 = vld [vmem:[#allocation19 + $0x9ec] ss:$28 sps:$4 sm:$0xff]  }
 0x652   : > { %6647 = vmatprep.subr.bf16.mxu0 %v8730_v13  ;;  %6759 = vmatprep.mubr.bf16.mxu1 %v9792_v55  ;;  %v8747_v55 = vld [vmem:[#allocation19 + $0xf8] ss:$28 sps:$4 sm:$0xff]   ;;  %v8792_v48 = vld [vmem:[#allocation19 + $0x4b0] ss:$28 sps:$4 sm:$0xff]   ;;  %v8788_v13 = vld [vmem:[#allocation19 + $0x9e8] ss:$28 sps:$4 sm:$0xff]  }
 0x653   : > { %6677 = vmatprep.mubr.bf16.mxu0 %v9812_v5 }
 0x654   : > { %7885 = vmatpush3.bf16.msra.mxu1 %v8732_v58  ;;  %v8796_v58 = vld [vmem:[#allocation19 + $0x6a8] ss:$28 sps:$4 sm:$0xff]  }
 0x655   : > { %6648 = vmatpush1.bf16.msra.mxu0 %v8728_v41  ;;  %7886 = vmatprep.subr.bf16.mxu1 %v8736_v59  ;;  %v8795_v41 = vld [vmem:[#allocation19 + $0xa24] ss:$28 sps:$4 sm:$0xff]  }
 0x656   : > { %6649 = vmatprep.subr.bf16.mxu0 %v8735_v42  ;;  %v8797_v59 = vld [vmem:[#allocation19 + $0x4e8] ss:$28 sps:$4 sm:$0xff]   ;;  %v8793_v42 = vld [vmem:[#allocation19 + $0xa20] ss:$28 sps:$4 sm:$0xff]  }
 0x658   : > { %7887 = vmatpush3.bf16.msra.mxu1 %v8737_v4  ;;  %v8801_v4 = vld [vmem:[#allocation19 + $0x6e0] ss:$28 sps:$4 sm:$0xff]  }
 0x659   : > { %6650 = vmatpush1.bf16.msra.mxu0 %v8733_v44  ;;  %7888 = vmatprep.subr.bf16.mxu1 %v8741_v45  ;;  %v8800_v44 = vld [vmem:[#allocation19 + $0xa5c] ss:$28 sps:$4 sm:$0xff]  }
 0x65a   : > { %6651 = vmatprep.subr.bf16.mxu0 %v8740_v46  ;;  %v8802_v45 = vld [vmem:[#allocation19 + $0x520] ss:$28 sps:$4 sm:$0xff]   ;;  %v8798_v46 = vld [vmem:[#allocation19 + $0xa58] ss:$28 sps:$4 sm:$0xff]  }
 0x65c   : > { %7889 = vmatpush3.bf16.msra.mxu1 %v8742_v56  ;;  %v8806_v56 = vld [vmem:[#allocation19 + $0x8d8] ss:$28 sps:$4 sm:$0xff]  }
 0x65d   : > { %6652 = vmatpush1.bf16.msra.mxu0 %v8738_v51  ;;  %7890 = vmatprep.subr.bf16.mxu1 %v8746_v3  ;;  %v8805_v51 = vld [vmem:[#allocation19 + $0xa94] ss:$28 sps:$4 sm:$0xff]  }
 0x65e   : > { %6653 = vmatprep.subr.bf16.mxu0 %v8745_v52  ;;  %v8807_v3 = vld [vmem:[#allocation19 + $0x718] ss:$28 sps:$4 sm:$0xff]   ;;  %v8803_v52 = vld [vmem:[#allocation19 + $0xa90] ss:$28 sps:$4 sm:$0xff]  }
 0x660   : > { %7891 = vmatpush3.bf16.msra.mxu1 %v8747_v55  ;;  %v8811_v55 = vld [vmem:[#allocation19 + $0x910] ss:$28 sps:$4 sm:$0xff]  }
 0x661   : > { %6654 = vmatpush1.bf16.msra.mxu0 %v8743_v6  ;;  %7892 = vmatprep.subr.bf16.mxu1 %v8751_v63  ;;  %v8810_v6 = vld [vmem:[#allocation19 + $0xacc] ss:$28 sps:$4 sm:$0xff]  }
 0x662   : > { %6655 = vmatprep.subr.bf16.mxu0 %v8750_v26  ;;  %v8812_v63 = vld [vmem:[#allocation19 + $0x750] ss:$28 sps:$4 sm:$0xff]   ;;  %v8808_v26 = vld [vmem:[#allocation19 + $0xac8] ss:$28 sps:$4 sm:$0xff]  }
 0x664   : > { %7893 = vmatpush3.bf16.msra.mxu1 %v8752_v1  ;;  %v8816_v1 = vld [vmem:[#allocation19 + $0x948] ss:$28 sps:$4 sm:$0xff]  }
 0x665   : > { %6656 = vmatpush1.bf16.msra.mxu0 %v8748_v2  ;;  %7894 = vmatprep.subr.bf16.mxu1 %v8756_v33  ;;  %v8815_v2 = vld [vmem:[#allocation19 + $0xb04] ss:$28 sps:$4 sm:$0xff]  }
 0x666   : > { %6657 = vmatprep.subr.bf16.mxu0 %v8755_v43  ;;  %v8817_v33 = vld [vmem:[#allocation19 + $0x788] ss:$28 sps:$4 sm:$0xff]   ;;  %v8813_v43 = vld [vmem:[#allocation19 + $0xb00] ss:$28 sps:$4 sm:$0xff]  }
 0x668   : > { %7895 = vmatpush3.bf16.msra.mxu1 %v8757_v11  ;;  %v8820_v11 = vld [vmem:[#allocation19 + $0xb3c] ss:$28 sps:$4 sm:$0xff]  }
 0x669   : > { %6658 = vmatpush1.bf16.msra.mxu0 %v8753_v14  ;;  %7896 = vmatprep.subr.bf16.mxu1 %v8761_v15  ;;  %v8822_v14 = vld [vmem:[#allocation19 + $0x7c0] ss:$28 sps:$4 sm:$0xff]   ;;  %v8818_v15 = vld [vmem:[#allocation19 + $0xb38] ss:$28 sps:$4 sm:$0xff]  }
 0x66a   : > { %6659 = vmatprep.subr.bf16.mxu0 %v8760_v16  ;;  %v8826_v16 = vld [vmem:[#allocation19 + $0x9b8] ss:$28 sps:$4 sm:$0xff]  }
 0x66c   : > { %7897 = vmatpush3.bf16.msra.mxu1 %v8762_v17  ;;  %v8825_v17 = vld [vmem:[#allocation19 + $0xb74] ss:$28 sps:$4 sm:$0xff]  }
 0x66d   : > { %6660 = vmatpush1.bf16.msra.mxu0 %v8758_v12  ;;  %7904 = vmatprep.subr.bf16.mxu1 %v8766_v18  ;;  %v9857_v12 = vld [vmem:[#allocation20] sm:$0xff]  ;;  %v8823_v18 = vld [vmem:[#allocation19 + $0xb70] ss:$28 sps:$4 sm:$0xff]  }
 0x66e   : > { %6661 = vmatprep.subr.bf16.mxu0 %v8765_v19  ;;  %v8831_v19 = vld [vmem:[#allocation19 + $0x9f0] ss:$28 sps:$4 sm:$0xff]  }
 0x66f   : > { %6760 = vmatmul.mubr.bf16.vlgmr.msra.gmra.mrb[8].mxu1 %v9794_v0  ;;  %v8782_v0 = vld [vmem:[#allocation19 + $0x440] ss:$28 sps:$4 sm:$0xff]  }
 0x670   : > { %7905 = vmatpush3.bf16.msra.mxu1 %v8767_v20  ;;  %6799 = vmatprep.mubr.bf16.mxu1 %v9796_v7  ;;  %v8786_v7 = vld [vmem:[#allocation19 + $0x638] ss:$28 sps:$4 sm:$0xff]   ;;  %v3899_v20 = vrot.slane %v9857_v12, %v9636_v60 }
 0x671   : > { %6662 = vmatpush1.bf16.msra.mxu0 %v8763_v24  ;;  %7906 = vmatprep.subr.bf16.mxu1 %v8771_v27  ;;  %v8830_v24 = vld [vmem:[#allocation19 + $0xbac] ss:$28 sps:$4 sm:$0xff]   ;;  %v3903_v27 = vrot.slane %v9857_v12, %v9633_v57  ;;  %v8833_v57 = vld [vmem:[#allocation19 + $0xbe0] ss:$28 sps:$4 sm:$0xff]  }
 0x672   : > { %6663 = vmatprep.subr.bf16.mxu0 %v8770_v28  ;;  %v8832_v28 = vld [vmem:[#allocation19 + $0x830] ss:$28 sps:$4 sm:$0xff]  }
 0x674   : > { %7907 = vmatpush3.bf16.msra.mxu1 %v8772_v47  ;;  %v8828_v47 = vld [vmem:[#allocation19 + $0xba8] ss:$28 sps:$4 sm:$0xff]  }
 0x675   : > { %6664 = vmatpush1.bf16.msra.mxu0 %v8768_v29  ;;  %7908 = vmatprep.subr.bf16.mxu1 %v8776_v31  ;;  %v8836_v29 = vld [vmem:[#allocation19 + $0xa28] ss:$28 sps:$4 sm:$0xff]   ;;  %v6270_v31 = vadd.f32 %v9843_v61, %v3899_v20  ;;  %v8842_v61 = vld [vmem:[#allocation19 + $0x8a0] ss:$28 sps:$4 sm:$0xff]   ;;  %v3911_v20 = vrot.slane %v9857_v12, %v9641_v9 }
 0x676   : > { %6665 = vmatprep.subr.bf16.mxu0 %v8775_v32  ;;  %v8835_v32 = vld [vmem:[#allocation19 + $0xbe4] ss:$28 sps:$4 sm:$0xff]  }
 0x678   : > { %7909 = vmatpush3.bf16.msra.mxu1 %v8777_v34  ;;  %v6272_v34 = vadd.f32 %v9845_v62, %v3903_v27  ;;  %v8838_v62 = vld [vmem:[#allocation19 + $0xc18] ss:$28 sps:$4 sm:$0xff]  }
 0x679   : > { %6666 = vmatpush1.bf16.msra.mxu0 %v8773_v22  ;;  %7910 = vmatprep.subr.bf16.mxu1 %v8781_v30 }
 0x67a   : > { %6667 = vmatprep.subr.bf16.mxu0 %v8780_v35  ;;  %v8837_v35 = vld [vmem:[#allocation19 + $0x868] ss:$28 sps:$4 sm:$0xff]  }
 0x67c   : > { %7911 = vmatpush3.bf16.msra.mxu1 %v8782_v0 }
 0x67d   : > { %6668 = vmatpush1.bf16.msra.mxu0 %v8778_v36  ;;  %7912 = vmatprep.subr.bf16.mxu1 %v8786_v7  ;;  %v8841_v7 = vld [vmem:[#allocation19 + $0xa60] ss:$28 sps:$4 sm:$0xff]  }
 0x67e   : > { %6669 = vmatprep.subr.bf16.mxu0 %v8785_v53 }
 0x680   : > { %7913 = vmatpush3.bf16.msra.mxu1 %v8787_v37  ;;  %v8840_v37 = vld [vmem:[#allocation19 + $0xc1c] ss:$28 sps:$4 sm:$0xff]  }
 0x681   : > { %6670 = vmatpush1.bf16.msra.mxu0 %v8783_v38  ;;  %7914 = vmatprep.subr.bf16.mxu1 %v8791_v39  ;;  %v8846_v38 = vld [vmem:[#allocation19 + $0xc58] ss:$28 sps:$4 sm:$0xff]  }
 0x682   : > { %6671 = vmatprep.subr.bf16.mxu0 %v8790_v23  ;;  %v8845_v39 = vld [vmem:[#allocation19 + $0xc54] ss:$28 sps:$4 sm:$0xff]  }
 0x683   : > { %v8847_v23 = vld [vmem:[#allocation19 + $0xa98] ss:$28 sps:$4 sm:$0xff]  }
 0x684   : > { %7915 = vmatpush3.bf16.msra.mxu1 %v8792_v48  ;;  %v8843_v48 = vld [vmem:[#allocation19 + $0xc50] ss:$28 sps:$4 sm:$0xff]  }
 0x685   : > { %6672 = vmatpush1.bf16.msra.mxu0 %v8788_v13  ;;  %7916 = vmatprep.subr.bf16.mxu1 %v8796_v58  ;;  %v8851_v13 = vld [vmem:[#allocation19 + $0xc90] ss:$28 sps:$4 sm:$0xff]  }
 0x686   : > { %6673 = vmatprep.subr.bf16.mxu0 %v8795_v41  ;;  %v8850_v58 = vld [vmem:[#allocation19 + $0xc8c] ss:$28 sps:$4 sm:$0xff]  }
 0x688   : > { %7917 = vmatpush3.bf16.msra.mxu1 %v8797_v59  ;;  %v8852_v59 = vld [vmem:[#allocation19 + $0xad0] ss:$28 sps:$4 sm:$0xff]  }
 0x689   : > { %6674 = vmatpush1.bf16.msra.mxu0 %v8793_v42  ;;  %7918 = vmatprep.subr.bf16.mxu1 %v8801_v4  ;;  %v8848_v4 = vld [vmem:[#allocation19 + $0xc88] ss:$28 sps:$4 sm:$0xff]  }
 0x68a   : > { %6675 = vmatprep.subr.bf16.mxu0 %v8800_v44  ;;  %v8856_v44 = vld [vmem:[#allocation19 + $0xcc8] ss:$28 sps:$4 sm:$0xff]  }
 0x68c   : > { %7919 = vmatpush3.bf16.msra.mxu1 %v8802_v45 }
 0x68d   : > { %6676 = vmatpush1.bf16.msra.mxu0 %v8798_v46  ;;  %7926 = vmatprep.subr.bf16.mxu1 %v8806_v56  ;;  %v8855_v46 = vld [vmem:[#allocation19 + $0xcc4] ss:$28 sps:$4 sm:$0xff]  }
 0x68e   : > { %6686 = vmatprep.subr.bf16.mxu0 %v8805_v51  ;;  %v8857_v56 = vld [vmem:[#allocation19 + $0xb08] ss:$28 sps:$4 sm:$0xff]   ;;  %v8861_v51 = vld [vmem:[#allocation19 + $0xd00] ss:$28 sps:$4 sm:$0xff]  }
 0x68f   : > { %6800 = vmatmul.mubr.bf16.vlgmr.msra.gmra.mrb[12].mxu1 %v9798_v8  ;;  %v8821_v8 = vld [vmem:[#allocation19 + $0x980] ss:$28 sps:$4 sm:$0xff]  }
 0x690   : > { %6678 = vmatmul.mubr.bf16.vlgmr.msra.gmra.mrb[4].mxu0 %v9822_v40  ;;  %7927 = vmatpush3.bf16.msra.mxu1 %v8807_v3  ;;  %v8862_v3 = vld [vmem:[#allocation19 + $0xb40] ss:$28 sps:$4 sm:$0xff]  }
 0x691   : > { %6687 = vmatpush1.bf16.msra.mxu0 %v8803_v52  ;;  %7928 = vmatprep.subr.bf16.mxu1 %v8811_v55  ;;  %v8858_v52 = vld [vmem:[#allocation19 + $0xcf8] ss:$28 sps:$4 sm:$0xff]  }
 0x692   : > { %6688 = vmatprep.subr.bf16.mxu0 %v8810_v6  ;;  %6839 = vmatprep.mubr.bf16.mxu1 %v9812_v5  ;;  %v8827_v5 = vld [vmem:[#allocation19 + $0x7f8] ss:$28 sps:$4 sm:$0xff]  }
 0x693   : > { %6718 = vmatprep.mubr.bf16.mxu0 %v9824_v54  ;;  %v8866_v55 = vld [vmem:[#allocation19 + $0xd38] ss:$28 sps:$4 sm:$0xff]  }
 0x694   : > { %7929 = vmatpush3.bf16.msra.mxu1 %v8812_v63  ;;  %v8865_v6 = vld [vmem:[#allocation19 + $0xd34] ss:$28 sps:$4 sm:$0xff]  }
 0x695   : > { %6689 = vmatpush1.bf16.msra.mxu0 %v8808_v26  ;;  %7930 = vmatprep.subr.bf16.mxu1 %v8816_v1  ;;  %v8867_v63 = vld [vmem:[#allocation19 + $0xb78] ss:$28 sps:$4 sm:$0xff]   ;;  %v8863_v26 = vld [vmem:[#allocation19 + $0xd30] ss:$28 sps:$4 sm:$0xff]  }
 0x696   : > { %6690 = vmatprep.subr.bf16.mxu0 %v8815_v2  ;;  %v8871_v1 = vld [vmem:[#allocation19 + $0xd70] ss:$28 sps:$4 sm:$0xff]  }
 0x697   : > { %v8870_v2 = vld [vmem:[#allocation19 + $0xd6c] ss:$28 sps:$4 sm:$0xff]  }
 0x698   : > { %7931 = vmatpush3.bf16.msra.mxu1 %v8817_v33  ;;  %v8872_v33 = vld [vmem:[#allocation19 + $0xbb0] ss:$28 sps:$4 sm:$0xff]  }
 0x699   : > { %6691 = vmatpush1.bf16.msra.mxu0 %v8813_v43  ;;  %7932 = vmatprep.subr.bf16.mxu1 %v8821_v8  ;;  %v8868_v43 = vld [vmem:[#allocation19 + $0xd68] ss:$28 sps:$4 sm:$0xff]  }
 0x69a   : > { %6692 = vmatprep.subr.bf16.mxu0 %v8820_v11  ;;  %v8876_v8 = vld [vmem:[#allocation19 + $0xda8] ss:$28 sps:$4 sm:$0xff]  }
 0x69b   : > { %v8875_v11 = vld [vmem:[#allocation19 + $0xda4] ss:$28 sps:$4 sm:$0xff]  }
 0x69c   : > { %7933 = vmatpush3.bf16.msra.mxu1 %v8822_v14  ;;  %v8877_v14 = vld [vmem:[#allocation19 + $0xbe8] ss:$28 sps:$4 sm:$0xff]  }
 0x69d   : > { %6693 = vmatpush1.bf16.msra.mxu0 %v8818_v15  ;;  %7934 = vmatprep.subr.bf16.mxu1 %v8826_v16  ;;  %v8873_v15 = vld [vmem:[#allocation19 + $0xda0] ss:$28 sps:$4 sm:$0xff]  }
 0x69e   : > { %6694 = vmatprep.subr.bf16.mxu0 %v8825_v17  ;;  %v8881_v16 = vld [vmem:[#allocation19 + $0xde0] ss:$28 sps:$4 sm:$0xff]  }
 0x69f   : > { %v8880_v17 = vld [vmem:[#allocation19 + $0xddc] ss:$28 sps:$4 sm:$0xff]  }
 0x6a0   : > { %7935 = vmatpush3.bf16.msra.mxu1 %v8827_v5  ;;  %v8882_v5 = vld [vmem:[#allocation19 + $0xc20] ss:$28 sps:$4 sm:$0xff]  }
 0x6a1   : > { %6695 = vmatpush1.bf16.msra.mxu0 %v8823_v18  ;;  %7936 = vmatprep.subr.bf16.mxu1 %v8831_v19  ;;  %v8878_v18 = vld [vmem:[#allocation19 + $0xdd8] ss:$28 sps:$4 sm:$0xff]   ;;  %v3907_v19 = vrot.slane %v9857_v12, %v9644_v10 }
 0x6a2   : > { %6696 = vmatprep.subr.bf16.mxu0 %v8830_v24 }
 0x6a3   : > { %v6392_v22 = vpop.f32.mrb[0].mxu0 }
 0x6a4   : > { %v8007_v30 = vadd.f32 %v6392_v22, %v6270_v31  ;;  %v6394_v60 = vpop.f32.mrb[1].mxu0  ;;  %7937 = vmatpush3.bf16.msra.mxu1 %v8832_v28 }
 0x6a5   : > { %v8009_v0 = vadd.f32 %v6394_v60, %v6272_v34  ;;  %v6396_v36 = vpop.f32.mrb[2].mxu0  ;;  %6697 = vmatpush1.bf16.msra.mxu0 %v8828_v47  ;;  %7938 = vmatprep.subr.bf16.mxu1 %v8836_v29 }
 0x6a6   : > { %8885 = vtanh.f32 %v8007_v30  ;;  %v6397_v53 = vpop.f32.mrb[3].mxu0  ;;  %6698 = vmatprep.subr.bf16.mxu0 %v8835_v32 }
 0x6a7   : > { %8887 = vtanh.f32 %v8009_v0 }
 0x6a8   : > { %7939 = vmatpush3.bf16.msra.mxu1 %v8837_v35  ;;  %v3923_v35 = vrot.slane %v9857_v12, %v9790_v49 }
 0x6a9   : > { %6699 = vmatpush1.bf16.msra.mxu0 %v8833_v57  ;;  %7940 = vmatprep.subr.bf16.mxu1 %v8841_v7 }
 0x6aa   : > { %6700 = vmatprep.subr.bf16.mxu0 %v8840_v37 }
 0x6ac   : > { %7941 = vmatpush3.bf16.msra.mxu1 %v8842_v61 }
 0x6ad   : > { %6701 = vmatpush1.bf16.msra.mxu0 %v8838_v62  ;;  %7948 = vmatprep.subr.bf16.mxu1 %v8846_v38 }
 0x6ae   : > { %6702 = vmatprep.subr.bf16.mxu0 %v8845_v39 }
 0x6af   : > { %6840 = vmatmul.mubr.bf16.vlgmr.msra.gmra.mrb[16].mxu1 %v9822_v40  ;;  %v8853_v40 = vld [vmem:[#allocation19 + $0xcc0] ss:$28 sps:$4 sm:$0xff]  }
 0x6b0   : > { %v8886_v41 = vpop.eup %8885  ;;  %7949 = vmatpush3.bf16.msra.mxu1 %v8847_v23  ;;  %6879 = vmatprep.mubr.bf16.mxu1 %v9824_v54  ;;  %v8860_v54 = vld [vmem:[#allocation19 + $0xcfc] ss:$28 sps:$4 sm:$0xff]  }
 0x6b1   : > { %v8888_v42 = vpop.eup %8887  ;;  %6703 = vmatpush1.bf16.msra.mxu0 %v8843_v48  ;;  %7950 = vmatprep.subr.bf16.mxu1 %v8851_v13 }
 0x6b2   : > { %v7869_v45 = vpack.c.bf16 %v8888_v42, %v8886_v41  ;;  %6704 = vmatprep.subr.bf16.mxu0 %v8850_v58  ;;  %v3915_v58 = vrot.slane %v9857_v12, %v9757_v25  ;;  %v3919_v41 = vrot.slane %v9857_v12, %v9752_v21 }
 0x6b4   : > { %6923 = vst [vmem:[%s9911_s11] sm:$0xff] %v7869_v45  ;;  %7951 = vmatpush3.bf16.msra.mxu1 %v8852_v59 }
 0x6b5   : > { %6705 = vmatpush1.bf16.msra.mxu0 %v8848_v4  ;;  %7952 = vmatprep.subr.bf16.mxu1 %v8856_v44 }
 0x6b6   : > { %6706 = vmatprep.subr.bf16.mxu0 %v8855_v46 }
 0x6b8   : > { %7953 = vmatpush3.bf16.msra.mxu1 %v8857_v56 }
 0x6b9   : > { %6707 = vmatpush1.bf16.msra.mxu0 %v8853_v40  ;;  %7954 = vmatprep.subr.bf16.mxu1 %v8861_v51 }
 0x6ba   : > { %6708 = vmatprep.subr.bf16.mxu0 %v8860_v54 }
 0x6bc   : > { %7955 = vmatpush3.bf16.msra.mxu1 %v8862_v3 }
 0x6bd   : > { %6709 = vmatpush1.bf16.msra.mxu0 %v8858_v52  ;;  %7956 = vmatprep.subr.bf16.mxu1 %v8866_v55 }
 0x6be   : > { %6710 = vmatprep.subr.bf16.mxu0 %v8865_v6 }
 0x6c0   : > { %7957 = vmatpush3.bf16.msra.mxu1 %v8867_v63 }
 0x6c1   : > { %6711 = vmatpush1.bf16.msra.mxu0 %v8863_v26  ;;  %7958 = vmatprep.subr.bf16.mxu1 %v8871_v1 }
 0x6c2   : > { %6712 = vmatprep.subr.bf16.mxu0 %v8870_v2 }
 0x6c4   : > { %7959 = vmatpush3.bf16.msra.mxu1 %v8872_v33 }
 0x6c5   : > { %6713 = vmatpush1.bf16.msra.mxu0 %v8868_v43  ;;  %7960 = vmatprep.subr.bf16.mxu1 %v8876_v8 }
 0x6c6   : > { %6714 = vmatprep.subr.bf16.mxu0 %v8875_v11 }
 0x6c8   : > { %7961 = vmatpush3.bf16.msra.mxu1 %v8877_v14 }
 0x6c9   : > { %6715 = vmatpush1.bf16.msra.mxu0 %v8873_v15  ;;  %7962 = vmatprep.subr.bf16.mxu1 %v8881_v16 }
 0x6ca   : > { %6716 = vmatprep.subr.bf16.mxu0 %v8880_v17 }
 0x6cc   : > { %7963 = vmatpush3.bf16.msra.mxu1 %v8882_v5 }
 0x6cd   : > { %6717 = vmatpush1.bf16.msra.mxu0 %v8878_v18 }
 0x6cf   : > { %6880 = vmatmul.mubr.bf16.vlgmr.msra.gmra.mrb[20].mxu1 %v9833_v50 }
 0x6d0   : > { %6719 = vmatmul.mubr.bf16.vlgmr.msra.gmra.mrb[4].mxu0 %v9833_v50 }
 0x722   : > { %v6556_v24 = vpop.f32.mrb[4].mxu1 }
 0x723   : > { %v8010_v27 = vadd.f32 %v6556_v24, %v3907_v19  ;;  %v6558_v28 = vpop.f32.mrb[5].mxu1 }
 0x724   : > { %v8011_v47 = vadd.f32 %v6558_v28, %v3911_v20  ;;  %v6560_v29 = vpop.f32.mrb[6].mxu1 }
 0x725   : > { %8889 = vtanh.f32 %v8010_v27  ;;  %v6561_v31 = vpop.f32.mrb[7].mxu1 }
 0x726   : > { %8891 = vtanh.f32 %v8011_v47 }
 0x72f   : > { %v8890_v32 = vpop.eup %8889 }
 0x730   : > { %v8892_v34 = vpop.eup %8891 }
 0x731   : > { %v7870_v22 = vpack.c.bf16 %v8892_v34, %v8890_v32 }
 0x733   : > { %6924 = vst [vmem:[%s9911_s11 + $0x8] sm:$0xff] %v7870_v22 }
 0x742   : > { %v7898_v50 = vpop.f32.mrb[8].mxu1 }
 0x743   : > { %v7899_v10 = vpop.f32.mrb[9].mxu1 }
 0x744   : > { %v7900_v30 = vadd.f32 %v7899_v10, %v7898_v50  ;;  %v7901_v60 = vpop.f32.mrb[10].mxu1 }
 0x745   : > { %v7902_v9 = vpop.f32.mrb[11].mxu1 }
 0x746   : > { %v6762_v57 = vadd.f32 %v7900_v30, %v3923_v35 }
 0x762   : > { %v7920_v0 = vpop.f32.mrb[12].mxu1 }
 0x763   : > { %v7921_v36 = vpop.f32.mrb[13].mxu1 }
 0x764   : > { %v7922_v7 = vadd.f32 %v7921_v36, %v7920_v0  ;;  %v7923_v53 = vpop.f32.mrb[14].mxu1 }
 0x765   : > { %v7924_v37 = vpop.f32.mrb[15].mxu1 }
 0x766   : > { %v6802_v61 = vadd.f32 %v7922_v7, %v6762_v57 }
 0x782   : > { %v7942_v62 = vpop.f32.mrb[16].mxu1 }
 0x783   : > { %v7943_v38 = vpop.f32.mrb[17].mxu1 }
 0x784   : > { %v7944_v39 = vadd.f32 %v7943_v38, %v7942_v62  ;;  %v7945_v23 = vpop.f32.mrb[18].mxu1 }
 0x785   : > { %v7946_v48 = vpop.f32.mrb[19].mxu1 }
 0x786   : > { %v6842_v13 = vadd.f32 %v7944_v39, %v6802_v61 }
 0x7a2   : > { %v7964_v49 = vpop.f32.mrb[20].mxu1 }
 0x7a3   : > { %v6720_v59 = vpop.f32.mrb[4].mxu0  ;;  %v7965_v42 = vpop.f32.mrb[21].mxu1 }
 0x7a4   : > { %v8012_v4 = vadd.f32 %v6720_v59, %v3915_v58  ;;  %v6722_v44 = vpop.f32.mrb[5].mxu0  ;;  %v7966_v45 = vadd.f32 %v7965_v42, %v7964_v49  ;;  %v7967_v46 = vpop.f32.mrb[22].mxu1 }
 0x7a5   : > { %v8013_v56 = vadd.f32 %v6722_v44, %v3919_v41  ;;  %v6724_v40 = vpop.f32.mrb[6].mxu0  ;;  %v7968_v51 = vpop.f32.mrb[23].mxu1 }
 0x7a6   : > { %8893 = vtanh.f32 %v8012_v4  ;;  %v6882_v54 = vadd.f32 %v7966_v45, %v6842_v13  ;;  %v6725_v3 = vpop.f32.mrb[7].mxu0 }
 0x7a7   : > { %8895 = vtanh.f32 %v8013_v56 }
 0x7a8   : > { %8897 = vtanh.f32 %v6882_v54 }
 0x7b0   : > { %v8894_v52 = vpop.eup %8893 }
 0x7b1   : > { %v8896_v25 = vpop.eup %8895 }
 0x7b2   : > { %v8898_v55 = vpop.eup %8897  ;;  %v7871_v6 = vpack.c.bf16 %v8896_v25, %v8894_v52 }
 0x7b3   : > { %v7872_v21 = vpack.c.bf16 %v8898_v55, %v8898_v55 }
 0x7b4   : > { %6925 = vst [vmem:[%s9911_s11 + $0x10] sm:$0xff] %v7871_v6 }
 0x7b5   : > { %6926 = vst [vmem:[%s9911_s11 + $0x18] sm:$0xf] %v7872_v21 }
 0x7b6 PF: > { %s9933_s14 = sld [smem:[#allocation28_spill]]  ;;  %s9934_s17 = smov %s9221_s18 }
 0x7b7   : > { %s9935_s18 = smov %s9938_s19 }
 0x7bc   : > { %s27_s27 = sadd.s32 1, %s9933_s14  }
 0x7bd   : > { %p24_p4 = scmp.ge.s32.totalorder %s27_s27, 5   ;;  %s9936_s19 = smov %s27_s27 }
 0x7bf   :  { %26 = sbr.rel (!%p24_p4) target bundleno = 12 (0xc), region = 155 }
 0x7c6   :  { %6948 = vsyncpa [#allocation7], 1 }
 0x7c7   :  { %6950 = vsyncpa [#allocation7 + $0x1], 1 }
 0x7c8   :  { %6951 = vsyncpa [#allocation9], 1 }
 0x7c9   :  { %6952 = vsyncpa [#allocation12], 1 }
 0x7ca   :  { %6953 = vsyncpa [#allocation15], 1 }
 0x7cb   :  { %6954 = vsyncpa [#allocation18], 1 }
 0x7cc   :  { %6955 = vsyncpa [#allocation21], 1 }

</bundles_post_ra>
